<compile_context>
chip_gen: v7x
topology: tpu7x:2x2x1
jax: 0.10.0
libtpu: 0.0.40
codegen_flags: <defaults>
</compile_context>

<pallas_src>
import functools

import jax
import jax.numpy as jnp
from jax.experimental import pallas as pl
from jax.experimental.pallas import tpu as pltpu

COMPUTE_DTYPE = jnp.bfloat16   # MXU operand dtype
LN_EPS = 1e-5                  # PyTorch nn.LayerNorm default
TM_CAP = 256                   # projection row-tile cap (sublane aligned)
TK_CAP = 512                   # projection contraction / FFN hidden tile cap
ATTN_TQ_CAP = 128              # attention q row-tile cap (flash)
ATTN_TK_CAP = 256              # attention key/value tile cap (flash)
VMEM_LIMIT = 48 * 1024 * 1024  # explicit scoped-VMEM budget (v7x-safe)


def _cparams(dims):
    return pltpu.CompilerParams(dimension_semantics=dims,
                                vmem_limit_bytes=VMEM_LIMIT)


# ----------------------------------------------------------------------------
# Tile pickers (always return a divisor of `dim`, keeping (8,128) alignment;
# fall back to the full dim -> single tile, never an invalid grid).
# ----------------------------------------------------------------------------
def _pick_tile_sublane(dim, cap, min_tiles=1):
    cap = min(cap, dim)
    if min_tiles > 1 and dim >= 8 * min_tiles:
        # shrink the cap so at least `min_tiles` row tiles exist (v7x megacore)
        cap = min(cap, max(8, (dim // min_tiles) // 8 * 8))
    if dim <= cap:
        return dim
    for t in range(cap - cap % 8, 7, -8):
        if dim % t == 0:
            return t
    return dim


def _pick_tile_lane(dim, cap):
    if dim <= cap:
        return dim
    for t in range(cap - cap % 128, 127, -128):
        if dim % t == 0:
            return t
    return dim


# ----------------------------------------------------------------------------
# Kernels
# ----------------------------------------------------------------------------
def _layernorm_f32(s, g, b):
    mean = jnp.mean(s, axis=-1, keepdims=True)
    c = s - mean
    var = jnp.mean(c * c, axis=-1, keepdims=True)
    inv = jax.lax.rsqrt(var + LN_EPS)
    return (c * inv) * g + b


def _self_qkv_kernel(x_ref, p_ref, wq_ref, bq_ref, wk_ref, bk_ref, wv_ref, bv_ref,
                     q_ref, k_ref, v_ref, accq, acck, accv):
    """q = (x+p)@wq+bq ; k = (x+p)@wk+bk ; v = x@wv+bv  (one pass over x / p)."""
    kk = pl.program_id(1)

    @pl.when(kk == 0)
    def _():
        accq[...] = jnp.zeros_like(accq)
        acck[...] = jnp.zeros_like(acck)
        accv[...] = jnp.zeros_like(accv)

    cd = wq_ref.dtype
    xf = x_ref[...].astype(jnp.float32)
    pf = p_ref[...].astype(jnp.float32)
    xp = (xf + pf).astype(cd)
    xc = xf.astype(cd)
    accq[...] += jnp.dot(xp, wq_ref[...], preferred_element_type=jnp.float32)
    acck[...] += jnp.dot(xp, wk_ref[...], preferred_element_type=jnp.float32)
    accv[...] += jnp.dot(xc, wv_ref[...], preferred_element_type=jnp.float32)

    @pl.when(kk == pl.num_programs(1) - 1)
    def _():
        q_ref[...] = (accq[...] + bq_ref[...].astype(jnp.float32)).astype(q_ref.dtype)
        k_ref[...] = (acck[...] + bk_ref[...].astype(jnp.float32)).astype(k_ref.dtype)
        v_ref[...] = (accv[...] + bv_ref[...].astype(jnp.float32)).astype(v_ref.dtype)


def _cross_kv_kernel(x_ref, p_ref, wk_ref, bk_ref, wv_ref, bv_ref,
                     k_ref, v_ref, acck, accv):
    """k = (x+p)@wk+bk ; v = x@wv+bv  (one pass over memory / pos)."""
    kk = pl.program_id(1)

    @pl.when(kk == 0)
    def _():
        acck[...] = jnp.zeros_like(acck)
        accv[...] = jnp.zeros_like(accv)

    cd = wk_ref.dtype
    xf = x_ref[...].astype(jnp.float32)
    pf = p_ref[...].astype(jnp.float32)
    acck[...] += jnp.dot((xf + pf).astype(cd), wk_ref[...],
                         preferred_element_type=jnp.float32)
    accv[...] += jnp.dot(xf.astype(cd), wv_ref[...],
                         preferred_element_type=jnp.float32)

    @pl.when(kk == pl.num_programs(1) - 1)
    def _():
        k_ref[...] = (acck[...] + bk_ref[...].astype(jnp.float32)).astype(k_ref.dtype)
        v_ref[...] = (accv[...] + bv_ref[...].astype(jnp.float32)).astype(v_ref.dtype)


def _add_proj_kernel(x_ref, p_ref, w_ref, b_ref, o_ref, acc):
    """o = (x + p) @ w + b."""
    kk = pl.program_id(1)

    @pl.when(kk == 0)
    def _():
        acc[...] = jnp.zeros_like(acc)

    cd = w_ref.dtype
    xp = (x_ref[...].astype(jnp.float32) + p_ref[...].astype(jnp.float32)).astype(cd)
    acc[...] += jnp.dot(xp, w_ref[...], preferred_element_type=jnp.float32)

    @pl.when(kk == pl.num_programs(1) - 1)
    def _():
        o_ref[...] = (acc[...] + b_ref[...].astype(jnp.float32)).astype(o_ref.dtype)


def _proj_add_ln_kernel(a_ref, res_ref, w_ref, b_ref, g_ref, bt_ref, o_ref, acc):
    """o = LayerNorm(res + a @ w + b): residual add + LN fused into the epilogue."""
    kk = pl.program_id(1)

    @pl.when(kk == 0)
    def _():
        acc[...] = jnp.zeros_like(acc)

    acc[...] += jnp.dot(a_ref[...].astype(w_ref.dtype), w_ref[...],
                        preferred_element_type=jnp.float32)

    @pl.when(kk == pl.num_programs(1) - 1)
    def _():
        y = acc[...] + b_ref[...].astype(jnp.float32)
        s = res_ref[...].astype(jnp.float32) + y
        o_ref[...] = _layernorm_f32(
            s, g_ref[...].astype(jnp.float32), bt_ref[...].astype(jnp.float32)
        ).astype(o_ref.dtype)


def _ffn_add_ln_kernel(x_ref, w1_ref, b1_ref, w2_ref, b2_ref, g_ref, bt_ref,
                       o_ref, acc):
    """o = LayerNorm(x + relu(x@w1+b1)@w2 + b2); hidden dim tiled on grid axis 1,
    the (tm, dim_feedforward) intermediate lives only in VMEM."""
    f = pl.program_id(1)

    @pl.when(f == 0)
    def _():
        acc[...] = jnp.zeros_like(acc)

    cd = w1_ref.dtype
    h = jnp.dot(x_ref[...].astype(cd), w1_ref[...],
                preferred_element_type=jnp.float32)
    h = jnp.maximum(h + b1_ref[...].astype(jnp.float32), 0.0)
    acc[...] += jnp.dot(h.astype(cd), w2_ref[...],
                        preferred_element_type=jnp.float32)

    @pl.when(f == pl.num_programs(1) - 1)
    def _():
        y = acc[...] + b2_ref[...].astype(jnp.float32)
        s = x_ref[...].astype(jnp.float32) + y
        o_ref[...] = _layernorm_f32(
            s, g_ref[...].astype(jnp.float32), bt_ref[...].astype(jnp.float32)
        ).astype(o_ref.dtype)


def _flash_attn_kernel(q_ref, k_ref, v_ref, o_ref, m_sc, l_sc, acc_sc,
                       *, nhead, scale):
    """Flash-style attention: kv length tiled on the last grid axis with online
    softmax. Per-head state lives in VMEM scratch (leading-dim indexed, so the
    running accumulator is never lane-sliced inside the kv loop)."""
    # TODO(synk): attn_mask / key_padding_mask not implemented (None in this path).
    kv = pl.program_id(2)
    D = q_ref.shape[-1]
    hd = D // nhead
    cd = k_ref.dtype

    @pl.when(kv == 0)
    def _():
        m_sc[...] = jnp.full(m_sc.shape, -jnp.inf, jnp.float32)
        l_sc[...] = jnp.zeros_like(l_sc)
        acc_sc[...] = jnp.zeros_like(acc_sc)

    # Fold the 1/sqrt(hd) scale into q (touches tq*D elems, not tq*tk scores).
    q = (q_ref[0].astype(jnp.float32) * scale).astype(cd)        # (tq, D)
    k = k_ref[0]                                                 # (tk, D)
    v = v_ref[0]                                                 # (tk, D)

    for h in range(nhead):
        sl = slice(h * hd, (h + 1) * hd)
        s = jax.lax.dot_general(q[:, sl], k[:, sl],
                                (((1,), (1,)), ((), ())),
                                preferred_element_type=jnp.float32)  # (tq, tk)
        m_prev = m_sc[h]                                             # (tq, 1)
        m_new = jnp.maximum(m_prev, jnp.max(s, axis=-1, keepdims=True))
        alpha = jnp.exp(m_prev - m_new)
        p = jnp.exp(s - m_new)
        l_sc[h] = alpha * l_sc[h] + jnp.sum(p, axis=-1, keepdims=True)
        acc_sc[h] = alpha * acc_sc[h] + jnp.dot(p.astype(cd), v[:, sl],
                                                preferred_element_type=jnp.float32)
        m_sc[h] = m_new

    @pl.when(kv == pl.num_programs(2) - 1)
    def _():
        outs = [acc_sc[h] * pl.reciprocal(l_sc[h], approx=True)
                for h in range(nhead)]
        o_ref[0] = jnp.concatenate(outs, axis=-1).astype(o_ref.dtype)


# ----------------------------------------------------------------------------
# Pallas wrappers
# ----------------------------------------------------------------------------
def self_qkv_proj(x, p, wq, bq, wk, bk, wv, bv):
    M, K = x.shape
    D = wq.shape[1]
    tm = _pick_tile_sublane(M, TM_CAP, min_tiles=2)
    tk = _pick_tile_lane(K, TK_CAP)
    row = pl.BlockSpec((tm, tk), lambda i, k: (i, k))
    wsp = pl.BlockSpec((tk, D), lambda i, k: (k, 0))
    bsp = pl.BlockSpec((1, D), lambda i, k: (0, 0))
    osp = pl.BlockSpec((tm, D), lambda i, k: (i, 0))
    return pl.pallas_call(
        _self_qkv_kernel,
        out_shape=tuple(jax.ShapeDtypeStruct((M, D), COMPUTE_DTYPE) for _ in range(3)),
        grid=(M // tm, K // tk),
        in_specs=[row, row, wsp, bsp, wsp, bsp, wsp, bsp],
        out_specs=(osp, osp, osp),
        scratch_shapes=[pltpu.VMEM((tm, D), jnp.float32)] * 3,
        compiler_params=_cparams(("parallel", "arbitrary")),
    )(x, p,
      wq.astype(COMPUTE_DTYPE), bq.reshape(1, D),
      wk.astype(COMPUTE_DTYPE), bk.reshape(1, D),
      wv.astype(COMPUTE_DTYPE), bv.reshape(1, D))


def cross_kv_proj(x, p, wk, bk, wv, bv):
    M, K = x.shape
    D = wk.shape[1]
    tm = _pick_tile_sublane(M, TM_CAP, min_tiles=2)
    tk = _pick_tile_lane(K, TK_CAP)
    row = pl.BlockSpec((tm, tk), lambda i, k: (i, k))
    wsp = pl.BlockSpec((tk, D), lambda i, k: (k, 0))
    bsp = pl.BlockSpec((1, D), lambda i, k: (0, 0))
    osp = pl.BlockSpec((tm, D), lambda i, k: (i, 0))
    return pl.pallas_call(
        _cross_kv_kernel,
        out_shape=tuple(jax.ShapeDtypeStruct((M, D), COMPUTE_DTYPE) for _ in range(2)),
        grid=(M // tm, K // tk),
        in_specs=[row, row, wsp, bsp, wsp, bsp],
        out_specs=(osp, osp),
        scratch_shapes=[pltpu.VMEM((tm, D), jnp.float32)] * 2,
        compiler_params=_cparams(("parallel", "arbitrary")),
    )(x, p,
      wk.astype(COMPUTE_DTYPE), bk.reshape(1, D),
      wv.astype(COMPUTE_DTYPE), bv.reshape(1, D))


def add_proj(x, p, w, b):
    M, K = x.shape
    N = w.shape[1]
    tm = _pick_tile_sublane(M, TM_CAP, min_tiles=2)
    tk = _pick_tile_lane(K, TK_CAP)
    return pl.pallas_call(
        _add_proj_kernel,
        out_shape=jax.ShapeDtypeStruct((M, N), COMPUTE_DTYPE),
        grid=(M // tm, K // tk),
        in_specs=[
            pl.BlockSpec((tm, tk), lambda i, k: (i, k)),
            pl.BlockSpec((tm, tk), lambda i, k: (i, k)),
            pl.BlockSpec((tk, N), lambda i, k: (k, 0)),
            pl.BlockSpec((1, N), lambda i, k: (0, 0)),
        ],
        out_specs=pl.BlockSpec((tm, N), lambda i, k: (i, 0)),
        scratch_shapes=[pltpu.VMEM((tm, N), jnp.float32)],
        compiler_params=_cparams(("parallel", "arbitrary")),
    )(x, p, w.astype(COMPUTE_DTYPE), b.reshape(1, N))


def proj_add_ln(a, res, w, b, gamma, beta):
    M, K = a.shape
    N = w.shape[1]
    tm = _pick_tile_sublane(M, TM_CAP, min_tiles=2)
    tk = _pick_tile_lane(K, TK_CAP)
    return pl.pallas_call(
        _proj_add_ln_kernel,
        out_shape=jax.ShapeDtypeStruct((M, N), jnp.float32),
        grid=(M // tm, K // tk),
        in_specs=[
            pl.BlockSpec((tm, tk), lambda i, k: (i, k)),
            pl.BlockSpec((tm, N), lambda i, k: (i, 0)),
            pl.BlockSpec((tk, N), lambda i, k: (k, 0)),
            pl.BlockSpec((1, N), lambda i, k: (0, 0)),
            pl.BlockSpec((1, N), lambda i, k: (0, 0)),
            pl.BlockSpec((1, N), lambda i, k: (0, 0)),
        ],
        out_specs=pl.BlockSpec((tm, N), lambda i, k: (i, 0)),
        scratch_shapes=[pltpu.VMEM((tm, N), jnp.float32)],
        compiler_params=_cparams(("parallel", "arbitrary")),
    )(a, res, w.astype(COMPUTE_DTYPE), b.reshape(1, N),
      gamma.reshape(1, N), beta.reshape(1, N))


def ffn_add_ln(x, w1, b1, w2, b2, gamma, beta):
    M, D = x.shape
    F = w1.shape[1]
    tm = _pick_tile_sublane(M, TM_CAP, min_tiles=2)
    tf = _pick_tile_lane(F, TK_CAP)
    return pl.pallas_call(
        _ffn_add_ln_kernel,
        out_shape=jax.ShapeDtypeStruct((M, D), jnp.float32),
        grid=(M // tm, F // tf),
        in_specs=[
            pl.BlockSpec((tm, D), lambda i, f: (i, 0)),
            pl.BlockSpec((D, tf), lambda i, f: (0, f)),
            pl.BlockSpec((1, tf), lambda i, f: (0, f)),
            pl.BlockSpec((tf, D), lambda i, f: (f, 0)),
            pl.BlockSpec((1, D), lambda i, f: (0, 0)),
            pl.BlockSpec((1, D), lambda i, f: (0, 0)),
            pl.BlockSpec((1, D), lambda i, f: (0, 0)),
        ],
        out_specs=pl.BlockSpec((tm, D), lambda i, f: (i, 0)),
        scratch_shapes=[pltpu.VMEM((tm, D), jnp.float32)],
        compiler_params=_cparams(("parallel", "arbitrary")),
    )(x, w1.astype(COMPUTE_DTYPE), b1.reshape(1, F),
      w2.astype(COMPUTE_DTYPE), b2.reshape(1, D),
      gamma.reshape(1, D), beta.reshape(1, D))


def flash_attention(q, k, v, nhead):
    """q: (B, Tq, D), k/v: (B, Tk, D) -> (B, Tq, D) bf16, flash-style (kv tiled)."""
    B, Tq, D = q.shape
    Tk = k.shape[1]
    hd = D // nhead
    scale = 1.0 / (hd ** 0.5)
    tq = _pick_tile_sublane(Tq, ATTN_TQ_CAP)
    tk = _pick_tile_sublane(Tk, ATTN_TK_CAP)
    return pl.pallas_call(
        functools.partial(_flash_attn_kernel, nhead=nhead, scale=scale),
        out_shape=jax.ShapeDtypeStruct((B, Tq, D), q.dtype),
        grid=(B, Tq // tq, Tk // tk),
        in_specs=[
            pl.BlockSpec((1, tq, D), lambda b, qi, ki: (b, qi, 0)),
            pl.BlockSpec((1, tk, D), lambda b, qi, ki: (b, ki, 0)),
            pl.BlockSpec((1, tk, D), lambda b, qi, ki: (b, ki, 0)),
        ],
        out_specs=pl.BlockSpec((1, tq, D), lambda b, qi, ki: (b, qi, 0)),
        scratch_shapes=[
            pltpu.VMEM((nhead, tq, 1), jnp.float32),    # running max (per head)
            pltpu.VMEM((nhead, tq, 1), jnp.float32),    # running sum (per head)
            pltpu.VMEM((nhead, tq, hd), jnp.float32),   # output accumulator
        ],
        compiler_params=_cparams(("parallel", "parallel", "arbitrary")),
    )(q, k, v)


# ----------------------------------------------------------------------------
# TransformerDecoderLayer forward (normalize_before=False -> forward_post)
# ----------------------------------------------------------------------------
def transformer_decoder_layer(tgt, memory, pos, query_pos, params, nhead):
    # TODO(synk): tgt_mask / memory_mask / key_padding_mask not implemented
    # (this matches the masks=None eval path); dropouts are identity (eval).
    T, B, D = tgt.shape
    S = memory.shape[0]

    # tgt-side residual stream is batch-major (one f32 transpose in, one out).
    x = jnp.transpose(tgt, (1, 0, 2)).reshape(B * T, D)
    qp = jnp.transpose(query_pos, (1, 0, 2)).reshape(B * T, D)

    # memory-side: stay in natural (S*B, D) row order for the row-wise
    # projections; only the bf16 k/v outputs get regrouped to (B, S, D).
    mem_rows = memory.reshape(S * B, D)
    mpos_rows = pos.reshape(S * B, D)

    # ---- self attention: q = k = tgt+query_pos, v = tgt ----
    sa = params["self_attn"]
    q, k, v = self_qkv_proj(x, qp, sa["wq"], sa["bq"], sa["wk"], sa["bk"],
                            sa["wv"], sa["bv"])
    attn = flash_attention(q.reshape(B, T, D), k.reshape(B, T, D),
                           v.reshape(B, T, D), nhead)
    x = proj_add_ln(attn.reshape(B * T, D), x, sa["wo"], sa["bo"],
                    params["norm1_g"], params["norm1_b"])

    # ---- cross attention: q = tgt+query_pos, k = memory+pos, v = memory ----
    ca = params["cross_attn"]
    kc_rows, vc_rows = cross_kv_proj(mem_rows, mpos_rows, ca["wk"], ca["bk"],
                                     ca["wv"], ca["bv"])
    kc = jnp.transpose(kc_rows.reshape(S, B, D), (1, 0, 2))   # bf16 regroup only
    vc = jnp.transpose(vc_rows.reshape(S, B, D), (1, 0, 2))
    qc = add_proj(x, qp, ca["wq"], ca["bq"])
    attn = flash_attention(qc.reshape(B, T, D), kc, vc, nhead)
    x = proj_add_ln(attn.reshape(B * T, D), x, ca["wo"], ca["bo"],
                    params["norm2_g"], params["norm2_b"])

    # ---- fused FFN + residual + norm3 ----
    x = ffn_add_ln(x, params["w1"], params["b1"], params["w2"], params["b2"],
                   params["norm3_g"], params["norm3_b"])

    return jnp.transpose(x.reshape(B, T, D), (1, 0, 2))


# ----------------------------------------------------------------------------
# Pure-JAX reference (f32) for a correctness spot-check
# ----------------------------------------------------------------------------
def _ref_ln(x, g, b):
    m = jnp.mean(x, axis=-1, keepdims=True)
    v = jnp.mean((x - m) ** 2, axis=-1, keepdims=True)
    return (x - m) * jax.lax.rsqrt(v + LN_EPS) * g + b


def _ref_attention(q, k, v, nhead):
    B, Tq, D = q.shape
    hd = D // nhead
    qh = q.reshape(B, Tq, nhead, hd).transpose(0, 2, 1, 3)
    kh = k.reshape(B, -1, nhead, hd).transpose(0, 2, 1, 3)
    vh = v.reshape(B, -1, nhead, hd).transpose(0, 2, 1, 3)
    s = jnp.einsum('bhqd,bhkd->bhqk', qh, kh) / (hd ** 0.5)
    p = jax.nn.softmax(s, axis=-1)
    o = jnp.einsum('bhqk,bhkd->bhqd', p, vh)
    return o.transpose(0, 2, 1, 3).reshape(B, Tq, D)


def ref_decoder_layer(tgt, memory, pos, query_pos, params, nhead):
    x = jnp.transpose(tgt, (1, 0, 2))
    qp = jnp.transpose(query_pos, (1, 0, 2))
    mem = jnp.transpose(memory, (1, 0, 2))
    mp = jnp.transpose(pos, (1, 0, 2))

    sa = params["self_attn"]
    q = (x + qp) @ sa["wq"] + sa["bq"]
    k = (x + qp) @ sa["wk"] + sa["bk"]
    v = x @ sa["wv"] + sa["bv"]
    a = _ref_attention(q, k, v, nhead) @ sa["wo"] + sa["bo"]
    x = _ref_ln(x + a, params["norm1_g"], params["norm1_b"])

    ca = params["cross_attn"]
    qc = (x + qp) @ ca["wq"] + ca["bq"]
    kc = (mem + mp) @ ca["wk"] + ca["bk"]
    vc = mem @ ca["wv"] + ca["bv"]
    a = _ref_attention(qc, kc, vc, nhead) @ ca["wo"] + ca["bo"]
    x = _ref_ln(x + a, params["norm2_g"], params["norm2_b"])

    h = jnp.maximum(x @ params["w1"] + params["b1"], 0.0)
    x = _ref_ln(x + h @ params["w2"] + params["b2"],
                params["norm3_g"], params["norm3_b"])
    return jnp.transpose(x, (1, 0, 2))


# ----------------------------------------------------------------------------
# Deterministic parameter init
# ----------------------------------------------------------------------------
def make_params(key, d_model, nhead, dim_feedforward):
    keys = iter(jax.random.split(key, 12))
    s = 0.02

    def dense(din, dout):
        return jax.random.normal(next(keys), (din, dout), jnp.float32) * s

    def zeros(n):
        return jnp.zeros((n,), jnp.float32)

    def attn_params():
        return {
            "wq": dense(d_model, d_model), "bq": zeros(d_model),
            "wk": dense(d_model, d_model), "bk": zeros(d_model),
            "wv": dense(d_model, d_model), "bv": zeros(d_model),
            "wo": dense(d_model, d_model), "bo": zeros(d_model),
        }

    return {
        "self_attn": attn_params(),
        "cross_attn": attn_params(),
        "w1": dense(d_model, dim_feedforward), "b1": zeros(dim_feedforward),
        "w2": dense(dim_feedforward, d_model), "b2": zeros(d_model),
        "norm1_g": jnp.ones((d_model,), jnp.float32), "norm1_b": zeros(d_model),
        "norm2_g": jnp.ones((d_model,), jnp.float32), "norm2_b": zeros(d_model),
        "norm3_g": jnp.ones((d_model,), jnp.float32), "norm3_b": zeros(d_model),
    }


if __name__ == "__main__":
    d_model, nhead, dim_feedforward = 32, 4, 64
    T, S, B = 8, 16, 2

    key = jax.random.PRNGKey(0)
    k_tgt, k_mem, k_pos, k_qpos, k_par = jax.random.split(key, 5)

    tgt = jax.random.normal(k_tgt, (T, B, d_model), jnp.float32)
    memory = jax.random.normal(k_mem, (S, B, d_model), jnp.float32)
    pos = jax.random.normal(k_pos, (S, B, d_model), jnp.float32)
    query_pos = jax.random.normal(k_qpos, (T, B, d_model), jnp.float32)

    params = make_params(k_par, d_model, nhead, dim_feedforward)

    fwd = jax.jit(functools.partial(transformer_decoder_layer, nhead=nhead))
    out = fwd(tgt, memory, pos, query_pos, params)
    jax.block_until_ready(out)

    assert out.shape == (T, B, d_model)
    assert bool(jnp.all(jnp.isfinite(out)))

    ref = ref_decoder_layer(tgt, memory, pos, query_pos, params, nhead)
    max_err = float(jnp.max(jnp.abs(out - ref)))
    assert max_err < 0.1, f"max abs error vs f32 reference too large: {max_err}"

    print("KERNEL_OK")
</pallas_src>

<mosaic_0001>
module attributes {stable_mosaic.version = 11 : i64} {
  func.func @_flash_attn_kernel(%arg0: i32, %arg1: i32, %arg2: i32, %arg3: memref<1x8x32xbf16, #tpu.memory_space<vmem>>, %arg4: memref<1x8x32xbf16, #tpu.memory_space<vmem>>, %arg5: memref<1x8x32xbf16, #tpu.memory_space<vmem>>, %arg6: memref<1x8x32xbf16, #tpu.memory_space<vmem>>, %arg7: memref<4x8x1xf32, #tpu.memory_space<vmem>>, %arg8: memref<4x8x1xf32, #tpu.memory_space<vmem>>, %arg9: memref<4x8x8xf32, #tpu.memory_space<vmem>>) attributes {dimension_semantics = [#tpu.dimension_semantics<parallel>, #tpu.dimension_semantics<parallel>, #tpu.dimension_semantics<arbitrary>], iteration_bounds = array<i64: 2, 1, 1>, scalar_prefetch = 0 : i64, scratch_operands = 3 : i64, tpu.core_type = #tpu.core_type<tc>, window_params = [{transform_indices = @transform_0, window_bounds = array<i64: 1, 8, 32>}, {transform_indices = @transform_1, window_bounds = array<i64: 1, 8, 32>}, {transform_indices = @transform_2, window_bounds = array<i64: 1, 8, 32>}, {transform_indices = @transform_3, window_bounds = array<i64: 1, 8, 32>}]} {
    %c0_i32 = arith.constant 0 : i32
    %0 = arith.cmpi eq, %arg2, %c0_i32 : i32
    %1 = arith.extui %0 : i1 to i32
    %c0_i32_0 = arith.constant 0 : i32
    %2 = arith.cmpi ne, %1, %c0_i32_0 : i32
    scf.if %2 {
      %cst_96 = arith.constant 0xFF800000 : f32
      %160 = vector.broadcast %cst_96 : f32 to vector<4x8x1xf32>
      %c0_97 = arith.constant 0 : index
      %c0_98 = arith.constant 0 : index
      %c0_99 = arith.constant 0 : index
      %161 = vector.load %arg7[%c0_97, %c0_98, %c0_99] : memref<4x8x1xf32, #tpu.memory_space<vmem>>, vector<4x8x1xf32>
      tpu.vector_store %arg7[%c0_97, %c0_98, %c0_99], %160 {strides = array<i32>} : memref<4x8x1xf32, #tpu.memory_space<vmem>>, vector<4x8x1xf32>,
      %cst_100 = arith.constant 0.000000e+00 : f32
      %162 = vector.broadcast %cst_100 : f32 to vector<4x8x1xf32>
      %c0_101 = arith.constant 0 : index
      %c0_102 = arith.constant 0 : index
      %c0_103 = arith.constant 0 : index
      %163 = vector.load %arg8[%c0_101, %c0_102, %c0_103] : memref<4x8x1xf32, #tpu.memory_space<vmem>>, vector<4x8x1xf32>
      tpu.vector_store %arg8[%c0_101, %c0_102, %c0_103], %162 {strides = array<i32>} : memref<4x8x1xf32, #tpu.memory_space<vmem>>, vector<4x8x1xf32>,
      %cst_104 = arith.constant 0.000000e+00 : f32
      %164 = vector.broadcast %cst_104 : f32 to vector<4x8x8xf32>
      %c0_105 = arith.constant 0 : index
      %c0_106 = arith.constant 0 : index
      %c0_107 = arith.constant 0 : index
      %165 = vector.load %arg9[%c0_105, %c0_106, %c0_107] : memref<4x8x8xf32, #tpu.memory_space<vmem>>, vector<4x8x8xf32>
      tpu.vector_store %arg9[%c0_105, %c0_106, %c0_107], %164 {strides = array<i32>} : memref<4x8x8xf32, #tpu.memory_space<vmem>>, vector<4x8x8xf32>,
    } else {
    }
    %c0 = arith.constant 0 : index
    %c0_1 = arith.constant 0 : index
    %c0_2 = arith.constant 0 : index
    %3 = vector.load %arg3[%c0, %c0_1, %c0_2] : memref<1x8x32xbf16, #tpu.memory_space<vmem>>, vector<1x8x32xbf16>
    %4 = vector.shape_cast %3 : vector<1x8x32xbf16> to vector<8x32xbf16>
    %5 = arith.extf %4 : vector<8x32xbf16> to vector<8x32xf32>
    %cst = arith.constant 0.353553385 : f32
    %6 = vector.broadcast %cst : f32 to vector<8x32xf32>
    %7 = arith.mulf %5, %6 : vector<8x32xf32>
    %8 = arith.truncf %7 : vector<8x32xf32> to vector<8x32xbf16>
    %c0_3 = arith.constant 0 : index
    %c0_4 = arith.constant 0 : index
    %c0_5 = arith.constant 0 : index
    %9 = vector.load %arg4[%c0_3, %c0_4, %c0_5] : memref<1x8x32xbf16, #tpu.memory_space<vmem>>, vector<1x8x32xbf16>
    %10 = vector.shape_cast %9 : vector<1x8x32xbf16> to vector<8x32xbf16>
    %c0_6 = arith.constant 0 : index
    %c0_7 = arith.constant 0 : index
    %c0_8 = arith.constant 0 : index
    %11 = vector.load %arg5[%c0_6, %c0_7, %c0_8] : memref<1x8x32xbf16, #tpu.memory_space<vmem>>, vector<1x8x32xbf16>
    %12 = vector.shape_cast %11 : vector<1x8x32xbf16> to vector<8x32xbf16>
    %13 = vector.extract_strided_slice %8 {offsets = [0, 0], sizes = [8, 8], strides = [1, 1]} : vector<8x32xbf16> to vector<8x8xbf16>
    %14 = vector.extract_strided_slice %10 {offsets = [0, 0], sizes = [8, 8], strides = [1, 1]} : vector<8x32xbf16> to vector<8x8xbf16>
    %cst_9 = arith.constant dense<0.000000e+00> : vector<8x8xf32>
    %15 = tpu.matmul %13, %14, %cst_9 {dimension_numbers = #tpu.dot_dimension_numbers<[1], [1], [0], [0], [0, 0, 1, 0], [], []>} : vector<8x8xbf16>, vector<8x8xbf16>, vector<8x8xf32> -> vector<8x8xf32>
    %c0_10 = arith.constant 0 : index
    %c0_11 = arith.constant 0 : index
    %c0_12 = arith.constant 0 : index
    %16 = vector.load %arg7[%c0_10, %c0_11, %c0_12] : memref<4x8x1xf32, #tpu.memory_space<vmem>>, vector<1x8x1xf32>
    %17 = vector.shape_cast %16 : vector<1x8x1xf32> to vector<8x1xf32>
    %cst_13 = arith.constant dense<0xFF800000> : vector<8xf32>
    %18 = vector.multi_reduction <maximumf>, %15, %cst_13 [1] : vector<8x8xf32> to vector<8xf32>
    %19 = vector.shape_cast %18 : vector<8xf32> to vector<8x1xf32>
    %20 = arith.maximumf %17, %19 : vector<8x1xf32>
    %21 = arith.subf %17, %20 : vector<8x1xf32>
    %22 = math.exp %21 : vector<8x1xf32>
    %23 = vector.broadcast %20 : vector<8x1xf32> to vector<8x8xf32>
    %24 = arith.subf %15, %23 : vector<8x8xf32>
    %25 = math.exp %24 : vector<8x8xf32>
    %c0_14 = arith.constant 0 : index
    %c0_15 = arith.constant 0 : index
    %c0_16 = arith.constant 0 : index
    %26 = vector.load %arg8[%c0_14, %c0_15, %c0_16] : memref<4x8x1xf32, #tpu.memory_space<vmem>>, vector<1x8x1xf32>
    %27 = vector.shape_cast %26 : vector<1x8x1xf32> to vector<8x1xf32>
    %28 = arith.mulf %22, %27 : vector<8x1xf32>
    %cst_17 = arith.constant dense<0.000000e+00> : vector<8xf32>
    %29 = vector.multi_reduction <add>, %25, %cst_17 [1] : vector<8x8xf32> to vector<8xf32>
    %30 = vector.shape_cast %29 : vector<8xf32> to vector<8x1xf32>
    %31 = arith.addf %28, %30 : vector<8x1xf32>
    %c0_18 = arith.constant 0 : index
    %c0_19 = arith.constant 0 : index
    %c0_20 = arith.constant 0 : index
    %32 = vector.load %arg8[%c0_18, %c0_19, %c0_20] : memref<4x8x1xf32, #tpu.memory_space<vmem>>, vector<1x8x1xf32>
    %33 = vector.shape_cast %32 : vector<1x8x1xf32> to vector<8x1xf32>
    %34 = vector.shape_cast %31 : vector<8x1xf32> to vector<1x8x1xf32>
    tpu.vector_store %arg8[%c0_18, %c0_19, %c0_20], %34 {strides = array<i32>} : memref<4x8x1xf32, #tpu.memory_space<vmem>>, vector<1x8x1xf32>,
    %c0_21 = arith.constant 0 : index
    %c0_22 = arith.constant 0 : index
    %c0_23 = arith.constant 0 : index
    %35 = vector.load %arg9[%c0_21, %c0_22, %c0_23] : memref<4x8x8xf32, #tpu.memory_space<vmem>>, vector<1x8x8xf32>
    %36 = vector.shape_cast %35 : vector<1x8x8xf32> to vector<8x8xf32>
    %37 = vector.broadcast %22 : vector<8x1xf32> to vector<8x8xf32>
    %38 = arith.mulf %37, %36 : vector<8x8xf32>
    %39 = arith.truncf %25 : vector<8x8xf32> to vector<8x8xbf16>
    %40 = vector.extract_strided_slice %12 {offsets = [0, 0], sizes = [8, 8], strides = [1, 1]} : vector<8x32xbf16> to vector<8x8xbf16>
    %cst_24 = arith.constant dense<0.000000e+00> : vector<8x8xf32>
    %41 = tpu.matmul %39, %40, %cst_24 {dimension_numbers = #tpu.dot_dimension_numbers<[1], [0], [0], [1], [0, 0, 1, 1], [], []>} : vector<8x8xbf16>, vector<8x8xbf16>, vector<8x8xf32> -> vector<8x8xf32>
    %42 = arith.addf %38, %41 : vector<8x8xf32>
    %c0_25 = arith.constant 0 : index
    %c0_26 = arith.constant 0 : index
    %c0_27 = arith.constant 0 : index
    %43 = vector.load %arg9[%c0_25, %c0_26, %c0_27] : memref<4x8x8xf32, #tpu.memory_space<vmem>>, vector<1x8x8xf32>
    %44 = vector.shape_cast %43 : vector<1x8x8xf32> to vector<8x8xf32>
    %45 = vector.shape_cast %42 : vector<8x8xf32> to vector<1x8x8xf32>
    tpu.vector_store %arg9[%c0_25, %c0_26, %c0_27], %45 {strides = array<i32>} : memref<4x8x8xf32, #tpu.memory_space<vmem>>, vector<1x8x8xf32>,
    %c0_28 = arith.constant 0 : index
    %c0_29 = arith.constant 0 : index
    %c0_30 = arith.constant 0 : index
    %46 = vector.load %arg7[%c0_28, %c0_29, %c0_30] : memref<4x8x1xf32, #tpu.memory_space<vmem>>, vector<1x8x1xf32>
    %47 = vector.shape_cast %46 : vector<1x8x1xf32> to vector<8x1xf32>
    %48 = vector.shape_cast %20 : vector<8x1xf32> to vector<1x8x1xf32>
    tpu.vector_store %arg7[%c0_28, %c0_29, %c0_30], %48 {strides = array<i32>} : memref<4x8x1xf32, #tpu.memory_space<vmem>>, vector<1x8x1xf32>,
    %49 = vector.extract_strided_slice %8 {offsets = [0, 8], sizes = [8, 8], strides = [1, 1]} : vector<8x32xbf16> to vector<8x8xbf16>
    %50 = vector.extract_strided_slice %10 {offsets = [0, 8], sizes = [8, 8], strides = [1, 1]} : vector<8x32xbf16> to vector<8x8xbf16>
    %cst_31 = arith.constant dense<0.000000e+00> : vector<8x8xf32>
    %51 = tpu.matmul %49, %50, %cst_31 {dimension_numbers = #tpu.dot_dimension_numbers<[1], [1], [0], [0], [0, 0, 1, 0], [], []>} : vector<8x8xbf16>, vector<8x8xbf16>, vector<8x8xf32> -> vector<8x8xf32>
    %c1 = arith.constant 1 : index
    %c0_32 = arith.constant 0 : index
    %c0_33 = arith.constant 0 : index
    %52 = vector.load %arg7[%c1, %c0_32, %c0_33] : memref<4x8x1xf32, #tpu.memory_space<vmem>>, vector<1x8x1xf32>
    %53 = vector.shape_cast %52 : vector<1x8x1xf32> to vector<8x1xf32>
    %cst_34 = arith.constant dense<0xFF800000> : vector<8xf32>
    %54 = vector.multi_reduction <maximumf>, %51, %cst_34 [1] : vector<8x8xf32> to vector<8xf32>
    %55 = vector.shape_cast %54 : vector<8xf32> to vector<8x1xf32>
    %56 = arith.maximumf %53, %55 : vector<8x1xf32>
    %57 = arith.subf %53, %56 : vector<8x1xf32>
    %58 = math.exp %57 : vector<8x1xf32>
    %59 = vector.broadcast %56 : vector<8x1xf32> to vector<8x8xf32>
    %60 = arith.subf %51, %59 : vector<8x8xf32>
    %61 = math.exp %60 : vector<8x8xf32>
    %c1_35 = arith.constant 1 : index
    %c0_36 = arith.constant 0 : index
    %c0_37 = arith.constant 0 : index
    %62 = vector.load %arg8[%c1_35, %c0_36, %c0_37] : memref<4x8x1xf32, #tpu.memory_space<vmem>>, vector<1x8x1xf32>
    %63 = vector.shape_cast %62 : vector<1x8x1xf32> to vector<8x1xf32>
    %64 = arith.mulf %58, %63 : vector<8x1xf32>
    %cst_38 = arith.constant dense<0.000000e+00> : vector<8xf32>
    %65 = vector.multi_reduction <add>, %61, %cst_38 [1] : vector<8x8xf32> to vector<8xf32>
    %66 = vector.shape_cast %65 : vector<8xf32> to vector<8x1xf32>
    %67 = arith.addf %64, %66 : vector<8x1xf32>
    %c1_39 = arith.constant 1 : index
    %c0_40 = arith.constant 0 : index
    %c0_41 = arith.constant 0 : index
    %68 = vector.load %arg8[%c1_39, %c0_40, %c0_41] : memref<4x8x1xf32, #tpu.memory_space<vmem>>, vector<1x8x1xf32>
    %69 = vector.shape_cast %68 : vector<1x8x1xf32> to vector<8x1xf32>
    %70 = vector.shape_cast %67 : vector<8x1xf32> to vector<1x8x1xf32>
    tpu.vector_store %arg8[%c1_39, %c0_40, %c0_41], %70 {strides = array<i32>} : memref<4x8x1xf32, #tpu.memory_space<vmem>>, vector<1x8x1xf32>,
    %c1_42 = arith.constant 1 : index
    %c0_43 = arith.constant 0 : index
    %c0_44 = arith.constant 0 : index
    %71 = vector.load %arg9[%c1_42, %c0_43, %c0_44] : memref<4x8x8xf32, #tpu.memory_space<vmem>>, vector<1x8x8xf32>
    %72 = vector.shape_cast %71 : vector<1x8x8xf32> to vector<8x8xf32>
    %73 = vector.broadcast %58 : vector<8x1xf32> to vector<8x8xf32>
    %74 = arith.mulf %73, %72 : vector<8x8xf32>
    %75 = arith.truncf %61 : vector<8x8xf32> to vector<8x8xbf16>
    %76 = vector.extract_strided_slice %12 {offsets = [0, 8], sizes = [8, 8], strides = [1, 1]} : vector<8x32xbf16> to vector<8x8xbf16>
    %cst_45 = arith.constant dense<0.000000e+00> : vector<8x8xf32>
    %77 = tpu.matmul %75, %76, %cst_45 {dimension_numbers = #tpu.dot_dimension_numbers<[1], [0], [0], [1], [0, 0, 1, 1], [], []>} : vector<8x8xbf16>, vector<8x8xbf16>, vector<8x8xf32> -> vector<8x8xf32>
    %78 = arith.addf %74, %77 : vector<8x8xf32>
    %c1_46 = arith.constant 1 : index
    %c0_47 = arith.constant 0 : index
    %c0_48 = arith.constant 0 : index
    %79 = vector.load %arg9[%c1_46, %c0_47, %c0_48] : memref<4x8x8xf32, #tpu.memory_space<vmem>>, vector<1x8x8xf32>
    %80 = vector.shape_cast %79 : vector<1x8x8xf32> to vector<8x8xf32>
    %81 = vector.shape_cast %78 : vector<8x8xf32> to vector<1x8x8xf32>
    tpu.vector_store %arg9[%c1_46, %c0_47, %c0_48], %81 {strides = array<i32>} : memref<4x8x8xf32, #tpu.memory_space<vmem>>, vector<1x8x8xf32>,
    %c1_49 = arith.constant 1 : index
    %c0_50 = arith.constant 0 : index
    %c0_51 = arith.constant 0 : index
    %82 = vector.load %arg7[%c1_49, %c0_50, %c0_51] : memref<4x8x1xf32, #tpu.memory_space<vmem>>, vector<1x8x1xf32>
    %83 = vector.shape_cast %82 : vector<1x8x1xf32> to vector<8x1xf32>
    %84 = vector.shape_cast %56 : vector<8x1xf32> to vector<1x8x1xf32>
    tpu.vector_store %arg7[%c1_49, %c0_50, %c0_51], %84 {strides = array<i32>} : memref<4x8x1xf32, #tpu.memory_space<vmem>>, vector<1x8x1xf32>,
    %85 = vector.extract_strided_slice %8 {offsets = [0, 16], sizes = [8, 8], strides = [1, 1]} : vector<8x32xbf16> to vector<8x8xbf16>
    %86 = vector.extract_strided_slice %10 {offsets = [0, 16], sizes = [8, 8], strides = [1, 1]} : vector<8x32xbf16> to vector<8x8xbf16>
    %cst_52 = arith.constant dense<0.000000e+00> : vector<8x8xf32>
    %87 = tpu.matmul %85, %86, %cst_52 {dimension_numbers = #tpu.dot_dimension_numbers<[1], [1], [0], [0], [0, 0, 1, 0], [], []>} : vector<8x8xbf16>, vector<8x8xbf16>, vector<8x8xf32> -> vector<8x8xf32>
    %c2 = arith.constant 2 : index
    %c0_53 = arith.constant 0 : index
    %c0_54 = arith.constant 0 : index
    %88 = vector.load %arg7[%c2, %c0_53, %c0_54] : memref<4x8x1xf32, #tpu.memory_space<vmem>>, vector<1x8x1xf32>
    %89 = vector.shape_cast %88 : vector<1x8x1xf32> to vector<8x1xf32>
    %cst_55 = arith.constant dense<0xFF800000> : vector<8xf32>
    %90 = vector.multi_reduction <maximumf>, %87, %cst_55 [1] : vector<8x8xf32> to vector<8xf32>
    %91 = vector.shape_cast %90 : vector<8xf32> to vector<8x1xf32>
    %92 = arith.maximumf %89, %91 : vector<8x1xf32>
    %93 = arith.subf %89, %92 : vector<8x1xf32>
    %94 = math.exp %93 : vector<8x1xf32>
    %95 = vector.broadcast %92 : vector<8x1xf32> to vector<8x8xf32>
    %96 = arith.subf %87, %95 : vector<8x8xf32>
    %97 = math.exp %96 : vector<8x8xf32>
    %c2_56 = arith.constant 2 : index
    %c0_57 = arith.constant 0 : index
    %c0_58 = arith.constant 0 : index
    %98 = vector.load %arg8[%c2_56, %c0_57, %c0_58] : memref<4x8x1xf32, #tpu.memory_space<vmem>>, vector<1x8x1xf32>
    %99 = vector.shape_cast %98 : vector<1x8x1xf32> to vector<8x1xf32>
    %100 = arith.mulf %94, %99 : vector<8x1xf32>
    %cst_59 = arith.constant dense<0.000000e+00> : vector<8xf32>
    %101 = vector.multi_reduction <add>, %97, %cst_59 [1] : vector<8x8xf32> to vector<8xf32>
    %102 = vector.shape_cast %101 : vector<8xf32> to vector<8x1xf32>
    %103 = arith.addf %100, %102 : vector<8x1xf32>
    %c2_60 = arith.constant 2 : index
    %c0_61 = arith.constant 0 : index
    %c0_62 = arith.constant 0 : index
    %104 = vector.load %arg8[%c2_60, %c0_61, %c0_62] : memref<4x8x1xf32, #tpu.memory_space<vmem>>, vector<1x8x1xf32>
    %105 = vector.shape_cast %104 : vector<1x8x1xf32> to vector<8x1xf32>
    %106 = vector.shape_cast %103 : vector<8x1xf32> to vector<1x8x1xf32>
    tpu.vector_store %arg8[%c2_60, %c0_61, %c0_62], %106 {strides = array<i32>} : memref<4x8x1xf32, #tpu.memory_space<vmem>>, vector<1x8x1xf32>,
    %c2_63 = arith.constant 2 : index
    %c0_64 = arith.constant 0 : index
    %c0_65 = arith.constant 0 : index
    %107 = vector.load %arg9[%c2_63, %c0_64, %c0_65] : memref<4x8x8xf32, #tpu.memory_space<vmem>>, vector<1x8x8xf32>
    %108 = vector.shape_cast %107 : vector<1x8x8xf32> to vector<8x8xf32>
    %109 = vector.broadcast %94 : vector<8x1xf32> to vector<8x8xf32>
    %110 = arith.mulf %109, %108 : vector<8x8xf32>
    %111 = arith.truncf %97 : vector<8x8xf32> to vector<8x8xbf16>
    %112 = vector.extract_strided_slice %12 {offsets = [0, 16], sizes = [8, 8], strides = [1, 1]} : vector<8x32xbf16> to vector<8x8xbf16>
    %cst_66 = arith.constant dense<0.000000e+00> : vector<8x8xf32>
    %113 = tpu.matmul %111, %112, %cst_66 {dimension_numbers = #tpu.dot_dimension_numbers<[1], [0], [0], [1], [0, 0, 1, 1], [], []>} : vector<8x8xbf16>, vector<8x8xbf16>, vector<8x8xf32> -> vector<8x8xf32>
    %114 = arith.addf %110, %113 : vector<8x8xf32>
    %c2_67 = arith.constant 2 : index
    %c0_68 = arith.constant 0 : index
    %c0_69 = arith.constant 0 : index
    %115 = vector.load %arg9[%c2_67, %c0_68, %c0_69] : memref<4x8x8xf32, #tpu.memory_space<vmem>>, vector<1x8x8xf32>
    %116 = vector.shape_cast %115 : vector<1x8x8xf32> to vector<8x8xf32>
    %117 = vector.shape_cast %114 : vector<8x8xf32> to vector<1x8x8xf32>
    tpu.vector_store %arg9[%c2_67, %c0_68, %c0_69], %117 {strides = array<i32>} : memref<4x8x8xf32, #tpu.memory_space<vmem>>, vector<1x8x8xf32>,
    %c2_70 = arith.constant 2 : index
    %c0_71 = arith.constant 0 : index
    %c0_72 = arith.constant 0 : index
    %118 = vector.load %arg7[%c2_70, %c0_71, %c0_72] : memref<4x8x1xf32, #tpu.memory_space<vmem>>, vector<1x8x1xf32>
    %119 = vector.shape_cast %118 : vector<1x8x1xf32> to vector<8x1xf32>
    %120 = vector.shape_cast %92 : vector<8x1xf32> to vector<1x8x1xf32>
    tpu.vector_store %arg7[%c2_70, %c0_71, %c0_72], %120 {strides = array<i32>} : memref<4x8x1xf32, #tpu.memory_space<vmem>>, vector<1x8x1xf32>,
    %121 = vector.extract_strided_slice %8 {offsets = [0, 24], sizes = [8, 8], strides = [1, 1]} : vector<8x32xbf16> to vector<8x8xbf16>
    %122 = vector.extract_strided_slice %10 {offsets = [0, 24], sizes = [8, 8], strides = [1, 1]} : vector<8x32xbf16> to vector<8x8xbf16>
    %cst_73 = arith.constant dense<0.000000e+00> : vector<8x8xf32>
    %123 = tpu.matmul %121, %122, %cst_73 {dimension_numbers = #tpu.dot_dimension_numbers<[1], [1], [0], [0], [0, 0, 1, 0], [], []>} : vector<8x8xbf16>, vector<8x8xbf16>, vector<8x8xf32> -> vector<8x8xf32>
    %c3 = arith.constant 3 : index
    %c0_74 = arith.constant 0 : index
    %c0_75 = arith.constant 0 : index
    %124 = vector.load %arg7[%c3, %c0_74, %c0_75] : memref<4x8x1xf32, #tpu.memory_space<vmem>>, vector<1x8x1xf32>
    %125 = vector.shape_cast %124 : vector<1x8x1xf32> to vector<8x1xf32>
    %cst_76 = arith.constant dense<0xFF800000> : vector<8xf32>
    %126 = vector.multi_reduction <maximumf>, %123, %cst_76 [1] : vector<8x8xf32> to vector<8xf32>
    %127 = vector.shape_cast %126 : vector<8xf32> to vector<8x1xf32>
    %128 = arith.maximumf %125, %127 : vector<8x1xf32>
    %129 = arith.subf %125, %128 : vector<8x1xf32>
    %130 = math.exp %129 : vector<8x1xf32>
    %131 = vector.broadcast %128 : vector<8x1xf32> to vector<8x8xf32>
    %132 = arith.subf %123, %131 : vector<8x8xf32>
    %133 = math.exp %132 : vector<8x8xf32>
    %c3_77 = arith.constant 3 : index
    %c0_78 = arith.constant 0 : index
    %c0_79 = arith.constant 0 : index
    %134 = vector.load %arg8[%c3_77, %c0_78, %c0_79] : memref<4x8x1xf32, #tpu.memory_space<vmem>>, vector<1x8x1xf32>
    %135 = vector.shape_cast %134 : vector<1x8x1xf32> to vector<8x1xf32>
    %136 = arith.mulf %130, %135 : vector<8x1xf32>
    %cst_80 = arith.constant dense<0.000000e+00> : vector<8xf32>
    %137 = vector.multi_reduction <add>, %133, %cst_80 [1] : vector<8x8xf32> to vector<8xf32>
    %138 = vector.shape_cast %137 : vector<8xf32> to vector<8x1xf32>
    %139 = arith.addf %136, %138 : vector<8x1xf32>
    %c3_81 = arith.constant 3 : index
    %c0_82 = arith.constant 0 : index
    %c0_83 = arith.constant 0 : index
    %140 = vector.load %arg8[%c3_81, %c0_82, %c0_83] : memref<4x8x1xf32, #tpu.memory_space<vmem>>, vector<1x8x1xf32>
    %141 = vector.shape_cast %140 : vector<1x8x1xf32> to vector<8x1xf32>
    %142 = vector.shape_cast %139 : vector<8x1xf32> to vector<1x8x1xf32>
    tpu.vector_store %arg8[%c3_81, %c0_82, %c0_83], %142 {strides = array<i32>} : memref<4x8x1xf32, #tpu.memory_space<vmem>>, vector<1x8x1xf32>,
    %c3_84 = arith.constant 3 : index
    %c0_85 = arith.constant 0 : index
    %c0_86 = arith.constant 0 : index
    %143 = vector.load %arg9[%c3_84, %c0_85, %c0_86] : memref<4x8x8xf32, #tpu.memory_space<vmem>>, vector<1x8x8xf32>
    %144 = vector.shape_cast %143 : vector<1x8x8xf32> to vector<8x8xf32>
    %145 = vector.broadcast %130 : vector<8x1xf32> to vector<8x8xf32>
    %146 = arith.mulf %145, %144 : vector<8x8xf32>
    %147 = arith.truncf %133 : vector<8x8xf32> to vector<8x8xbf16>
    %148 = vector.extract_strided_slice %12 {offsets = [0, 24], sizes = [8, 8], strides = [1, 1]} : vector<8x32xbf16> to vector<8x8xbf16>
    %cst_87 = arith.constant dense<0.000000e+00> : vector<8x8xf32>
    %149 = tpu.matmul %147, %148, %cst_87 {dimension_numbers = #tpu.dot_dimension_numbers<[1], [0], [0], [1], [0, 0, 1, 1], [], []>} : vector<8x8xbf16>, vector<8x8xbf16>, vector<8x8xf32> -> vector<8x8xf32>
    %150 = arith.addf %146, %149 : vector<8x8xf32>
    %c3_88 = arith.constant 3 : index
    %c0_89 = arith.constant 0 : index
    %c0_90 = arith.constant 0 : index
    %151 = vector.load %arg9[%c3_88, %c0_89, %c0_90] : memref<4x8x8xf32, #tpu.memory_space<vmem>>, vector<1x8x8xf32>
    %152 = vector.shape_cast %151 : vector<1x8x8xf32> to vector<8x8xf32>
    %153 = vector.shape_cast %150 : vector<8x8xf32> to vector<1x8x8xf32>
    tpu.vector_store %arg9[%c3_88, %c0_89, %c0_90], %153 {strides = array<i32>} : memref<4x8x8xf32, #tpu.memory_space<vmem>>, vector<1x8x8xf32>,
    %c3_91 = arith.constant 3 : index
    %c0_92 = arith.constant 0 : index
    %c0_93 = arith.constant 0 : index
    %154 = vector.load %arg7[%c3_91, %c0_92, %c0_93] : memref<4x8x1xf32, #tpu.memory_space<vmem>>, vector<1x8x1xf32>
    %155 = vector.shape_cast %154 : vector<1x8x1xf32> to vector<8x1xf32>
    %156 = vector.shape_cast %128 : vector<8x1xf32> to vector<1x8x1xf32>
    tpu.vector_store %arg7[%c3_91, %c0_92, %c0_93], %156 {strides = array<i32>} : memref<4x8x1xf32, #tpu.memory_space<vmem>>, vector<1x8x1xf32>,
    %c0_i32_94 = arith.constant 0 : i32
    %157 = arith.cmpi eq, %arg2, %c0_i32_94 : i32
    %158 = arith.extui %157 : i1 to i32
    %c0_i32_95 = arith.constant 0 : i32
    %159 = arith.cmpi ne, %158, %c0_i32_95 : i32
    scf.if %159 {
      %c0_96 = arith.constant 0 : index
      %c0_97 = arith.constant 0 : index
      %c0_98 = arith.constant 0 : index
      %160 = vector.load %arg9[%c0_96, %c0_97, %c0_98] : memref<4x8x8xf32, #tpu.memory_space<vmem>>, vector<1x8x8xf32>
      %161 = vector.shape_cast %160 : vector<1x8x8xf32> to vector<8x8xf32>
      %c0_99 = arith.constant 0 : index
      %c0_100 = arith.constant 0 : index
      %c0_101 = arith.constant 0 : index
      %162 = vector.load %arg8[%c0_99, %c0_100, %c0_101] : memref<4x8x1xf32, #tpu.memory_space<vmem>>, vector<1x8x1xf32>
      %163 = vector.shape_cast %162 : vector<1x8x1xf32> to vector<8x1xf32>
      %164 = tpu.reciprocal %163 {approx = true} : vector<8x1xf32> -> vector<8x1xf32>
      %165 = vector.broadcast %164 : vector<8x1xf32> to vector<8x8xf32>
      %166 = arith.mulf %161, %165 : vector<8x8xf32>
      %c1_102 = arith.constant 1 : index
      %c0_103 = arith.constant 0 : index
      %c0_104 = arith.constant 0 : index
      %167 = vector.load %arg9[%c1_102, %c0_103, %c0_104] : memref<4x8x8xf32, #tpu.memory_space<vmem>>, vector<1x8x8xf32>
      %168 = vector.shape_cast %167 : vector<1x8x8xf32> to vector<8x8xf32>
      %c1_105 = arith.constant 1 : index
      %c0_106 = arith.constant 0 : index
      %c0_107 = arith.constant 0 : index
      %169 = vector.load %arg8[%c1_105, %c0_106, %c0_107] : memref<4x8x1xf32, #tpu.memory_space<vmem>>, vector<1x8x1xf32>
      %170 = vector.shape_cast %169 : vector<1x8x1xf32> to vector<8x1xf32>
      %171 = tpu.reciprocal %170 {approx = true} : vector<8x1xf32> -> vector<8x1xf32>
      %172 = vector.broadcast %171 : vector<8x1xf32> to vector<8x8xf32>
      %173 = arith.mulf %168, %172 : vector<8x8xf32>
      %c2_108 = arith.constant 2 : index
      %c0_109 = arith.constant 0 : index
      %c0_110 = arith.constant 0 : index
      %174 = vector.load %arg9[%c2_108, %c0_109, %c0_110] : memref<4x8x8xf32, #tpu.memory_space<vmem>>, vector<1x8x8xf32>
      %175 = vector.shape_cast %174 : vector<1x8x8xf32> to vector<8x8xf32>
      %c2_111 = arith.constant 2 : index
      %c0_112 = arith.constant 0 : index
      %c0_113 = arith.constant 0 : index
      %176 = vector.load %arg8[%c2_111, %c0_112, %c0_113] : memref<4x8x1xf32, #tpu.memory_space<vmem>>, vector<1x8x1xf32>
      %177 = vector.shape_cast %176 : vector<1x8x1xf32> to vector<8x1xf32>
      %178 = tpu.reciprocal %177 {approx = true} : vector<8x1xf32> -> vector<8x1xf32>
      %179 = vector.broadcast %178 : vector<8x1xf32> to vector<8x8xf32>
      %180 = arith.mulf %175, %179 : vector<8x8xf32>
      %c3_114 = arith.constant 3 : index
      %c0_115 = arith.constant 0 : index
      %c0_116 = arith.constant 0 : index
      %181 = vector.load %arg9[%c3_114, %c0_115, %c0_116] : memref<4x8x8xf32, #tpu.memory_space<vmem>>, vector<1x8x8xf32>
      %182 = vector.shape_cast %181 : vector<1x8x8xf32> to vector<8x8xf32>
      %c3_117 = arith.constant 3 : index
      %c0_118 = arith.constant 0 : index
      %c0_119 = arith.constant 0 : index
      %183 = vector.load %arg8[%c3_117, %c0_118, %c0_119] : memref<4x8x1xf32, #tpu.memory_space<vmem>>, vector<1x8x1xf32>
      %184 = vector.shape_cast %183 : vector<1x8x1xf32> to vector<8x1xf32>
      %185 = tpu.reciprocal %184 {approx = true} : vector<8x1xf32> -> vector<8x1xf32>
      %186 = vector.broadcast %185 : vector<8x1xf32> to vector<8x8xf32>
      %187 = arith.mulf %182, %186 : vector<8x8xf32>
      %188 = tpu.concatenate %166, %173, %180, %187 in 1 : vector<8x8xf32>, vector<8x8xf32>, vector<8x8xf32>, vector<8x8xf32> -> vector<8x32xf32>
      %189 = arith.truncf %188 : vector<8x32xf32> to vector<8x32xbf16>
      %c0_120 = arith.constant 0 : index
      %c0_121 = arith.constant 0 : index
      %c0_122 = arith.constant 0 : index
      %190 = vector.load %arg6[%c0_120, %c0_121, %c0_122] : memref<1x8x32xbf16, #tpu.memory_space<vmem>>, vector<1x8x32xbf16>
      %191 = vector.shape_cast %190 : vector<1x8x32xbf16> to vector<8x32xbf16>
      %192 = vector.shape_cast %189 : vector<8x32xbf16> to vector<1x8x32xbf16>
      tpu.vector_store %arg6[%c0_120, %c0_121, %c0_122], %192 {strides = array<i32>} : memref<1x8x32xbf16, #tpu.memory_space<vmem>>, vector<1x8x32xbf16>,
    } else {
    }
    return
  }
  func.func @transform_0(%arg0: i32, %arg1: i32, %arg2: i32) -> (i32, i32, i32) {
    %c0_i32 = arith.constant 0 : i32
    %c0_i32_0 = arith.constant 0 : i32
    return %arg0, %arg1, %c0_i32 : i32, i32, i32
  }
  func.func @transform_1(%arg0: i32, %arg1: i32, %arg2: i32) -> (i32, i32, i32) {
    %c0_i32 = arith.constant 0 : i32
    %c0_i32_0 = arith.constant 0 : i32
    return %arg0, %arg2, %c0_i32 : i32, i32, i32
  }
  func.func @transform_2(%arg0: i32, %arg1: i32, %arg2: i32) -> (i32, i32, i32) {
    %c0_i32 = arith.constant 0 : i32
    %c0_i32_0 = arith.constant 0 : i32
    return %arg0, %arg2, %c0_i32 : i32, i32, i32
  }
  func.func @transform_3(%arg0: i32, %arg1: i32, %arg2: i32) -> (i32, i32, i32) {
    %c0_i32 = arith.constant 0 : i32
    %c0_i32_0 = arith.constant 0 : i32
    return %arg0, %arg1, %c0_i32 : i32, i32, i32
  }
}

module attributes {stable_mosaic.version = 11 : i64} {
  func.func @_self_qkv_kernel(%arg0: i32, %arg1: i32, %arg2: memref<8x32xf32, #tpu.memory_space<vmem>>, %arg3: memref<8x32xf32, #tpu.memory_space<vmem>>, %arg4: memref<32x32xbf16, #tpu.memory_space<vmem>>, %arg5: memref<1x32xf32, #tpu.memory_space<vmem>>, %arg6: memref<32x32xbf16, #tpu.memory_space<vmem>>, %arg7: memref<1x32xf32, #tpu.memory_space<vmem>>, %arg8: memref<32x32xbf16, #tpu.memory_space<vmem>>, %arg9: memref<1x32xf32, #tpu.memory_space<vmem>>, %arg10: memref<8x32xbf16, #tpu.memory_space<vmem>>, %arg11: memref<8x32xbf16, #tpu.memory_space<vmem>>, %arg12: memref<8x32xbf16, #tpu.memory_space<vmem>>, %arg13: memref<8x32xf32, #tpu.memory_space<vmem>>, %arg14: memref<8x32xf32, #tpu.memory_space<vmem>>, %arg15: memref<8x32xf32, #tpu.memory_space<vmem>>) attributes {dimension_semantics = [#tpu.dimension_semantics<parallel>, #tpu.dimension_semantics<arbitrary>], iteration_bounds = array<i64: 2, 1>, scalar_prefetch = 0 : i64, scratch_operands = 3 : i64, tpu.core_type = #tpu.core_type<tc>, window_params = [{transform_indices = @transform_0, window_bounds = array<i64: 8, 32>}, {transform_indices = @transform_1, window_bounds = array<i64: 8, 32>}, {transform_indices = @transform_2, window_bounds = array<i64: 32, 32>}, {pipeline_mode = #tpu.pipeline_mode<synchronous>, transform_indices = @transform_3, window_bounds = array<i64: 1, 32>}, {transform_indices = @transform_4, window_bounds = array<i64: 32, 32>}, {pipeline_mode = #tpu.pipeline_mode<synchronous>, transform_indices = @transform_5, window_bounds = array<i64: 1, 32>}, {transform_indices = @transform_6, window_bounds = array<i64: 32, 32>}, {pipeline_mode = #tpu.pipeline_mode<synchronous>, transform_indices = @transform_7, window_bounds = array<i64: 1, 32>}, {transform_indices = @transform_8, window_bounds = array<i64: 8, 32>}, {transform_indices = @transform_9, window_bounds = array<i64: 8, 32>}, {transform_indices = @transform_10, window_bounds = array<i64: 8, 32>}]} {
    %c0_i32 = arith.constant 0 : i32
    %0 = arith.cmpi eq, %arg1, %c0_i32 : i32
    %1 = arith.extui %0 : i1 to i32
    %c0_i32_0 = arith.constant 0 : i32
    %2 = arith.cmpi ne, %1, %c0_i32_0 : i32
    scf.if %2 {
      %cst_26 = arith.constant 0.000000e+00 : f32
      %26 = vector.broadcast %cst_26 : f32 to vector<8x32xf32>
      %c0_27 = arith.constant 0 : index
      %c0_28 = arith.constant 0 : index
      %27 = vector.load %arg13[%c0_27, %c0_28] : memref<8x32xf32, #tpu.memory_space<vmem>>, vector<8x32xf32>
      tpu.vector_store %arg13[%c0_27, %c0_28], %26 {strides = array<i32>} : memref<8x32xf32, #tpu.memory_space<vmem>>, vector<8x32xf32>,
      %cst_29 = arith.constant 0.000000e+00 : f32
      %28 = vector.broadcast %cst_29 : f32 to vector<8x32xf32>
      %c0_30 = arith.constant 0 : index
      %c0_31 = arith.constant 0 : index
      %29 = vector.load %arg14[%c0_30, %c0_31] : memref<8x32xf32, #tpu.memory_space<vmem>>, vector<8x32xf32>
      tpu.vector_store %arg14[%c0_30, %c0_31], %28 {strides = array<i32>} : memref<8x32xf32, #tpu.memory_space<vmem>>, vector<8x32xf32>,
      %cst_32 = arith.constant 0.000000e+00 : f32
      %30 = vector.broadcast %cst_32 : f32 to vector<8x32xf32>
      %c0_33 = arith.constant 0 : index
      %c0_34 = arith.constant 0 : index
      %31 = vector.load %arg15[%c0_33, %c0_34] : memref<8x32xf32, #tpu.memory_space<vmem>>, vector<8x32xf32>
      tpu.vector_store %arg15[%c0_33, %c0_34], %30 {strides = array<i32>} : memref<8x32xf32, #tpu.memory_space<vmem>>, vector<8x32xf32>,
    } else {
    }
    %c0 = arith.constant 0 : index
    %c0_1 = arith.constant 0 : index
    %3 = vector.load %arg2[%c0, %c0_1] : memref<8x32xf32, #tpu.memory_space<vmem>>, vector<8x32xf32>
    %c0_2 = arith.constant 0 : index
    %c0_3 = arith.constant 0 : index
    %4 = vector.load %arg3[%c0_2, %c0_3] : memref<8x32xf32, #tpu.memory_space<vmem>>, vector<8x32xf32>
    %5 = arith.addf %3, %4 : vector<8x32xf32>
    %6 = arith.truncf %5 : vector<8x32xf32> to vector<8x32xbf16>
    %7 = arith.truncf %3 : vector<8x32xf32> to vector<8x32xbf16>
    %c0_4 = arith.constant 0 : index
    %c0_5 = arith.constant 0 : index
    %8 = vector.load %arg13[%c0_4, %c0_5] : memref<8x32xf32, #tpu.memory_space<vmem>>, vector<8x32xf32>
    %c0_6 = arith.constant 0 : index
    %c0_7 = arith.constant 0 : index
    %9 = vector.load %arg4[%c0_6, %c0_7] : memref<32x32xbf16, #tpu.memory_space<vmem>>, vector<32x32xbf16>
    %cst = arith.constant dense<0.000000e+00> : vector<8x32xf32>
    %10 = tpu.matmul %6, %9, %cst {dimension_numbers = #tpu.dot_dimension_numbers<[1], [0], [0], [1], [0, 0, 1, 1], [], []>} : vector<8x32xbf16>, vector<32x32xbf16>, vector<8x32xf32> -> vector<8x32xf32>
    %11 = arith.addf %8, %10 : vector<8x32xf32>
    %c0_8 = arith.constant 0 : index
    %c0_9 = arith.constant 0 : index
    %12 = vector.load %arg13[%c0_8, %c0_9] : memref<8x32xf32, #tpu.memory_space<vmem>>, vector<8x32xf32>
    tpu.vector_store %arg13[%c0_8, %c0_9], %11 {strides = array<i32>} : memref<8x32xf32, #tpu.memory_space<vmem>>, vector<8x32xf32>,
    %c0_10 = arith.constant 0 : index
    %c0_11 = arith.constant 0 : index
    %13 = vector.load %arg14[%c0_10, %c0_11] : memref<8x32xf32, #tpu.memory_space<vmem>>, vector<8x32xf32>
    %c0_12 = arith.constant 0 : index
    %c0_13 = arith.constant 0 : index
    %14 = vector.load %arg6[%c0_12, %c0_13] : memref<32x32xbf16, #tpu.memory_space<vmem>>, vector<32x32xbf16>
    %cst_14 = arith.constant dense<0.000000e+00> : vector<8x32xf32>
    %15 = tpu.matmul %6, %14, %cst_14 {dimension_numbers = #tpu.dot_dimension_numbers<[1], [0], [0], [1], [0, 0, 1, 1], [], []>} : vector<8x32xbf16>, vector<32x32xbf16>, vector<8x32xf32> -> vector<8x32xf32>
    %16 = arith.addf %13, %15 : vector<8x32xf32>
    %c0_15 = arith.constant 0 : index
    %c0_16 = arith.constant 0 : index
    %17 = vector.load %arg14[%c0_15, %c0_16] : memref<8x32xf32, #tpu.memory_space<vmem>>, vector<8x32xf32>
    tpu.vector_store %arg14[%c0_15, %c0_16], %16 {strides = array<i32>} : memref<8x32xf32, #tpu.memory_space<vmem>>, vector<8x32xf32>,
    %c0_17 = arith.constant 0 : index
    %c0_18 = arith.constant 0 : index
    %18 = vector.load %arg15[%c0_17, %c0_18] : memref<8x32xf32, #tpu.memory_space<vmem>>, vector<8x32xf32>
    %c0_19 = arith.constant 0 : index
    %c0_20 = arith.constant 0 : index
    %19 = vector.load %arg8[%c0_19, %c0_20] : memref<32x32xbf16, #tpu.memory_space<vmem>>, vector<32x32xbf16>
    %cst_21 = arith.constant dense<0.000000e+00> : vector<8x32xf32>
    %20 = tpu.matmul %7, %19, %cst_21 {dimension_numbers = #tpu.dot_dimension_numbers<[1], [0], [0], [1], [0, 0, 1, 1], [], []>} : vector<8x32xbf16>, vector<32x32xbf16>, vector<8x32xf32> -> vector<8x32xf32>
    %21 = arith.addf %18, %20 : vector<8x32xf32>
    %c0_22 = arith.constant 0 : index
    %c0_23 = arith.constant 0 : index
    %22 = vector.load %arg15[%c0_22, %c0_23] : memref<8x32xf32, #tpu.memory_space<vmem>>, vector<8x32xf32>
    tpu.vector_store %arg15[%c0_22, %c0_23], %21 {strides = array<i32>} : memref<8x32xf32, #tpu.memory_space<vmem>>, vector<8x32xf32>,
    %c0_i32_24 = arith.constant 0 : i32
    %23 = arith.cmpi eq, %arg1, %c0_i32_24 : i32
    %24 = arith.extui %23 : i1 to i32
    %c0_i32_25 = arith.constant 0 : i32
    %25 = arith.cmpi ne, %24, %c0_i32_25 : i32
    scf.if %25 {
      %c0_26 = arith.constant 0 : index
      %c0_27 = arith.constant 0 : index
      %26 = vector.load %arg13[%c0_26, %c0_27] : memref<8x32xf32, #tpu.memory_space<vmem>>, vector<8x32xf32>
      %c0_28 = arith.constant 0 : index
      %c0_29 = arith.constant 0 : index
      %27 = vector.load %arg5[%c0_28, %c0_29] : memref<1x32xf32, #tpu.memory_space<vmem>>, vector<1x32xf32>
      %28 = vector.broadcast %27 : vector<1x32xf32> to vector<8x32xf32>
      %29 = arith.addf %26, %28 : vector<8x32xf32>
      %30 = arith.truncf %29 : vector<8x32xf32> to vector<8x32xbf16>
      %c0_30 = arith.constant 0 : index
      %c0_31 = arith.constant 0 : index
      %31 = vector.load %arg10[%c0_30, %c0_31] : memref<8x32xbf16, #tpu.memory_space<vmem>>, vector<8x32xbf16>
      tpu.vector_store %arg10[%c0_30, %c0_31], %30 {strides = array<i32>} : memref<8x32xbf16, #tpu.memory_space<vmem>>, vector<8x32xbf16>,
      %c0_32 = arith.constant 0 : index
      %c0_33 = arith.constant 0 : index
      %32 = vector.load %arg14[%c0_32, %c0_33] : memref<8x32xf32, #tpu.memory_space<vmem>>, vector<8x32xf32>
      %c0_34 = arith.constant 0 : index
      %c0_35 = arith.constant 0 : index
      %33 = vector.load %arg7[%c0_34, %c0_35] : memref<1x32xf32, #tpu.memory_space<vmem>>, vector<1x32xf32>
      %34 = vector.broadcast %33 : vector<1x32xf32> to vector<8x32xf32>
      %35 = arith.addf %32, %34 : vector<8x32xf32>
      %36 = arith.truncf %35 : vector<8x32xf32> to vector<8x32xbf16>
      %c0_36 = arith.constant 0 : index
      %c0_37 = arith.constant 0 : index
      %37 = vector.load %arg11[%c0_36, %c0_37] : memref<8x32xbf16, #tpu.memory_space<vmem>>, vector<8x32xbf16>
      tpu.vector_store %arg11[%c0_36, %c0_37], %36 {strides = array<i32>} : memref<8x32xbf16, #tpu.memory_space<vmem>>, vector<8x32xbf16>,
      %c0_38 = arith.constant 0 : index
      %c0_39 = arith.constant 0 : index
      %38 = vector.load %arg15[%c0_38, %c0_39] : memref<8x32xf32, #tpu.memory_space<vmem>>, vector<8x32xf32>
      %c0_40 = arith.constant 0 : index
      %c0_41 = arith.constant 0 : index
      %39 = vector.load %arg9[%c0_40, %c0_41] : memref<1x32xf32, #tpu.memory_space<vmem>>, vector<1x32xf32>
      %40 = vector.broadcast %39 : vector<1x32xf32> to vector<8x32xf32>
      %41 = arith.addf %38, %40 : vector<8x32xf32>
      %42 = arith.truncf %41 : vector<8x32xf32> to vector<8x32xbf16>
      %c0_42 = arith.constant 0 : index
      %c0_43 = arith.constant 0 : index
      %43 = vector.load %arg12[%c0_42, %c0_43] : memref<8x32xbf16, #tpu.memory_space<vmem>>, vector<8x32xbf16>
      tpu.vector_store %arg12[%c0_42, %c0_43], %42 {strides = array<i32>} : memref<8x32xbf16, #tpu.memory_space<vmem>>, vector<8x32xbf16>,
    } else {
    }
    return
  }
  func.func @transform_0(%arg0: i32, %arg1: i32) -> (i32, i32) {
    %c0_i32 = arith.constant 0 : i32
    return %arg0, %arg1 : i32, i32
  }
  func.func @transform_1(%arg0: i32, %arg1: i32) -> (i32, i32) {
    %c0_i32 = arith.constant 0 : i32
    return %arg0, %arg1 : i32, i32
  }
  func.func @transform_2(%arg0: i32, %arg1: i32) -> (i32, i32) {
    %c0_i32 = arith.constant 0 : i32
    %c0_i32_0 = arith.constant 0 : i32
    return %arg1, %c0_i32 : i32, i32
  }
  func.func @transform_3(%arg0: i32, %arg1: i32) -> (i32, i32) {
    %c0_i32 = arith.constant 0 : i32
    %c0_i32_0 = arith.constant 0 : i32
    %c0_i32_1 = arith.constant 0 : i32
    return %c0_i32, %c0_i32_0 : i32, i32
  }
  func.func @transform_4(%arg0: i32, %arg1: i32) -> (i32, i32) {
    %c0_i32 = arith.constant 0 : i32
    %c0_i32_0 = arith.constant 0 : i32
    return %arg1, %c0_i32 : i32, i32
  }
  func.func @transform_5(%arg0: i32, %arg1: i32) -> (i32, i32) {
    %c0_i32 = arith.constant 0 : i32
    %c0_i32_0 = arith.constant 0 : i32
    %c0_i32_1 = arith.constant 0 : i32
    return %c0_i32, %c0_i32_0 : i32, i32
  }
  func.func @transform_6(%arg0: i32, %arg1: i32) -> (i32, i32) {
    %c0_i32 = arith.constant 0 : i32
    %c0_i32_0 = arith.constant 0 : i32
    return %arg1, %c0_i32 : i32, i32
  }
  func.func @transform_7(%arg0: i32, %arg1: i32) -> (i32, i32) {
    %c0_i32 = arith.constant 0 : i32
    %c0_i32_0 = arith.constant 0 : i32
    %c0_i32_1 = arith.constant 0 : i32
    return %c0_i32, %c0_i32_0 : i32, i32
  }
  func.func @transform_8(%arg0: i32, %arg1: i32) -> (i32, i32) {
    %c0_i32 = arith.constant 0 : i32
    %c0_i32_0 = arith.constant 0 : i32
    return %arg0, %c0_i32 : i32, i32
  }
  func.func @transform_9(%arg0: i32, %arg1: i32) -> (i32, i32) {
    %c0_i32 = arith.constant 0 : i32
    %c0_i32_0 = arith.constant 0 : i32
    return %arg0, %c0_i32 : i32, i32
  }
  func.func @transform_10(%arg0: i32, %arg1: i32) -> (i32, i32) {
    %c0_i32 = arith.constant 0 : i32
    %c0_i32_0 = arith.constant 0 : i32
    return %arg0, %c0_i32 : i32, i32
  }
}

module attributes {stable_mosaic.version = 11 : i64} {
  func.func @_add_proj_kernel(%arg0: i32, %arg1: i32, %arg2: memref<8x32xf32, #tpu.memory_space<vmem>>, %arg3: memref<8x32xf32, #tpu.memory_space<vmem>>, %arg4: memref<32x32xbf16, #tpu.memory_space<vmem>>, %arg5: memref<1x32xf32, #tpu.memory_space<vmem>>, %arg6: memref<8x32xbf16, #tpu.memory_space<vmem>>, %arg7: memref<8x32xf32, #tpu.memory_space<vmem>>) attributes {dimension_semantics = [#tpu.dimension_semantics<parallel>, #tpu.dimension_semantics<arbitrary>], iteration_bounds = array<i64: 2, 1>, scalar_prefetch = 0 : i64, scratch_operands = 1 : i64, tpu.core_type = #tpu.core_type<tc>, window_params = [{transform_indices = @transform_0, window_bounds = array<i64: 8, 32>}, {transform_indices = @transform_1, window_bounds = array<i64: 8, 32>}, {transform_indices = @transform_2, window_bounds = array<i64: 32, 32>}, {pipeline_mode = #tpu.pipeline_mode<synchronous>, transform_indices = @transform_3, window_bounds = array<i64: 1, 32>}, {transform_indices = @transform_4, window_bounds = array<i64: 8, 32>}]} {
    %c0_i32 = arith.constant 0 : i32
    %0 = arith.cmpi eq, %arg1, %c0_i32 : i32
    %1 = arith.extui %0 : i1 to i32
    %c0_i32_0 = arith.constant 0 : i32
    %2 = arith.cmpi ne, %1, %c0_i32_0 : i32
    scf.if %2 {
      %cst_12 = arith.constant 0.000000e+00 : f32
      %15 = vector.broadcast %cst_12 : f32 to vector<8x32xf32>
      %c0_13 = arith.constant 0 : index
      %c0_14 = arith.constant 0 : index
      %16 = vector.load %arg7[%c0_13, %c0_14] : memref<8x32xf32, #tpu.memory_space<vmem>>, vector<8x32xf32>
      tpu.vector_store %arg7[%c0_13, %c0_14], %15 {strides = array<i32>} : memref<8x32xf32, #tpu.memory_space<vmem>>, vector<8x32xf32>,
    } else {
    }
    %c0 = arith.constant 0 : index
    %c0_1 = arith.constant 0 : index
    %3 = vector.load %arg2[%c0, %c0_1] : memref<8x32xf32, #tpu.memory_space<vmem>>, vector<8x32xf32>
    %c0_2 = arith.constant 0 : index
    %c0_3 = arith.constant 0 : index
    %4 = vector.load %arg3[%c0_2, %c0_3] : memref<8x32xf32, #tpu.memory_space<vmem>>, vector<8x32xf32>
    %5 = arith.addf %3, %4 : vector<8x32xf32>
    %6 = arith.truncf %5 : vector<8x32xf32> to vector<8x32xbf16>
    %c0_4 = arith.constant 0 : index
    %c0_5 = arith.constant 0 : index
    %7 = vector.load %arg7[%c0_4, %c0_5] : memref<8x32xf32, #tpu.memory_space<vmem>>, vector<8x32xf32>
    %c0_6 = arith.constant 0 : index
    %c0_7 = arith.constant 0 : index
    %8 = vector.load %arg4[%c0_6, %c0_7] : memref<32x32xbf16, #tpu.memory_space<vmem>>, vector<32x32xbf16>
    %cst = arith.constant dense<0.000000e+00> : vector<8x32xf32>
    %9 = tpu.matmul %6, %8, %cst {dimension_numbers = #tpu.dot_dimension_numbers<[1], [0], [0], [1], [0, 0, 1, 1], [], []>} : vector<8x32xbf16>, vector<32x32xbf16>, vector<8x32xf32> -> vector<8x32xf32>
    %10 = arith.addf %7, %9 : vector<8x32xf32>
    %c0_8 = arith.constant 0 : index
    %c0_9 = arith.constant 0 : index
    %11 = vector.load %arg7[%c0_8, %c0_9] : memref<8x32xf32, #tpu.memory_space<vmem>>, vector<8x32xf32>
    tpu.vector_store %arg7[%c0_8, %c0_9], %10 {strides = array<i32>} : memref<8x32xf32, #tpu.memory_space<vmem>>, vector<8x32xf32>,
    %c0_i32_10 = arith.constant 0 : i32
    %12 = arith.cmpi eq, %arg1, %c0_i32_10 : i32
    %13 = arith.extui %12 : i1 to i32
    %c0_i32_11 = arith.constant 0 : i32
    %14 = arith.cmpi ne, %13, %c0_i32_11 : i32
    scf.if %14 {
      %c0_12 = arith.constant 0 : index
      %c0_13 = arith.constant 0 : index
      %15 = vector.load %arg7[%c0_12, %c0_13] : memref<8x32xf32, #tpu.memory_space<vmem>>, vector<8x32xf32>
      %c0_14 = arith.constant 0 : index
      %c0_15 = arith.constant 0 : index
      %16 = vector.load %arg5[%c0_14, %c0_15] : memref<1x32xf32, #tpu.memory_space<vmem>>, vector<1x32xf32>
      %17 = vector.broadcast %16 : vector<1x32xf32> to vector<8x32xf32>
      %18 = arith.addf %15, %17 : vector<8x32xf32>
      %19 = arith.truncf %18 : vector<8x32xf32> to vector<8x32xbf16>
      %c0_16 = arith.constant 0 : index
      %c0_17 = arith.constant 0 : index
      %20 = vector.load %arg6[%c0_16, %c0_17] : memref<8x32xbf16, #tpu.memory_space<vmem>>, vector<8x32xbf16>
      tpu.vector_store %arg6[%c0_16, %c0_17], %19 {strides = array<i32>} : memref<8x32xbf16, #tpu.memory_space<vmem>>, vector<8x32xbf16>,
    } else {
    }
    return
  }
  func.func @transform_0(%arg0: i32, %arg1: i32) -> (i32, i32) {
    %c0_i32 = arith.constant 0 : i32
    return %arg0, %arg1 : i32, i32
  }
  func.func @transform_1(%arg0: i32, %arg1: i32) -> (i32, i32) {
    %c0_i32 = arith.constant 0 : i32
    return %arg0, %arg1 : i32, i32
  }
  func.func @transform_2(%arg0: i32, %arg1: i32) -> (i32, i32) {
    %c0_i32 = arith.constant 0 : i32
    %c0_i32_0 = arith.constant 0 : i32
    return %arg1, %c0_i32 : i32, i32
  }
  func.func @transform_3(%arg0: i32, %arg1: i32) -> (i32, i32) {
    %c0_i32 = arith.constant 0 : i32
    %c0_i32_0 = arith.constant 0 : i32
    %c0_i32_1 = arith.constant 0 : i32
    return %c0_i32, %c0_i32_0 : i32, i32
  }
  func.func @transform_4(%arg0: i32, %arg1: i32) -> (i32, i32) {
    %c0_i32 = arith.constant 0 : i32
    %c0_i32_0 = arith.constant 0 : i32
    return %arg0, %c0_i32 : i32, i32
  }
}

module attributes {stable_mosaic.version = 11 : i64} {
  func.func @_proj_add_ln_kernel(%arg0: i32, %arg1: i32, %arg2: memref<8x32xbf16, #tpu.memory_space<vmem>>, %arg3: memref<8x32xf32, #tpu.memory_space<vmem>>, %arg4: memref<32x32xbf16, #tpu.memory_space<vmem>>, %arg5: memref<1x32xf32, #tpu.memory_space<vmem>>, %arg6: memref<1x32xf32, #tpu.memory_space<vmem>>, %arg7: memref<1x32xf32, #tpu.memory_space<vmem>>, %arg8: memref<8x32xf32, #tpu.memory_space<vmem>>, %arg9: memref<8x32xf32, #tpu.memory_space<vmem>>) attributes {dimension_semantics = [#tpu.dimension_semantics<parallel>, #tpu.dimension_semantics<arbitrary>], iteration_bounds = array<i64: 2, 1>, scalar_prefetch = 0 : i64, scratch_operands = 1 : i64, tpu.core_type = #tpu.core_type<tc>, window_params = [{transform_indices = @transform_0, window_bounds = array<i64: 8, 32>}, {transform_indices = @transform_1, window_bounds = array<i64: 8, 32>}, {transform_indices = @transform_2, window_bounds = array<i64: 32, 32>}, {pipeline_mode = #tpu.pipeline_mode<synchronous>, transform_indices = @transform_3, window_bounds = array<i64: 1, 32>}, {pipeline_mode = #tpu.pipeline_mode<synchronous>, transform_indices = @transform_4, window_bounds = array<i64: 1, 32>}, {pipeline_mode = #tpu.pipeline_mode<synchronous>, transform_indices = @transform_5, window_bounds = array<i64: 1, 32>}, {transform_indices = @transform_6, window_bounds = array<i64: 8, 32>}]} {
    %c0_i32 = arith.constant 0 : i32
    %0 = arith.cmpi eq, %arg1, %c0_i32 : i32
    %1 = arith.extui %0 : i1 to i32
    %c0_i32_0 = arith.constant 0 : i32
    %2 = arith.cmpi ne, %1, %c0_i32_0 : i32
    scf.if %2 {
      %cst_10 = arith.constant 0.000000e+00 : f32
      %12 = vector.broadcast %cst_10 : f32 to vector<8x32xf32>
      %c0_11 = arith.constant 0 : index
      %c0_12 = arith.constant 0 : index
      %13 = vector.load %arg9[%c0_11, %c0_12] : memref<8x32xf32, #tpu.memory_space<vmem>>, vector<8x32xf32>
      tpu.vector_store %arg9[%c0_11, %c0_12], %12 {strides = array<i32>} : memref<8x32xf32, #tpu.memory_space<vmem>>, vector<8x32xf32>,
    } else {
    }
    %c0 = arith.constant 0 : index
    %c0_1 = arith.constant 0 : index
    %3 = vector.load %arg9[%c0, %c0_1] : memref<8x32xf32, #tpu.memory_space<vmem>>, vector<8x32xf32>
    %c0_2 = arith.constant 0 : index
    %c0_3 = arith.constant 0 : index
    %4 = vector.load %arg2[%c0_2, %c0_3] : memref<8x32xbf16, #tpu.memory_space<vmem>>, vector<8x32xbf16>
    %c0_4 = arith.constant 0 : index
    %c0_5 = arith.constant 0 : index
    %5 = vector.load %arg4[%c0_4, %c0_5] : memref<32x32xbf16, #tpu.memory_space<vmem>>, vector<32x32xbf16>
    %cst = arith.constant dense<0.000000e+00> : vector<8x32xf32>
    %6 = tpu.matmul %4, %5, %cst {dimension_numbers = #tpu.dot_dimension_numbers<[1], [0], [0], [1], [0, 0, 1, 1], [], []>} : vector<8x32xbf16>, vector<32x32xbf16>, vector<8x32xf32> -> vector<8x32xf32>
    %7 = arith.addf %3, %6 : vector<8x32xf32>
    %c0_6 = arith.constant 0 : index
    %c0_7 = arith.constant 0 : index
    %8 = vector.load %arg9[%c0_6, %c0_7] : memref<8x32xf32, #tpu.memory_space<vmem>>, vector<8x32xf32>
    tpu.vector_store %arg9[%c0_6, %c0_7], %7 {strides = array<i32>} : memref<8x32xf32, #tpu.memory_space<vmem>>, vector<8x32xf32>,
    %c0_i32_8 = arith.constant 0 : i32
    %9 = arith.cmpi eq, %arg1, %c0_i32_8 : i32
    %10 = arith.extui %9 : i1 to i32
    %c0_i32_9 = arith.constant 0 : i32
    %11 = arith.cmpi ne, %10, %c0_i32_9 : i32
    scf.if %11 {
      %c0_10 = arith.constant 0 : index
      %c0_11 = arith.constant 0 : index
      %12 = vector.load %arg9[%c0_10, %c0_11] : memref<8x32xf32, #tpu.memory_space<vmem>>, vector<8x32xf32>
      %c0_12 = arith.constant 0 : index
      %c0_13 = arith.constant 0 : index
      %13 = vector.load %arg5[%c0_12, %c0_13] : memref<1x32xf32, #tpu.memory_space<vmem>>, vector<1x32xf32>
      %14 = vector.broadcast %13 : vector<1x32xf32> to vector<8x32xf32>
      %15 = arith.addf %12, %14 : vector<8x32xf32>
      %c0_14 = arith.constant 0 : index
      %c0_15 = arith.constant 0 : index
      %16 = vector.load %arg3[%c0_14, %c0_15] : memref<8x32xf32, #tpu.memory_space<vmem>>, vector<8x32xf32>
      %17 = arith.addf %16, %15 : vector<8x32xf32>
      %c0_16 = arith.constant 0 : index
      %c0_17 = arith.constant 0 : index
      %18 = vector.load %arg6[%c0_16, %c0_17] : memref<1x32xf32, #tpu.memory_space<vmem>>, vector<1x32xf32>
      %c0_18 = arith.constant 0 : index
      %c0_19 = arith.constant 0 : index
      %19 = vector.load %arg7[%c0_18, %c0_19] : memref<1x32xf32, #tpu.memory_space<vmem>>, vector<1x32xf32>
      %cst_20 = arith.constant dense<0.000000e+00> : vector<8xf32>
      %20 = vector.multi_reduction <add>, %17, %cst_20 [1] : vector<8x32xf32> to vector<8xf32>
      %21 = vector.shape_cast %20 : vector<8xf32> to vector<8x1xf32>
      %cst_21 = arith.constant 3.200000e+01 : f32
      %22 = vector.broadcast %cst_21 : f32 to vector<8x1xf32>
      %23 = arith.divf %21, %22 : vector<8x1xf32>
      %24 = vector.broadcast %23 : vector<8x1xf32> to vector<8x32xf32>
      %25 = arith.subf %17, %24 : vector<8x32xf32>
      %26 = arith.mulf %25, %25 : vector<8x32xf32>
      %cst_22 = arith.constant dense<0.000000e+00> : vector<8xf32>
      %27 = vector.multi_reduction <add>, %26, %cst_22 [1] : vector<8x32xf32> to vector<8xf32>
      %28 = vector.shape_cast %27 : vector<8xf32> to vector<8x1xf32>
      %cst_23 = arith.constant 3.200000e+01 : f32
      %29 = vector.broadcast %cst_23 : f32 to vector<8x1xf32>
      %30 = arith.divf %28, %29 : vector<8x1xf32>
      %cst_24 = arith.constant 9.99999974E-6 : f32
      %31 = vector.broadcast %cst_24 : f32 to vector<8x1xf32>
      %32 = arith.addf %30, %31 : vector<8x1xf32>
      %33 = math.rsqrt %32 : vector<8x1xf32>
      %34 = vector.broadcast %33 : vector<8x1xf32> to vector<8x32xf32>
      %35 = arith.mulf %25, %34 : vector<8x32xf32>
      %36 = vector.broadcast %18 : vector<1x32xf32> to vector<8x32xf32>
      %37 = arith.mulf %35, %36 : vector<8x32xf32>
      %38 = vector.broadcast %19 : vector<1x32xf32> to vector<8x32xf32>
      %39 = arith.addf %37, %38 : vector<8x32xf32>
      %c0_25 = arith.constant 0 : index
      %c0_26 = arith.constant 0 : index
      %40 = vector.load %arg8[%c0_25, %c0_26] : memref<8x32xf32, #tpu.memory_space<vmem>>, vector<8x32xf32>
      tpu.vector_store %arg8[%c0_25, %c0_26], %39 {strides = array<i32>} : memref<8x32xf32, #tpu.memory_space<vmem>>, vector<8x32xf32>,
    } else {
    }
    return
  }
  func.func @transform_0(%arg0: i32, %arg1: i32) -> (i32, i32) {
    %c0_i32 = arith.constant 0 : i32
    return %arg0, %arg1 : i32, i32
  }
  func.func @transform_1(%arg0: i32, %arg1: i32) -> (i32, i32) {
    %c0_i32 = arith.constant 0 : i32
    %c0_i32_0 = arith.constant 0 : i32
    return %arg0, %c0_i32 : i32, i32
  }
  func.func @transform_2(%arg0: i32, %arg1: i32) -> (i32, i32) {
    %c0_i32 = arith.constant 0 : i32
    %c0_i32_0 = arith.constant 0 : i32
    return %arg1, %c0_i32 : i32, i32
  }
  func.func @transform_3(%arg0: i32, %arg1: i32) -> (i32, i32) {
    %c0_i32 = arith.constant 0 : i32
    %c0_i32_0 = arith.constant 0 : i32
    %c0_i32_1 = arith.constant 0 : i32
    return %c0_i32, %c0_i32_0 : i32, i32
  }
  func.func @transform_4(%arg0: i32, %arg1: i32) -> (i32, i32) {
    %c0_i32 = arith.constant 0 : i32
    %c0_i32_0 = arith.constant 0 : i32
    %c0_i32_1 = arith.constant 0 : i32
    return %c0_i32, %c0_i32_0 : i32, i32
  }
  func.func @transform_5(%arg0: i32, %arg1: i32) -> (i32, i32) {
    %c0_i32 = arith.constant 0 : i32
    %c0_i32_0 = arith.constant 0 : i32
    %c0_i32_1 = arith.constant 0 : i32
    return %c0_i32, %c0_i32_0 : i32, i32
  }
  func.func @transform_6(%arg0: i32, %arg1: i32) -> (i32, i32) {
    %c0_i32 = arith.constant 0 : i32
    %c0_i32_0 = arith.constant 0 : i32
    return %arg0, %c0_i32 : i32, i32
  }
}

module attributes {stable_mosaic.version = 11 : i64} {
  func.func @_flash_attn_kernel(%arg0: i32, %arg1: i32, %arg2: i32, %arg3: memref<1x8x32xbf16, #tpu.memory_space<vmem>>, %arg4: memref<1x16x32xbf16, #tpu.memory_space<vmem>>, %arg5: memref<1x16x32xbf16, #tpu.memory_space<vmem>>, %arg6: memref<1x8x32xbf16, #tpu.memory_space<vmem>>, %arg7: memref<4x8x1xf32, #tpu.memory_space<vmem>>, %arg8: memref<4x8x1xf32, #tpu.memory_space<vmem>>, %arg9: memref<4x8x8xf32, #tpu.memory_space<vmem>>) attributes {dimension_semantics = [#tpu.dimension_semantics<parallel>, #tpu.dimension_semantics<parallel>, #tpu.dimension_semantics<arbitrary>], iteration_bounds = array<i64: 2, 1, 1>, scalar_prefetch = 0 : i64, scratch_operands = 3 : i64, tpu.core_type = #tpu.core_type<tc>, window_params = [{transform_indices = @transform_0, window_bounds = array<i64: 1, 8, 32>}, {transform_indices = @transform_1, window_bounds = array<i64: 1, 16, 32>}, {transform_indices = @transform_2, window_bounds = array<i64: 1, 16, 32>}, {transform_indices = @transform_3, window_bounds = array<i64: 1, 8, 32>}]} {
    %c0_i32 = arith.constant 0 : i32
    %0 = arith.cmpi eq, %arg2, %c0_i32 : i32
    %1 = arith.extui %0 : i1 to i32
    %c0_i32_0 = arith.constant 0 : i32
    %2 = arith.cmpi ne, %1, %c0_i32_0 : i32
    scf.if %2 {
      %cst_96 = arith.constant 0xFF800000 : f32
      %160 = vector.broadcast %cst_96 : f32 to vector<4x8x1xf32>
      %c0_97 = arith.constant 0 : index
      %c0_98 = arith.constant 0 : index
      %c0_99 = arith.constant 0 : index
      %161 = vector.load %arg7[%c0_97, %c0_98, %c0_99] : memref<4x8x1xf32, #tpu.memory_space<vmem>>, vector<4x8x1xf32>
      tpu.vector_store %arg7[%c0_97, %c0_98, %c0_99], %160 {strides = array<i32>} : memref<4x8x1xf32, #tpu.memory_space<vmem>>, vector<4x8x1xf32>,
      %cst_100 = arith.constant 0.000000e+00 : f32
      %162 = vector.broadcast %cst_100 : f32 to vector<4x8x1xf32>
      %c0_101 = arith.constant 0 : index
      %c0_102 = arith.constant 0 : index
      %c0_103 = arith.constant 0 : index
      %163 = vector.load %arg8[%c0_101, %c0_102, %c0_103] : memref<4x8x1xf32, #tpu.memory_space<vmem>>, vector<4x8x1xf32>
      tpu.vector_store %arg8[%c0_101, %c0_102, %c0_103], %162 {strides = array<i32>} : memref<4x8x1xf32, #tpu.memory_space<vmem>>, vector<4x8x1xf32>,
      %cst_104 = arith.constant 0.000000e+00 : f32
      %164 = vector.broadcast %cst_104 : f32 to vector<4x8x8xf32>
      %c0_105 = arith.constant 0 : index
      %c0_106 = arith.constant 0 : index
      %c0_107 = arith.constant 0 : index
      %165 = vector.load %arg9[%c0_105, %c0_106, %c0_107] : memref<4x8x8xf32, #tpu.memory_space<vmem>>, vector<4x8x8xf32>
      tpu.vector_store %arg9[%c0_105, %c0_106, %c0_107], %164 {strides = array<i32>} : memref<4x8x8xf32, #tpu.memory_space<vmem>>, vector<4x8x8xf32>,
    } else {
    }
    %c0 = arith.constant 0 : index
    %c0_1 = arith.constant 0 : index
    %c0_2 = arith.constant 0 : index
    %3 = vector.load %arg3[%c0, %c0_1, %c0_2] : memref<1x8x32xbf16, #tpu.memory_space<vmem>>, vector<1x8x32xbf16>
    %4 = vector.shape_cast %3 : vector<1x8x32xbf16> to vector<8x32xbf16>
    %5 = arith.extf %4 : vector<8x32xbf16> to vector<8x32xf32>
    %cst = arith.constant 0.353553385 : f32
    %6 = vector.broadcast %cst : f32 to vector<8x32xf32>
    %7 = arith.mulf %5, %6 : vector<8x32xf32>
    %8 = arith.truncf %7 : vector<8x32xf32> to vector<8x32xbf16>
    %c0_3 = arith.constant 0 : index
    %c0_4 = arith.constant 0 : index
    %c0_5 = arith.constant 0 : index
    %9 = vector.load %arg4[%c0_3, %c0_4, %c0_5] : memref<1x16x32xbf16, #tpu.memory_space<vmem>>, vector<1x16x32xbf16>
    %10 = vector.shape_cast %9 : vector<1x16x32xbf16> to vector<16x32xbf16>
    %c0_6 = arith.constant 0 : index
    %c0_7 = arith.constant 0 : index
    %c0_8 = arith.constant 0 : index
    %11 = vector.load %arg5[%c0_6, %c0_7, %c0_8] : memref<1x16x32xbf16, #tpu.memory_space<vmem>>, vector<1x16x32xbf16>
    %12 = vector.shape_cast %11 : vector<1x16x32xbf16> to vector<16x32xbf16>
    %13 = vector.extract_strided_slice %8 {offsets = [0, 0], sizes = [8, 8], strides = [1, 1]} : vector<8x32xbf16> to vector<8x8xbf16>
    %14 = vector.extract_strided_slice %10 {offsets = [0, 0], sizes = [16, 8], strides = [1, 1]} : vector<16x32xbf16> to vector<16x8xbf16>
    %cst_9 = arith.constant dense<0.000000e+00> : vector<8x16xf32>
    %15 = tpu.matmul %13, %14, %cst_9 {dimension_numbers = #tpu.dot_dimension_numbers<[1], [1], [0], [0], [0, 0, 1, 0], [], []>} : vector<8x8xbf16>, vector<16x8xbf16>, vector<8x16xf32> -> vector<8x16xf32>
    %c0_10 = arith.constant 0 : index
    %c0_11 = arith.constant 0 : index
    %c0_12 = arith.constant 0 : index
    %16 = vector.load %arg7[%c0_10, %c0_11, %c0_12] : memref<4x8x1xf32, #tpu.memory_space<vmem>>, vector<1x8x1xf32>
    %17 = vector.shape_cast %16 : vector<1x8x1xf32> to vector<8x1xf32>
    %cst_13 = arith.constant dense<0xFF800000> : vector<8xf32>
    %18 = vector.multi_reduction <maximumf>, %15, %cst_13 [1] : vector<8x16xf32> to vector<8xf32>
    %19 = vector.shape_cast %18 : vector<8xf32> to vector<8x1xf32>
    %20 = arith.maximumf %17, %19 : vector<8x1xf32>
    %21 = arith.subf %17, %20 : vector<8x1xf32>
    %22 = math.exp %21 : vector<8x1xf32>
    %23 = vector.broadcast %20 : vector<8x1xf32> to vector<8x16xf32>
    %24 = arith.subf %15, %23 : vector<8x16xf32>
    %25 = math.exp %24 : vector<8x16xf32>
    %c0_14 = arith.constant 0 : index
    %c0_15 = arith.constant 0 : index
    %c0_16 = arith.constant 0 : index
    %26 = vector.load %arg8[%c0_14, %c0_15, %c0_16] : memref<4x8x1xf32, #tpu.memory_space<vmem>>, vector<1x8x1xf32>
    %27 = vector.shape_cast %26 : vector<1x8x1xf32> to vector<8x1xf32>
    %28 = arith.mulf %22, %27 : vector<8x1xf32>
    %cst_17 = arith.constant dense<0.000000e+00> : vector<8xf32>
    %29 = vector.multi_reduction <add>, %25, %cst_17 [1] : vector<8x16xf32> to vector<8xf32>
    %30 = vector.shape_cast %29 : vector<8xf32> to vector<8x1xf32>
    %31 = arith.addf %28, %30 : vector<8x1xf32>
    %c0_18 = arith.constant 0 : index
    %c0_19 = arith.constant 0 : index
    %c0_20 = arith.constant 0 : index
    %32 = vector.load %arg8[%c0_18, %c0_19, %c0_20] : memref<4x8x1xf32, #tpu.memory_space<vmem>>, vector<1x8x1xf32>
    %33 = vector.shape_cast %32 : vector<1x8x1xf32> to vector<8x1xf32>
    %34 = vector.shape_cast %31 : vector<8x1xf32> to vector<1x8x1xf32>
    tpu.vector_store %arg8[%c0_18, %c0_19, %c0_20], %34 {strides = array<i32>} : memref<4x8x1xf32, #tpu.memory_space<vmem>>, vector<1x8x1xf32>,
    %c0_21 = arith.constant 0 : index
    %c0_22 = arith.constant 0 : index
    %c0_23 = arith.constant 0 : index
    %35 = vector.load %arg9[%c0_21, %c0_22, %c0_23] : memref<4x8x8xf32, #tpu.memory_space<vmem>>, vector<1x8x8xf32>
    %36 = vector.shape_cast %35 : vector<1x8x8xf32> to vector<8x8xf32>
    %37 = vector.broadcast %22 : vector<8x1xf32> to vector<8x8xf32>
    %38 = arith.mulf %37, %36 : vector<8x8xf32>
    %39 = arith.truncf %25 : vector<8x16xf32> to vector<8x16xbf16>
    %40 = vector.extract_strided_slice %12 {offsets = [0, 0], sizes = [16, 8], strides = [1, 1]} : vector<16x32xbf16> to vector<16x8xbf16>
    %cst_24 = arith.constant dense<0.000000e+00> : vector<8x8xf32>
    %41 = tpu.matmul %39, %40, %cst_24 {dimension_numbers = #tpu.dot_dimension_numbers<[1], [0], [0], [1], [0, 0, 1, 1], [], []>} : vector<8x16xbf16>, vector<16x8xbf16>, vector<8x8xf32> -> vector<8x8xf32>
    %42 = arith.addf %38, %41 : vector<8x8xf32>
    %c0_25 = arith.constant 0 : index
    %c0_26 = arith.constant 0 : index
    %c0_27 = arith.constant 0 : index
    %43 = vector.load %arg9[%c0_25, %c0_26, %c0_27] : memref<4x8x8xf32, #tpu.memory_space<vmem>>, vector<1x8x8xf32>
    %44 = vector.shape_cast %43 : vector<1x8x8xf32> to vector<8x8xf32>
    %45 = vector.shape_cast %42 : vector<8x8xf32> to vector<1x8x8xf32>
    tpu.vector_store %arg9[%c0_25, %c0_26, %c0_27], %45 {strides = array<i32>} : memref<4x8x8xf32, #tpu.memory_space<vmem>>, vector<1x8x8xf32>,
    %c0_28 = arith.constant 0 : index
    %c0_29 = arith.constant 0 : index
    %c0_30 = arith.constant 0 : index
    %46 = vector.load %arg7[%c0_28, %c0_29, %c0_30] : memref<4x8x1xf32, #tpu.memory_space<vmem>>, vector<1x8x1xf32>
    %47 = vector.shape_cast %46 : vector<1x8x1xf32> to vector<8x1xf32>
    %48 = vector.shape_cast %20 : vector<8x1xf32> to vector<1x8x1xf32>
    tpu.vector_store %arg7[%c0_28, %c0_29, %c0_30], %48 {strides = array<i32>} : memref<4x8x1xf32, #tpu.memory_space<vmem>>, vector<1x8x1xf32>,
    %49 = vector.extract_strided_slice %8 {offsets = [0, 8], sizes = [8, 8], strides = [1, 1]} : vector<8x32xbf16> to vector<8x8xbf16>
    %50 = vector.extract_strided_slice %10 {offsets = [0, 8], sizes = [16, 8], strides = [1, 1]} : vector<16x32xbf16> to vector<16x8xbf16>
    %cst_31 = arith.constant dense<0.000000e+00> : vector<8x16xf32>
    %51 = tpu.matmul %49, %50, %cst_31 {dimension_numbers = #tpu.dot_dimension_numbers<[1], [1], [0], [0], [0, 0, 1, 0], [], []>} : vector<8x8xbf16>, vector<16x8xbf16>, vector<8x16xf32> -> vector<8x16xf32>
    %c1 = arith.constant 1 : index
    %c0_32 = arith.constant 0 : index
    %c0_33 = arith.constant 0 : index
    %52 = vector.load %arg7[%c1, %c0_32, %c0_33] : memref<4x8x1xf32, #tpu.memory_space<vmem>>, vector<1x8x1xf32>
    %53 = vector.shape_cast %52 : vector<1x8x1xf32> to vector<8x1xf32>
    %cst_34 = arith.constant dense<0xFF800000> : vector<8xf32>
    %54 = vector.multi_reduction <maximumf>, %51, %cst_34 [1] : vector<8x16xf32> to vector<8xf32>
    %55 = vector.shape_cast %54 : vector<8xf32> to vector<8x1xf32>
    %56 = arith.maximumf %53, %55 : vector<8x1xf32>
    %57 = arith.subf %53, %56 : vector<8x1xf32>
    %58 = math.exp %57 : vector<8x1xf32>
    %59 = vector.broadcast %56 : vector<8x1xf32> to vector<8x16xf32>
    %60 = arith.subf %51, %59 : vector<8x16xf32>
    %61 = math.exp %60 : vector<8x16xf32>
    %c1_35 = arith.constant 1 : index
    %c0_36 = arith.constant 0 : index
    %c0_37 = arith.constant 0 : index
    %62 = vector.load %arg8[%c1_35, %c0_36, %c0_37] : memref<4x8x1xf32, #tpu.memory_space<vmem>>, vector<1x8x1xf32>
    %63 = vector.shape_cast %62 : vector<1x8x1xf32> to vector<8x1xf32>
    %64 = arith.mulf %58, %63 : vector<8x1xf32>
    %cst_38 = arith.constant dense<0.000000e+00> : vector<8xf32>
    %65 = vector.multi_reduction <add>, %61, %cst_38 [1] : vector<8x16xf32> to vector<8xf32>
    %66 = vector.shape_cast %65 : vector<8xf32> to vector<8x1xf32>
    %67 = arith.addf %64, %66 : vector<8x1xf32>
    %c1_39 = arith.constant 1 : index
    %c0_40 = arith.constant 0 : index
    %c0_41 = arith.constant 0 : index
    %68 = vector.load %arg8[%c1_39, %c0_40, %c0_41] : memref<4x8x1xf32, #tpu.memory_space<vmem>>, vector<1x8x1xf32>
    %69 = vector.shape_cast %68 : vector<1x8x1xf32> to vector<8x1xf32>
    %70 = vector.shape_cast %67 : vector<8x1xf32> to vector<1x8x1xf32>
    tpu.vector_store %arg8[%c1_39, %c0_40, %c0_41], %70 {strides = array<i32>} : memref<4x8x1xf32, #tpu.memory_space<vmem>>, vector<1x8x1xf32>,
    %c1_42 = arith.constant 1 : index
    %c0_43 = arith.constant 0 : index
    %c0_44 = arith.constant 0 : index
    %71 = vector.load %arg9[%c1_42, %c0_43, %c0_44] : memref<4x8x8xf32, #tpu.memory_space<vmem>>, vector<1x8x8xf32>
    %72 = vector.shape_cast %71 : vector<1x8x8xf32> to vector<8x8xf32>
    %73 = vector.broadcast %58 : vector<8x1xf32> to vector<8x8xf32>
    %74 = arith.mulf %73, %72 : vector<8x8xf32>
    %75 = arith.truncf %61 : vector<8x16xf32> to vector<8x16xbf16>
    %76 = vector.extract_strided_slice %12 {offsets = [0, 8], sizes = [16, 8], strides = [1, 1]} : vector<16x32xbf16> to vector<16x8xbf16>
    %cst_45 = arith.constant dense<0.000000e+00> : vector<8x8xf32>
    %77 = tpu.matmul %75, %76, %cst_45 {dimension_numbers = #tpu.dot_dimension_numbers<[1], [0], [0], [1], [0, 0, 1, 1], [], []>} : vector<8x16xbf16>, vector<16x8xbf16>, vector<8x8xf32> -> vector<8x8xf32>
    %78 = arith.addf %74, %77 : vector<8x8xf32>
    %c1_46 = arith.constant 1 : index
    %c0_47 = arith.constant 0 : index
    %c0_48 = arith.constant 0 : index
    %79 = vector.load %arg9[%c1_46, %c0_47, %c0_48] : memref<4x8x8xf32, #tpu.memory_space<vmem>>, vector<1x8x8xf32>
    %80 = vector.shape_cast %79 : vector<1x8x8xf32> to vector<8x8xf32>
    %81 = vector.shape_cast %78 : vector<8x8xf32> to vector<1x8x8xf32>
    tpu.vector_store %arg9[%c1_46, %c0_47, %c0_48], %81 {strides = array<i32>} : memref<4x8x8xf32, #tpu.memory_space<vmem>>, vector<1x8x8xf32>,
    %c1_49 = arith.constant 1 : index
    %c0_50 = arith.constant 0 : index
    %c0_51 = arith.constant 0 : index
    %82 = vector.load %arg7[%c1_49, %c0_50, %c0_51] : memref<4x8x1xf32, #tpu.memory_space<vmem>>, vector<1x8x1xf32>
    %83 = vector.shape_cast %82 : vector<1x8x1xf32> to vector<8x1xf32>
    %84 = vector.shape_cast %56 : vector<8x1xf32> to vector<1x8x1xf32>
    tpu.vector_store %arg7[%c1_49, %c0_50, %c0_51], %84 {strides = array<i32>} : memref<4x8x1xf32, #tpu.memory_space<vmem>>, vector<1x8x1xf32>,
    %85 = vector.extract_strided_slice %8 {offsets = [0, 16], sizes = [8, 8], strides = [1, 1]} : vector<8x32xbf16> to vector<8x8xbf16>
    %86 = vector.extract_strided_slice %10 {offsets = [0, 16], sizes = [16, 8], strides = [1, 1]} : vector<16x32xbf16> to vector<16x8xbf16>
    %cst_52 = arith.constant dense<0.000000e+00> : vector<8x16xf32>
    %87 = tpu.matmul %85, %86, %cst_52 {dimension_numbers = #tpu.dot_dimension_numbers<[1], [1], [0], [0], [0, 0, 1, 0], [], []>} : vector<8x8xbf16>, vector<16x8xbf16>, vector<8x16xf32> -> vector<8x16xf32>
    %c2 = arith.constant 2 : index
    %c0_53 = arith.constant 0 : index
    %c0_54 = arith.constant 0 : index
    %88 = vector.load %arg7[%c2, %c0_53, %c0_54] : memref<4x8x1xf32, #tpu.memory_space<vmem>>, vector<1x8x1xf32>
    %89 = vector.shape_cast %88 : vector<1x8x1xf32> to vector<8x1xf32>
    %cst_55 = arith.constant dense<0xFF800000> : vector<8xf32>
    %90 = vector.multi_reduction <maximumf>, %87, %cst_55 [1] : vector<8x16xf32> to vector<8xf32>
    %91 = vector.shape_cast %90 : vector<8xf32> to vector<8x1xf32>
    %92 = arith.maximumf %89, %91 : vector<8x1xf32>
    %93 = arith.subf %89, %92 : vector<8x1xf32>
    %94 = math.exp %93 : vector<8x1xf32>
    %95 = vector.broadcast %92 : vector<8x1xf32> to vector<8x16xf32>
    %96 = arith.subf %87, %95 : vector<8x16xf32>
    %97 = math.exp %96 : vector<8x16xf32>
    %c2_56 = arith.constant 2 : index
    %c0_57 = arith.constant 0 : index
    %c0_58 = arith.constant 0 : index
    %98 = vector.load %arg8[%c2_56, %c0_57, %c0_58] : memref<4x8x1xf32, #tpu.memory_space<vmem>>, vector<1x8x1xf32>
    %99 = vector.shape_cast %98 : vector<1x8x1xf32> to vector<8x1xf32>
    %100 = arith.mulf %94, %99 : vector<8x1xf32>
    %cst_59 = arith.constant dense<0.000000e+00> : vector<8xf32>
    %101 = vector.multi_reduction <add>, %97, %cst_59 [1] : vector<8x16xf32> to vector<8xf32>
    %102 = vector.shape_cast %101 : vector<8xf32> to vector<8x1xf32>
    %103 = arith.addf %100, %102 : vector<8x1xf32>
    %c2_60 = arith.constant 2 : index
    %c0_61 = arith.constant 0 : index
    %c0_62 = arith.constant 0 : index
    %104 = vector.load %arg8[%c2_60, %c0_61, %c0_62] : memref<4x8x1xf32, #tpu.memory_space<vmem>>, vector<1x8x1xf32>
    %105 = vector.shape_cast %104 : vector<1x8x1xf32> to vector<8x1xf32>
    %106 = vector.shape_cast %103 : vector<8x1xf32> to vector<1x8x1xf32>
    tpu.vector_store %arg8[%c2_60, %c0_61, %c0_62], %106 {strides = array<i32>} : memref<4x8x1xf32, #tpu.memory_space<vmem>>, vector<1x8x1xf32>,
    %c2_63 = arith.constant 2 : index
    %c0_64 = arith.constant 0 : index
    %c0_65 = arith.constant 0 : index
    %107 = vector.load %arg9[%c2_63, %c0_64, %c0_65] : memref<4x8x8xf32, #tpu.memory_space<vmem>>, vector<1x8x8xf32>
    %108 = vector.shape_cast %107 : vector<1x8x8xf32> to vector<8x8xf32>
    %109 = vector.broadcast %94 : vector<8x1xf32> to vector<8x8xf32>
    %110 = arith.mulf %109, %108 : vector<8x8xf32>
    %111 = arith.truncf %97 : vector<8x16xf32> to vector<8x16xbf16>
    %112 = vector.extract_strided_slice %12 {offsets = [0, 16], sizes = [16, 8], strides = [1, 1]} : vector<16x32xbf16> to vector<16x8xbf16>
    %cst_66 = arith.constant dense<0.000000e+00> : vector<8x8xf32>
    %113 = tpu.matmul %111, %112, %cst_66 {dimension_numbers = #tpu.dot_dimension_numbers<[1], [0], [0], [1], [0, 0, 1, 1], [], []>} : vector<8x16xbf16>, vector<16x8xbf16>, vector<8x8xf32> -> vector<8x8xf32>
    %114 = arith.addf %110, %113 : vector<8x8xf32>
    %c2_67 = arith.constant 2 : index
    %c0_68 = arith.constant 0 : index
    %c0_69 = arith.constant 0 : index
    %115 = vector.load %arg9[%c2_67, %c0_68, %c0_69] : memref<4x8x8xf32, #tpu.memory_space<vmem>>, vector<1x8x8xf32>
    %116 = vector.shape_cast %115 : vector<1x8x8xf32> to vector<8x8xf32>
    %117 = vector.shape_cast %114 : vector<8x8xf32> to vector<1x8x8xf32>
    tpu.vector_store %arg9[%c2_67, %c0_68, %c0_69], %117 {strides = array<i32>} : memref<4x8x8xf32, #tpu.memory_space<vmem>>, vector<1x8x8xf32>,
    %c2_70 = arith.constant 2 : index
    %c0_71 = arith.constant 0 : index
    %c0_72 = arith.constant 0 : index
    %118 = vector.load %arg7[%c2_70, %c0_71, %c0_72] : memref<4x8x1xf32, #tpu.memory_space<vmem>>, vector<1x8x1xf32>
    %119 = vector.shape_cast %118 : vector<1x8x1xf32> to vector<8x1xf32>
    %120 = vector.shape_cast %92 : vector<8x1xf32> to vector<1x8x1xf32>
    tpu.vector_store %arg7[%c2_70, %c0_71, %c0_72], %120 {strides = array<i32>} : memref<4x8x1xf32, #tpu.memory_space<vmem>>, vector<1x8x1xf32>,
    %121 = vector.extract_strided_slice %8 {offsets = [0, 24], sizes = [8, 8], strides = [1, 1]} : vector<8x32xbf16> to vector<8x8xbf16>
    %122 = vector.extract_strided_slice %10 {offsets = [0, 24], sizes = [16, 8], strides = [1, 1]} : vector<16x32xbf16> to vector<16x8xbf16>
    %cst_73 = arith.constant dense<0.000000e+00> : vector<8x16xf32>
    %123 = tpu.matmul %121, %122, %cst_73 {dimension_numbers = #tpu.dot_dimension_numbers<[1], [1], [0], [0], [0, 0, 1, 0], [], []>} : vector<8x8xbf16>, vector<16x8xbf16>, vector<8x16xf32> -> vector<8x16xf32>
    %c3 = arith.constant 3 : index
    %c0_74 = arith.constant 0 : index
    %c0_75 = arith.constant 0 : index
    %124 = vector.load %arg7[%c3, %c0_74, %c0_75] : memref<4x8x1xf32, #tpu.memory_space<vmem>>, vector<1x8x1xf32>
    %125 = vector.shape_cast %124 : vector<1x8x1xf32> to vector<8x1xf32>
    %cst_76 = arith.constant dense<0xFF800000> : vector<8xf32>
    %126 = vector.multi_reduction <maximumf>, %123, %cst_76 [1] : vector<8x16xf32> to vector<8xf32>
    %127 = vector.shape_cast %126 : vector<8xf32> to vector<8x1xf32>
    %128 = arith.maximumf %125, %127 : vector<8x1xf32>
    %129 = arith.subf %125, %128 : vector<8x1xf32>
    %130 = math.exp %129 : vector<8x1xf32>
    %131 = vector.broadcast %128 : vector<8x1xf32> to vector<8x16xf32>
    %132 = arith.subf %123, %131 : vector<8x16xf32>
    %133 = math.exp %132 : vector<8x16xf32>
    %c3_77 = arith.constant 3 : index
    %c0_78 = arith.constant 0 : index
    %c0_79 = arith.constant 0 : index
    %134 = vector.load %arg8[%c3_77, %c0_78, %c0_79] : memref<4x8x1xf32, #tpu.memory_space<vmem>>, vector<1x8x1xf32>
    %135 = vector.shape_cast %134 : vector<1x8x1xf32> to vector<8x1xf32>
    %136 = arith.mulf %130, %135 : vector<8x1xf32>
    %cst_80 = arith.constant dense<0.000000e+00> : vector<8xf32>
    %137 = vector.multi_reduction <add>, %133, %cst_80 [1] : vector<8x16xf32> to vector<8xf32>
    %138 = vector.shape_cast %137 : vector<8xf32> to vector<8x1xf32>
    %139 = arith.addf %136, %138 : vector<8x1xf32>
    %c3_81 = arith.constant 3 : index
    %c0_82 = arith.constant 0 : index
    %c0_83 = arith.constant 0 : index
    %140 = vector.load %arg8[%c3_81, %c0_82, %c0_83] : memref<4x8x1xf32, #tpu.memory_space<vmem>>, vector<1x8x1xf32>
    %141 = vector.shape_cast %140 : vector<1x8x1xf32> to vector<8x1xf32>
    %142 = vector.shape_cast %139 : vector<8x1xf32> to vector<1x8x1xf32>
    tpu.vector_store %arg8[%c3_81, %c0_82, %c0_83], %142 {strides = array<i32>} : memref<4x8x1xf32, #tpu.memory_space<vmem>>, vector<1x8x1xf32>,
    %c3_84 = arith.constant 3 : index
    %c0_85 = arith.constant 0 : index
    %c0_86 = arith.constant 0 : index
    %143 = vector.load %arg9[%c3_84, %c0_85, %c0_86] : memref<4x8x8xf32, #tpu.memory_space<vmem>>, vector<1x8x8xf32>
    %144 = vector.shape_cast %143 : vector<1x8x8xf32> to vector<8x8xf32>
    %145 = vector.broadcast %130 : vector<8x1xf32> to vector<8x8xf32>
    %146 = arith.mulf %145, %144 : vector<8x8xf32>
    %147 = arith.truncf %133 : vector<8x16xf32> to vector<8x16xbf16>
    %148 = vector.extract_strided_slice %12 {offsets = [0, 24], sizes = [16, 8], strides = [1, 1]} : vector<16x32xbf16> to vector<16x8xbf16>
    %cst_87 = arith.constant dense<0.000000e+00> : vector<8x8xf32>
    %149 = tpu.matmul %147, %148, %cst_87 {dimension_numbers = #tpu.dot_dimension_numbers<[1], [0], [0], [1], [0, 0, 1, 1], [], []>} : vector<8x16xbf16>, vector<16x8xbf16>, vector<8x8xf32> -> vector<8x8xf32>
    %150 = arith.addf %146, %149 : vector<8x8xf32>
    %c3_88 = arith.constant 3 : index
    %c0_89 = arith.constant 0 : index
    %c0_90 = arith.constant 0 : index
    %151 = vector.load %arg9[%c3_88, %c0_89, %c0_90] : memref<4x8x8xf32, #tpu.memory_space<vmem>>, vector<1x8x8xf32>
    %152 = vector.shape_cast %151 : vector<1x8x8xf32> to vector<8x8xf32>
    %153 = vector.shape_cast %150 : vector<8x8xf32> to vector<1x8x8xf32>
    tpu.vector_store %arg9[%c3_88, %c0_89, %c0_90], %153 {strides = array<i32>} : memref<4x8x8xf32, #tpu.memory_space<vmem>>, vector<1x8x8xf32>,
    %c3_91 = arith.constant 3 : index
    %c0_92 = arith.constant 0 : index
    %c0_93 = arith.constant 0 : index
    %154 = vector.load %arg7[%c3_91, %c0_92, %c0_93] : memref<4x8x1xf32, #tpu.memory_space<vmem>>, vector<1x8x1xf32>
    %155 = vector.shape_cast %154 : vector<1x8x1xf32> to vector<8x1xf32>
    %156 = vector.shape_cast %128 : vector<8x1xf32> to vector<1x8x1xf32>
    tpu.vector_store %arg7[%c3_91, %c0_92, %c0_93], %156 {strides = array<i32>} : memref<4x8x1xf32, #tpu.memory_space<vmem>>, vector<1x8x1xf32>,
    %c0_i32_94 = arith.constant 0 : i32
    %157 = arith.cmpi eq, %arg2, %c0_i32_94 : i32
    %158 = arith.extui %157 : i1 to i32
    %c0_i32_95 = arith.constant 0 : i32
    %159 = arith.cmpi ne, %158, %c0_i32_95 : i32
    scf.if %159 {
      %c0_96 = arith.constant 0 : index
      %c0_97 = arith.constant 0 : index
      %c0_98 = arith.constant 0 : index
      %160 = vector.load %arg9[%c0_96, %c0_97, %c0_98] : memref<4x8x8xf32, #tpu.memory_space<vmem>>, vector<1x8x8xf32>
      %161 = vector.shape_cast %160 : vector<1x8x8xf32> to vector<8x8xf32>
      %c0_99 = arith.constant 0 : index
      %c0_100 = arith.constant 0 : index
      %c0_101 = arith.constant 0 : index
      %162 = vector.load %arg8[%c0_99, %c0_100, %c0_101] : memref<4x8x1xf32, #tpu.memory_space<vmem>>, vector<1x8x1xf32>
      %163 = vector.shape_cast %162 : vector<1x8x1xf32> to vector<8x1xf32>
      %164 = tpu.reciprocal %163 {approx = true} : vector<8x1xf32> -> vector<8x1xf32>
      %165 = vector.broadcast %164 : vector<8x1xf32> to vector<8x8xf32>
      %166 = arith.mulf %161, %165 : vector<8x8xf32>
      %c1_102 = arith.constant 1 : index
      %c0_103 = arith.constant 0 : index
      %c0_104 = arith.constant 0 : index
      %167 = vector.load %arg9[%c1_102, %c0_103, %c0_104] : memref<4x8x8xf32, #tpu.memory_space<vmem>>, vector<1x8x8xf32>
      %168 = vector.shape_cast %167 : vector<1x8x8xf32> to vector<8x8xf32>
      %c1_105 = arith.constant 1 : index
      %c0_106 = arith.constant 0 : index
      %c0_107 = arith.constant 0 : index
      %169 = vector.load %arg8[%c1_105, %c0_106, %c0_107] : memref<4x8x1xf32, #tpu.memory_space<vmem>>, vector<1x8x1xf32>
      %170 = vector.shape_cast %169 : vector<1x8x1xf32> to vector<8x1xf32>
      %171 = tpu.reciprocal %170 {approx = true} : vector<8x1xf32> -> vector<8x1xf32>
      %172 = vector.broadcast %171 : vector<8x1xf32> to vector<8x8xf32>
      %173 = arith.mulf %168, %172 : vector<8x8xf32>
      %c2_108 = arith.constant 2 : index
      %c0_109 = arith.constant 0 : index
      %c0_110 = arith.constant 0 : index
      %174 = vector.load %arg9[%c2_108, %c0_109, %c0_110] : memref<4x8x8xf32, #tpu.memory_space<vmem>>, vector<1x8x8xf32>
      %175 = vector.shape_cast %174 : vector<1x8x8xf32> to vector<8x8xf32>
      %c2_111 = arith.constant 2 : index
      %c0_112 = arith.constant 0 : index
      %c0_113 = arith.constant 0 : index
      %176 = vector.load %arg8[%c2_111, %c0_112, %c0_113] : memref<4x8x1xf32, #tpu.memory_space<vmem>>, vector<1x8x1xf32>
      %177 = vector.shape_cast %176 : vector<1x8x1xf32> to vector<8x1xf32>
      %178 = tpu.reciprocal %177 {approx = true} : vector<8x1xf32> -> vector<8x1xf32>
      %179 = vector.broadcast %178 : vector<8x1xf32> to vector<8x8xf32>
      %180 = arith.mulf %175, %179 : vector<8x8xf32>
      %c3_114 = arith.constant 3 : index
      %c0_115 = arith.constant 0 : index
      %c0_116 = arith.constant 0 : index
      %181 = vector.load %arg9[%c3_114, %c0_115, %c0_116] : memref<4x8x8xf32, #tpu.memory_space<vmem>>, vector<1x8x8xf32>
      %182 = vector.shape_cast %181 : vector<1x8x8xf32> to vector<8x8xf32>
      %c3_117 = arith.constant 3 : index
      %c0_118 = arith.constant 0 : index
      %c0_119 = arith.constant 0 : index
      %183 = vector.load %arg8[%c3_117, %c0_118, %c0_119] : memref<4x8x1xf32, #tpu.memory_space<vmem>>, vector<1x8x1xf32>
      %184 = vector.shape_cast %183 : vector<1x8x1xf32> to vector<8x1xf32>
      %185 = tpu.reciprocal %184 {approx = true} : vector<8x1xf32> -> vector<8x1xf32>
      %186 = vector.broadcast %185 : vector<8x1xf32> to vector<8x8xf32>
      %187 = arith.mulf %182, %186 : vector<8x8xf32>
      %188 = tpu.concatenate %166, %173, %180, %187 in 1 : vector<8x8xf32>, vector<8x8xf32>, vector<8x8xf32>, vector<8x8xf32> -> vector<8x32xf32>
      %189 = arith.truncf %188 : vector<8x32xf32> to vector<8x32xbf16>
      %c0_120 = arith.constant 0 : index
      %c0_121 = arith.constant 0 : index
      %c0_122 = arith.constant 0 : index
      %190 = vector.load %arg6[%c0_120, %c0_121, %c0_122] : memref<1x8x32xbf16, #tpu.memory_space<vmem>>, vector<1x8x32xbf16>
      %191 = vector.shape_cast %190 : vector<1x8x32xbf16> to vector<8x32xbf16>
      %192 = vector.shape_cast %189 : vector<8x32xbf16> to vector<1x8x32xbf16>
      tpu.vector_store %arg6[%c0_120, %c0_121, %c0_122], %192 {strides = array<i32>} : memref<1x8x32xbf16, #tpu.memory_space<vmem>>, vector<1x8x32xbf16>,
    } else {
    }
    return
  }
  func.func @transform_0(%arg0: i32, %arg1: i32, %arg2: i32) -> (i32, i32, i32) {
    %c0_i32 = arith.constant 0 : i32
    %c0_i32_0 = arith.constant 0 : i32
    return %arg0, %arg1, %c0_i32 : i32, i32, i32
  }
  func.func @transform_1(%arg0: i32, %arg1: i32, %arg2: i32) -> (i32, i32, i32) {
    %c0_i32 = arith.constant 0 : i32
    %c0_i32_0 = arith.constant 0 : i32
    return %arg0, %arg2, %c0_i32 : i32, i32, i32
  }
  func.func @transform_2(%arg0: i32, %arg1: i32, %arg2: i32) -> (i32, i32, i32) {
    %c0_i32 = arith.constant 0 : i32
    %c0_i32_0 = arith.constant 0 : i32
    return %arg0, %arg2, %c0_i32 : i32, i32, i32
  }
  func.func @transform_3(%arg0: i32, %arg1: i32, %arg2: i32) -> (i32, i32, i32) {
    %c0_i32 = arith.constant 0 : i32
    %c0_i32_0 = arith.constant 0 : i32
    return %arg0, %arg1, %c0_i32 : i32, i32, i32
  }
}

module attributes {stable_mosaic.version = 11 : i64} {
  func.func @_cross_kv_kernel(%arg0: i32, %arg1: i32, %arg2: memref<16x32xf32, #tpu.memory_space<vmem>>, %arg3: memref<16x32xf32, #tpu.memory_space<vmem>>, %arg4: memref<32x32xbf16, #tpu.memory_space<vmem>>, %arg5: memref<1x32xf32, #tpu.memory_space<vmem>>, %arg6: memref<32x32xbf16, #tpu.memory_space<vmem>>, %arg7: memref<1x32xf32, #tpu.memory_space<vmem>>, %arg8: memref<16x32xbf16, #tpu.memory_space<vmem>>, %arg9: memref<16x32xbf16, #tpu.memory_space<vmem>>, %arg10: memref<16x32xf32, #tpu.memory_space<vmem>>, %arg11: memref<16x32xf32, #tpu.memory_space<vmem>>) attributes {dimension_semantics = [#tpu.dimension_semantics<parallel>, #tpu.dimension_semantics<arbitrary>], iteration_bounds = array<i64: 2, 1>, scalar_prefetch = 0 : i64, scratch_operands = 2 : i64, tpu.core_type = #tpu.core_type<tc>, window_params = [{transform_indices = @transform_0, window_bounds = array<i64: 16, 32>}, {transform_indices = @transform_1, window_bounds = array<i64: 16, 32>}, {transform_indices = @transform_2, window_bounds = array<i64: 32, 32>}, {pipeline_mode = #tpu.pipeline_mode<synchronous>, transform_indices = @transform_3, window_bounds = array<i64: 1, 32>}, {transform_indices = @transform_4, window_bounds = array<i64: 32, 32>}, {pipeline_mode = #tpu.pipeline_mode<synchronous>, transform_indices = @transform_5, window_bounds = array<i64: 1, 32>}, {transform_indices = @transform_6, window_bounds = array<i64: 16, 32>}, {transform_indices = @transform_7, window_bounds = array<i64: 16, 32>}]} {
    %c0_i32 = arith.constant 0 : i32
    %0 = arith.cmpi eq, %arg1, %c0_i32 : i32
    %1 = arith.extui %0 : i1 to i32
    %c0_i32_0 = arith.constant 0 : i32
    %2 = arith.cmpi ne, %1, %c0_i32_0 : i32
    scf.if %2 {
      %cst_19 = arith.constant 0.000000e+00 : f32
      %21 = vector.broadcast %cst_19 : f32 to vector<16x32xf32>
      %c0_20 = arith.constant 0 : index
      %c0_21 = arith.constant 0 : index
      %22 = vector.load %arg10[%c0_20, %c0_21] : memref<16x32xf32, #tpu.memory_space<vmem>>, vector<16x32xf32>
      tpu.vector_store %arg10[%c0_20, %c0_21], %21 {strides = array<i32>} : memref<16x32xf32, #tpu.memory_space<vmem>>, vector<16x32xf32>,
      %cst_22 = arith.constant 0.000000e+00 : f32
      %23 = vector.broadcast %cst_22 : f32 to vector<16x32xf32>
      %c0_23 = arith.constant 0 : index
      %c0_24 = arith.constant 0 : index
      %24 = vector.load %arg11[%c0_23, %c0_24] : memref<16x32xf32, #tpu.memory_space<vmem>>, vector<16x32xf32>
      tpu.vector_store %arg11[%c0_23, %c0_24], %23 {strides = array<i32>} : memref<16x32xf32, #tpu.memory_space<vmem>>, vector<16x32xf32>,
    } else {
    }
    %c0 = arith.constant 0 : index
    %c0_1 = arith.constant 0 : index
    %3 = vector.load %arg2[%c0, %c0_1] : memref<16x32xf32, #tpu.memory_space<vmem>>, vector<16x32xf32>
    %c0_2 = arith.constant 0 : index
    %c0_3 = arith.constant 0 : index
    %4 = vector.load %arg3[%c0_2, %c0_3] : memref<16x32xf32, #tpu.memory_space<vmem>>, vector<16x32xf32>
    %c0_4 = arith.constant 0 : index
    %c0_5 = arith.constant 0 : index
    %5 = vector.load %arg10[%c0_4, %c0_5] : memref<16x32xf32, #tpu.memory_space<vmem>>, vector<16x32xf32>
    %6 = arith.addf %3, %4 : vector<16x32xf32>
    %7 = arith.truncf %6 : vector<16x32xf32> to vector<16x32xbf16>
    %c0_6 = arith.constant 0 : index
    %c0_7 = arith.constant 0 : index
    %8 = vector.load %arg4[%c0_6, %c0_7] : memref<32x32xbf16, #tpu.memory_space<vmem>>, vector<32x32xbf16>
    %cst = arith.constant dense<0.000000e+00> : vector<16x32xf32>
    %9 = tpu.matmul %7, %8, %cst {dimension_numbers = #tpu.dot_dimension_numbers<[1], [0], [0], [1], [0, 0, 1, 1], [], []>} : vector<16x32xbf16>, vector<32x32xbf16>, vector<16x32xf32> -> vector<16x32xf32>
    %10 = arith.addf %5, %9 : vector<16x32xf32>
    %c0_8 = arith.constant 0 : index
    %c0_9 = arith.constant 0 : index
    %11 = vector.load %arg10[%c0_8, %c0_9] : memref<16x32xf32, #tpu.memory_space<vmem>>, vector<16x32xf32>
    tpu.vector_store %arg10[%c0_8, %c0_9], %10 {strides = array<i32>} : memref<16x32xf32, #tpu.memory_space<vmem>>, vector<16x32xf32>,
    %c0_10 = arith.constant 0 : index
    %c0_11 = arith.constant 0 : index
    %12 = vector.load %arg11[%c0_10, %c0_11] : memref<16x32xf32, #tpu.memory_space<vmem>>, vector<16x32xf32>
    %13 = arith.truncf %3 : vector<16x32xf32> to vector<16x32xbf16>
    %c0_12 = arith.constant 0 : index
    %c0_13 = arith.constant 0 : index
    %14 = vector.load %arg6[%c0_12, %c0_13] : memref<32x32xbf16, #tpu.memory_space<vmem>>, vector<32x32xbf16>
    %cst_14 = arith.constant dense<0.000000e+00> : vector<16x32xf32>
    %15 = tpu.matmul %13, %14, %cst_14 {dimension_numbers = #tpu.dot_dimension_numbers<[1], [0], [0], [1], [0, 0, 1, 1], [], []>} : vector<16x32xbf16>, vector<32x32xbf16>, vector<16x32xf32> -> vector<16x32xf32>
    %16 = arith.addf %12, %15 : vector<16x32xf32>
    %c0_15 = arith.constant 0 : index
    %c0_16 = arith.constant 0 : index
    %17 = vector.load %arg11[%c0_15, %c0_16] : memref<16x32xf32, #tpu.memory_space<vmem>>, vector<16x32xf32>
    tpu.vector_store %arg11[%c0_15, %c0_16], %16 {strides = array<i32>} : memref<16x32xf32, #tpu.memory_space<vmem>>, vector<16x32xf32>,
    %c0_i32_17 = arith.constant 0 : i32
    %18 = arith.cmpi eq, %arg1, %c0_i32_17 : i32
    %19 = arith.extui %18 : i1 to i32
    %c0_i32_18 = arith.constant 0 : i32
    %20 = arith.cmpi ne, %19, %c0_i32_18 : i32
    scf.if %20 {
      %c0_19 = arith.constant 0 : index
      %c0_20 = arith.constant 0 : index
      %21 = vector.load %arg10[%c0_19, %c0_20] : memref<16x32xf32, #tpu.memory_space<vmem>>, vector<16x32xf32>
      %c0_21 = arith.constant 0 : index
      %c0_22 = arith.constant 0 : index
      %22 = vector.load %arg5[%c0_21, %c0_22] : memref<1x32xf32, #tpu.memory_space<vmem>>, vector<1x32xf32>
      %23 = vector.broadcast %22 : vector<1x32xf32> to vector<16x32xf32>
      %24 = arith.addf %21, %23 : vector<16x32xf32>
      %25 = arith.truncf %24 : vector<16x32xf32> to vector<16x32xbf16>
      %c0_23 = arith.constant 0 : index
      %c0_24 = arith.constant 0 : index
      %26 = vector.load %arg8[%c0_23, %c0_24] : memref<16x32xbf16, #tpu.memory_space<vmem>>, vector<16x32xbf16>
      tpu.vector_store %arg8[%c0_23, %c0_24], %25 {strides = array<i32>} : memref<16x32xbf16, #tpu.memory_space<vmem>>, vector<16x32xbf16>,
      %c0_25 = arith.constant 0 : index
      %c0_26 = arith.constant 0 : index
      %27 = vector.load %arg11[%c0_25, %c0_26] : memref<16x32xf32, #tpu.memory_space<vmem>>, vector<16x32xf32>
      %c0_27 = arith.constant 0 : index
      %c0_28 = arith.constant 0 : index
      %28 = vector.load %arg7[%c0_27, %c0_28] : memref<1x32xf32, #tpu.memory_space<vmem>>, vector<1x32xf32>
      %29 = vector.broadcast %28 : vector<1x32xf32> to vector<16x32xf32>
      %30 = arith.addf %27, %29 : vector<16x32xf32>
      %31 = arith.truncf %30 : vector<16x32xf32> to vector<16x32xbf16>
      %c0_29 = arith.constant 0 : index
      %c0_30 = arith.constant 0 : index
      %32 = vector.load %arg9[%c0_29, %c0_30] : memref<16x32xbf16, #tpu.memory_space<vmem>>, vector<16x32xbf16>
      tpu.vector_store %arg9[%c0_29, %c0_30], %31 {strides = array<i32>} : memref<16x32xbf16, #tpu.memory_space<vmem>>, vector<16x32xbf16>,
    } else {
    }
    return
  }
  func.func @transform_0(%arg0: i32, %arg1: i32) -> (i32, i32) {
    %c0_i32 = arith.constant 0 : i32
    return %arg0, %arg1 : i32, i32
  }
  func.func @transform_1(%arg0: i32, %arg1: i32) -> (i32, i32) {
    %c0_i32 = arith.constant 0 : i32
    return %arg0, %arg1 : i32, i32
  }
  func.func @transform_2(%arg0: i32, %arg1: i32) -> (i32, i32) {
    %c0_i32 = arith.constant 0 : i32
    %c0_i32_0 = arith.constant 0 : i32
    return %arg1, %c0_i32 : i32, i32
  }
  func.func @transform_3(%arg0: i32, %arg1: i32) -> (i32, i32) {
    %c0_i32 = arith.constant 0 : i32
    %c0_i32_0 = arith.constant 0 : i32
    %c0_i32_1 = arith.constant 0 : i32
    return %c0_i32, %c0_i32_0 : i32, i32
  }
  func.func @transform_4(%arg0: i32, %arg1: i32) -> (i32, i32) {
    %c0_i32 = arith.constant 0 : i32
    %c0_i32_0 = arith.constant 0 : i32
    return %arg1, %c0_i32 : i32, i32
  }
  func.func @transform_5(%arg0: i32, %arg1: i32) -> (i32, i32) {
    %c0_i32 = arith.constant 0 : i32
    %c0_i32_0 = arith.constant 0 : i32
    %c0_i32_1 = arith.constant 0 : i32
    return %c0_i32, %c0_i32_0 : i32, i32
  }
  func.func @transform_6(%arg0: i32, %arg1: i32) -> (i32, i32) {
    %c0_i32 = arith.constant 0 : i32
    %c0_i32_0 = arith.constant 0 : i32
    return %arg0, %c0_i32 : i32, i32
  }
  func.func @transform_7(%arg0: i32, %arg1: i32) -> (i32, i32) {
    %c0_i32 = arith.constant 0 : i32
    %c0_i32_0 = arith.constant 0 : i32
    return %arg0, %c0_i32 : i32, i32
  }
}

module attributes {stable_mosaic.version = 11 : i64} {
  func.func @_ffn_add_ln_kernel(%arg0: i32, %arg1: i32, %arg2: memref<8x32xf32, #tpu.memory_space<vmem>>, %arg3: memref<32x64xbf16, #tpu.memory_space<vmem>>, %arg4: memref<1x64xf32, #tpu.memory_space<vmem>>, %arg5: memref<64x32xbf16, #tpu.memory_space<vmem>>, %arg6: memref<1x32xf32, #tpu.memory_space<vmem>>, %arg7: memref<1x32xf32, #tpu.memory_space<vmem>>, %arg8: memref<1x32xf32, #tpu.memory_space<vmem>>, %arg9: memref<8x32xf32, #tpu.memory_space<vmem>>, %arg10: memref<8x32xf32, #tpu.memory_space<vmem>>) attributes {dimension_semantics = [#tpu.dimension_semantics<parallel>, #tpu.dimension_semantics<arbitrary>], iteration_bounds = array<i64: 2, 1>, scalar_prefetch = 0 : i64, scratch_operands = 1 : i64, tpu.core_type = #tpu.core_type<tc>, window_params = [{transform_indices = @transform_0, window_bounds = array<i64: 8, 32>}, {transform_indices = @transform_1, window_bounds = array<i64: 32, 64>}, {transform_indices = @transform_2, window_bounds = array<i64: 1, 64>}, {transform_indices = @transform_3, window_bounds = array<i64: 64, 32>}, {pipeline_mode = #tpu.pipeline_mode<synchronous>, transform_indices = @transform_4, window_bounds = array<i64: 1, 32>}, {pipeline_mode = #tpu.pipeline_mode<synchronous>, transform_indices = @transform_5, window_bounds = array<i64: 1, 32>}, {pipeline_mode = #tpu.pipeline_mode<synchronous>, transform_indices = @transform_6, window_bounds = array<i64: 1, 32>}, {transform_indices = @transform_7, window_bounds = array<i64: 8, 32>}]} {
    %c0_i32 = arith.constant 0 : i32
    %0 = arith.cmpi eq, %arg1, %c0_i32 : i32
    %1 = arith.extui %0 : i1 to i32
    %c0_i32_0 = arith.constant 0 : i32
    %2 = arith.cmpi ne, %1, %c0_i32_0 : i32
    scf.if %2 {
      %cst_16 = arith.constant 0.000000e+00 : f32
      %21 = vector.broadcast %cst_16 : f32 to vector<8x32xf32>
      %c0_17 = arith.constant 0 : index
      %c0_18 = arith.constant 0 : index
      %22 = vector.load %arg10[%c0_17, %c0_18] : memref<8x32xf32, #tpu.memory_space<vmem>>, vector<8x32xf32>
      tpu.vector_store %arg10[%c0_17, %c0_18], %21 {strides = array<i32>} : memref<8x32xf32, #tpu.memory_space<vmem>>, vector<8x32xf32>,
    } else {
    }
    %c0 = arith.constant 0 : index
    %c0_1 = arith.constant 0 : index
    %3 = vector.load %arg2[%c0, %c0_1] : memref<8x32xf32, #tpu.memory_space<vmem>>, vector<8x32xf32>
    %4 = arith.truncf %3 : vector<8x32xf32> to vector<8x32xbf16>
    %c0_2 = arith.constant 0 : index
    %c0_3 = arith.constant 0 : index
    %5 = vector.load %arg3[%c0_2, %c0_3] : memref<32x64xbf16, #tpu.memory_space<vmem>>, vector<32x64xbf16>
    %cst = arith.constant dense<0.000000e+00> : vector<8x64xf32>
    %6 = tpu.matmul %4, %5, %cst {dimension_numbers = #tpu.dot_dimension_numbers<[1], [0], [0], [1], [0, 0, 1, 1], [], []>} : vector<8x32xbf16>, vector<32x64xbf16>, vector<8x64xf32> -> vector<8x64xf32>
    %c0_4 = arith.constant 0 : index
    %c0_5 = arith.constant 0 : index
    %7 = vector.load %arg4[%c0_4, %c0_5] : memref<1x64xf32, #tpu.memory_space<vmem>>, vector<1x64xf32>
    %8 = vector.broadcast %7 : vector<1x64xf32> to vector<8x64xf32>
    %9 = arith.addf %6, %8 : vector<8x64xf32>
    %cst_6 = arith.constant 0.000000e+00 : f32
    %10 = vector.broadcast %cst_6 : f32 to vector<8x64xf32>
    %11 = arith.maximumf %9, %10 : vector<8x64xf32>
    %c0_7 = arith.constant 0 : index
    %c0_8 = arith.constant 0 : index
    %12 = vector.load %arg10[%c0_7, %c0_8] : memref<8x32xf32, #tpu.memory_space<vmem>>, vector<8x32xf32>
    %13 = arith.truncf %11 : vector<8x64xf32> to vector<8x64xbf16>
    %c0_9 = arith.constant 0 : index
    %c0_10 = arith.constant 0 : index
    %14 = vector.load %arg5[%c0_9, %c0_10] : memref<64x32xbf16, #tpu.memory_space<vmem>>, vector<64x32xbf16>
    %cst_11 = arith.constant dense<0.000000e+00> : vector<8x32xf32>
    %15 = tpu.matmul %13, %14, %cst_11 {dimension_numbers = #tpu.dot_dimension_numbers<[1], [0], [0], [1], [0, 0, 1, 1], [], []>} : vector<8x64xbf16>, vector<64x32xbf16>, vector<8x32xf32> -> vector<8x32xf32>
    %16 = arith.addf %12, %15 : vector<8x32xf32>
    %c0_12 = arith.constant 0 : index
    %c0_13 = arith.constant 0 : index
    %17 = vector.load %arg10[%c0_12, %c0_13] : memref<8x32xf32, #tpu.memory_space<vmem>>, vector<8x32xf32>
    tpu.vector_store %arg10[%c0_12, %c0_13], %16 {strides = array<i32>} : memref<8x32xf32, #tpu.memory_space<vmem>>, vector<8x32xf32>,
    %c0_i32_14 = arith.constant 0 : i32
    %18 = arith.cmpi eq, %arg1, %c0_i32_14 : i32
    %19 = arith.extui %18 : i1 to i32
    %c0_i32_15 = arith.constant 0 : i32
    %20 = arith.cmpi ne, %19, %c0_i32_15 : i32
    scf.if %20 {
      %c0_16 = arith.constant 0 : index
      %c0_17 = arith.constant 0 : index
      %21 = vector.load %arg10[%c0_16, %c0_17] : memref<8x32xf32, #tpu.memory_space<vmem>>, vector<8x32xf32>
      %c0_18 = arith.constant 0 : index
      %c0_19 = arith.constant 0 : index
      %22 = vector.load %arg6[%c0_18, %c0_19] : memref<1x32xf32, #tpu.memory_space<vmem>>, vector<1x32xf32>
      %23 = vector.broadcast %22 : vector<1x32xf32> to vector<8x32xf32>
      %24 = arith.addf %21, %23 : vector<8x32xf32>
      %c0_20 = arith.constant 0 : index
      %c0_21 = arith.constant 0 : index
      %25 = vector.load %arg2[%c0_20, %c0_21] : memref<8x32xf32, #tpu.memory_space<vmem>>, vector<8x32xf32>
      %26 = arith.addf %25, %24 : vector<8x32xf32>
      %c0_22 = arith.constant 0 : index
      %c0_23 = arith.constant 0 : index
      %27 = vector.load %arg7[%c0_22, %c0_23] : memref<1x32xf32, #tpu.memory_space<vmem>>, vector<1x32xf32>
      %c0_24 = arith.constant 0 : index
      %c0_25 = arith.constant 0 : index
      %28 = vector.load %arg8[%c0_24, %c0_25] : memref<1x32xf32, #tpu.memory_space<vmem>>, vector<1x32xf32>
      %cst_26 = arith.constant dense<0.000000e+00> : vector<8xf32>
      %29 = vector.multi_reduction <add>, %26, %cst_26 [1] : vector<8x32xf32> to vector<8xf32>
      %30 = vector.shape_cast %29 : vector<8xf32> to vector<8x1xf32>
      %cst_27 = arith.constant 3.200000e+01 : f32
      %31 = vector.broadcast %cst_27 : f32 to vector<8x1xf32>
      %32 = arith.divf %30, %31 : vector<8x1xf32>
      %33 = vector.broadcast %32 : vector<8x1xf32> to vector<8x32xf32>
      %34 = arith.subf %26, %33 : vector<8x32xf32>
      %35 = arith.mulf %34, %34 : vector<8x32xf32>
      %cst_28 = arith.constant dense<0.000000e+00> : vector<8xf32>
      %36 = vector.multi_reduction <add>, %35, %cst_28 [1] : vector<8x32xf32> to vector<8xf32>
      %37 = vector.shape_cast %36 : vector<8xf32> to vector<8x1xf32>
      %cst_29 = arith.constant 3.200000e+01 : f32
      %38 = vector.broadcast %cst_29 : f32 to vector<8x1xf32>
      %39 = arith.divf %37, %38 : vector<8x1xf32>
      %cst_30 = arith.constant 9.99999974E-6 : f32
      %40 = vector.broadcast %cst_30 : f32 to vector<8x1xf32>
      %41 = arith.addf %39, %40 : vector<8x1xf32>
      %42 = math.rsqrt %41 : vector<8x1xf32>
      %43 = vector.broadcast %42 : vector<8x1xf32> to vector<8x32xf32>
      %44 = arith.mulf %34, %43 : vector<8x32xf32>
      %45 = vector.broadcast %27 : vector<1x32xf32> to vector<8x32xf32>
      %46 = arith.mulf %44, %45 : vector<8x32xf32>
      %47 = vector.broadcast %28 : vector<1x32xf32> to vector<8x32xf32>
      %48 = arith.addf %46, %47 : vector<8x32xf32>
      %c0_31 = arith.constant 0 : index
      %c0_32 = arith.constant 0 : index
      %49 = vector.load %arg9[%c0_31, %c0_32] : memref<8x32xf32, #tpu.memory_space<vmem>>, vector<8x32xf32>
      tpu.vector_store %arg9[%c0_31, %c0_32], %48 {strides = array<i32>} : memref<8x32xf32, #tpu.memory_space<vmem>>, vector<8x32xf32>,
    } else {
    }
    return
  }
  func.func @transform_0(%arg0: i32, %arg1: i32) -> (i32, i32) {
    %c0_i32 = arith.constant 0 : i32
    %c0_i32_0 = arith.constant 0 : i32
    return %arg0, %c0_i32 : i32, i32
  }
  func.func @transform_1(%arg0: i32, %arg1: i32) -> (i32, i32) {
    %c0_i32 = arith.constant 0 : i32
    %c0_i32_0 = arith.constant 0 : i32
    return %c0_i32, %arg1 : i32, i32
  }
  func.func @transform_2(%arg0: i32, %arg1: i32) -> (i32, i32) {
    %c0_i32 = arith.constant 0 : i32
    %c0_i32_0 = arith.constant 0 : i32
    return %c0_i32, %arg1 : i32, i32
  }
  func.func @transform_3(%arg0: i32, %arg1: i32) -> (i32, i32) {
    %c0_i32 = arith.constant 0 : i32
    %c0_i32_0 = arith.constant 0 : i32
    return %arg1, %c0_i32 : i32, i32
  }
  func.func @transform_4(%arg0: i32, %arg1: i32) -> (i32, i32) {
    %c0_i32 = arith.constant 0 : i32
    %c0_i32_0 = arith.constant 0 : i32
    %c0_i32_1 = arith.constant 0 : i32
    return %c0_i32, %c0_i32_0 : i32, i32
  }
  func.func @transform_5(%arg0: i32, %arg1: i32) -> (i32, i32) {
    %c0_i32 = arith.constant 0 : i32
    %c0_i32_0 = arith.constant 0 : i32
    %c0_i32_1 = arith.constant 0 : i32
    return %c0_i32, %c0_i32_0 : i32, i32
  }
  func.func @transform_6(%arg0: i32, %arg1: i32) -> (i32, i32) {
    %c0_i32 = arith.constant 0 : i32
    %c0_i32_0 = arith.constant 0 : i32
    %c0_i32_1 = arith.constant 0 : i32
    return %c0_i32, %c0_i32_0 : i32, i32
  }
  func.func @transform_7(%arg0: i32, %arg1: i32) -> (i32, i32) {
    %c0_i32 = arith.constant 0 : i32
    %c0_i32_0 = arith.constant 0 : i32
    return %arg0, %c0_i32 : i32, i32
  }
}

</mosaic_0001>

<bundles_post_ra>
// kernel: transformer_decoder_layer.8
= control target key start
LH: loop header
LB: loop body
LE: loop exit
PB: predicated region body
PF: predicated region fallthrough
CT: control target
= control target key end

     0   :  { %s1088_s13 = smov 0   ;;  %s1090_s14 = smov 0   ;;  %s1173_s0 = inlined_call_operand.vmem [shape: f32[16,32], index: 0, kind: input, shape index: {}]   ;;  %s1174_s1 = inlined_call_operand.vmem [shape: f32[16,32], index: 1, kind: input, shape index: {}]   ;;  %s1175_s2 = inlined_call_operand.vmem [shape: bf16[32,32], index: 2, kind: input, shape index: {}]   ;;  %s1176_s3 = inlined_call_operand.vmem [shape: f32[1,32], index: 3, kind: input, shape index: {}]   ;;  %s1177_s4 = inlined_call_operand.vmem [shape: bf16[32,32], index: 4, kind: input, shape index: {}]   ;;  %s1178_s5 = inlined_call_operand.vmem [shape: f32[1,32], index: 5, kind: input, shape index: {}]   ;;  %s1179_s6 = inlined_call_operand.vmem [shape: bf16[32,32], index: 6, kind: input, shape index: {}]   ;;  %s1180_s7 = inlined_call_operand.vmem [shape: f32[1,32], index: 7, kind: input, shape index: {}]   ;;  %s1181_s8 = inlined_call_operand.vmem [shape: bf16[16,32], index: 8, kind: output, shape index: {0}]   ;;  %s1182_s9 = inlined_call_operand.vmem [shape: bf16[16,32], index: 9, kind: output, shape index: {1}]   ;;  %s1183_s10 = inlined_call_operand.vmem [shape: bf16[16,32], index: 10, kind: output, shape index: {2}]  }
   0x1   :  { %s1092_s15 = smov 0  }
   0x2 LB: > { %s33_s16 = sadd.s32 1, %s1025_s14  ;;  %p922_p0 = scmp.ge.s32.totalorder %s1029_s15, 1  ;;  %s1029_s15 = sphi %s1092_s15, %s21_s15   ;;  %s1025_s14 = sphi %s1090_s14, %s1185_s14   ;;  %s1021_s13 = sphi %s1088_s13, %s1184_s13  }
   0x3   : > { %p35_p1 = scmp.ge.s32.totalorder %s33_s16, 2  ;;  %p380_p2 = scmp.lt.s32.totalorder %s1029_s15, 3 }
   0x5   : > { %s1187_s16 = smov (%p35_p1, %s33_s16), 0  ;;  %p381_p3 = pnand %p922_p0, %p380_p2 }
   0x6   : > { %v1001_v0 = vld [vmem:[%s1175_s2] sm:$0xff] (!%p381_p3)   ;;  %v1031_v1 = vmov (!%p381_p3), 0.0   ;;  %v1002_v2 = vld [vmem:[%s1175_s2 + $0x8] sm:$0xff] (!%p381_p3)   ;;  %vm1032_vm0 = vmmov (!%p381_p3), 0   ;;  %p449_p4 = scmp.lt.s32.totalorder (!%p381_p3), %s1021_s13, 1  ;;  %vm498_vm1 = vcmask (!%p381_p3), 261120  }
   0x7   : > { %384 = sbr.rel (%p381_p3) target bundleno = 258 (0x102), region = 52  ;;  %951 = vmatprep.subr.bf16.mxu0 (!%p381_p3), %v1031_v1  ;;  %959 = vmatprep.subr.bf16.mxu1 (!%p381_p3), %v1031_v1  ;;  %v1003_v3 = vld [vmem:[%s1177_s4] sm:$0xff] (!%p381_p3)   ;;  %499 = vst.msk [vmem:[#allocation2] sm:$0xff] (!%p381_p3), %vm498_vm1, %v1031_v1  ;;  %500 = vst.msk [vmem:[#allocation3] sm:$0xff] (!%p381_p3), %vm498_vm1, %v1031_v1  ;;  %v1005_v4 = vld [vmem:[%s1177_s4 + $0x8] sm:$0xff] (!%p381_p3)   ;;  %vm704_vm2 = vcmask (!%p381_p3), 257024  }
   0x8   : > { %952 = vmatpush3.bf16.msra.mxu0 (!%p381_p3), %v1001_v0  ;;  %955 = vmatprep.mubr.msk.bf16.mxu0 (!%p381_p3), %vm1032_vm0, %v1031_v1  ;;  %501 = vst.msk [vmem:[#allocation4] sm:$0xff] (!%p381_p3), %vm498_vm1, %v1031_v1  ;;  %v1004_v8 = vld [vmem:[%s1179_s6] sm:$0xff] (!%p381_p3)   ;;  %v1006_v10 = vld [vmem:[%s1179_s6 + $0x8] sm:$0xff] (!%p381_p3)  }
   0x9   : > { %953 = vmatprep.subr.bf16.mxu0 (!%p381_p3), %v1031_v1  ;;  %963 = vmatprep.mubr.msk.bf16.mxu1 (!%p381_p3), %vm1032_vm0, %v1031_v1  ;;  %v937_v25 = vld [vmem:[%s1176_s3] ss:$0 sm:$0xff] (!%p381_p3) }
   0xa   : > { %960 = vmatpush3.bf16.msra.mxu1 (!%p381_p3), %v1003_v3  ;;  %v938_v26 = vld [vmem:[%s1178_s5] ss:$0 sm:$0xff] (!%p381_p3) }
   0xb   : > { %961 = vmatprep.subr.bf16.mxu1 (!%p381_p3), %v1031_v1  ;;  %v939_v38 = vld [vmem:[%s1180_s7] ss:$0 sm:$0xff] (!%p381_p3) }
   0xc   : > { %954 = vmatpush3.bf16.msra.mxu0 (!%p381_p3), %v1002_v2 }
   0xd   : > { %967 = vmatprep.subr.bf16.mxu0 (!%p381_p3), %v1031_v1 }
   0xe   : > { %s1189_s13 = smov (!%p449_p4, %s1021_s13), 1  ;;  %962 = vmatpush3.bf16.msra.mxu1 %v1005_v4  ;;  %v507_v12 = vld [vmem:[#allocation2] sm:$0xff]  ;;  %v570_v13 = vld [vmem:[#allocation3] sm:$0xff] }
   0xf   : > { %s923_s25 = sshll.u32 %s1189_s13, 3  ;;  %v629_v24 = vld [vmem:[#allocation4] sm:$0xff]  ;;  %s925_s24 = sshll.u32 %s1189_s13, 2 }
  0x10   : > { %s455_s28 = scalar_lea.vmem %s1173_s0, %s923_s25  ;;  %s462_s11 = scalar_lea.vmem %s1174_s1, %s923_s25 }
  0x11   : > { %v502_v5 = vld [vmem:[%s455_s28] sm:$0xff]  ;;  %s484_s27 = scalar_lea.vmem %s1181_s8, %s925_s24  ;;  %s488_s30 = scalar_lea.vmem %s1182_s9, %s925_s24 }
  0x12   : > { %v503_v6 = vld [vmem:[%s462_s11] sm:$0xff]  ;;  %v506_v11 = vpack.c.bf16 %v502_v5, %v502_v5  ;;  %s492_s18 = scalar_lea.vmem %s1183_s10, %s925_s24 }
  0x13   : > { %v504_v7 = vadd.f32 %v503_v6, %v502_v5 }
  0x15   : > { %v505_v9 = vpack.c.bf16 %v504_v7, %v504_v7 }
  0x17   : > { %956 = vmatmul.mubr.msk.bf16.vlgmr.msra.gmra.mrb[0].mxu0 %vm498_vm1, %v505_v9  ;;  %964 = vmatmul.mubr.msk.bf16.vlgmr.msra.gmra.mrb[0].mxu1 %vm498_vm1, %v505_v9 }
  0x18   : > { %968 = vmatpush3.bf16.msra.mxu0 %v1004_v8  ;;  %971 = vmatprep.mubr.msk.bf16.mxu0 %vm1032_vm0, %v1031_v1 }
  0x19   : > { %969 = vmatprep.subr.bf16.mxu0 %v1031_v1 }
  0x1c   : > { %970 = vmatpush3.bf16.msra.mxu0 %v1006_v10 }
  0x1f   : > { %972 = vmatmul.mubr.msk.bf16.vlgmr.msra.gmra.mrb[4].mxu0 %vm498_vm1, %v506_v11 }
  0xea   : > { %v562_v14 = vpop.f32.mrb[0].mxu0  ;;  %v621_v15 = vpop.f32.mrb[0].mxu1 }
  0xeb   : > { %v568_v16 = vadd.f32 %v562_v14, %v507_v12  ;;  %v957_v17 = vpop.f32.mrb[1].mxu0  ;;  %v627_v18 = vadd.f32 %v621_v15, %v570_v13  ;;  %v965_v19 = vpop.f32.mrb[1].mxu1 }
  0xec   : > { %v565_v20 = vpop.f32.mrb[2].mxu0  ;;  %v624_v21 = vpop.f32.mrb[2].mxu1 }
  0xed   : > { %569 = vst.msk [vmem:[#allocation2] sm:$0xff] %vm498_vm1, %v568_v16  ;;  %v958_v22 = vpop.f32.mrb[3].mxu0  ;;  %628 = vst.msk [vmem:[#allocation3] sm:$0xff] %vm498_vm1, %v627_v18  ;;  %v966_v23 = vpop.f32.mrb[3].mxu1 }
  0xf2   : > { %v683_v27 = vpop.f32.mrb[4].mxu0 }
  0xf3   : > { %v689_v28 = vadd.f32 %v683_v27, %v629_v24  ;;  %v973_v29 = vpop.f32.mrb[5].mxu0 }
  0xf4   : > { %v694_v30 = vld [vmem:[#allocation2] sm:$0xff]  ;;  %v706_v31 = vld [vmem:[#allocation3] sm:$0xff]  ;;  %v686_v32 = vpop.f32.mrb[6].mxu0 }
  0xf5   : > { %v702_v33 = vadd.f32 %v937_v25, %v694_v30  ;;  %v714_v34 = vadd.f32 %v938_v26, %v706_v31  ;;  %690 = vst.msk [vmem:[#allocation4] sm:$0xff] %vm498_vm1, %v689_v28  ;;  %v974_v35 = vpop.f32.mrb[7].mxu0 }
  0xf7   : > { %v703_v36 = vpack.c.bf16 %v702_v33, %v702_v33  ;;  %v715_v37 = vpack.c.bf16 %v714_v34, %v714_v34 }
  0xf9   : > { %705 = vst.msk [vmem:[%s484_s27] sm:$0xf] %vm704_vm2, %v703_v36  ;;  %716 = vst.msk [vmem:[%s488_s30] sm:$0xf] %vm704_vm2, %v715_v37 }
  0xfc   : > { %v717_v39 = vld [vmem:[#allocation4] sm:$0xff] }
  0xfd   : > { %v725_v40 = vadd.f32 %v939_v38, %v717_v39 }
  0xff   : > { %v726_v41 = vpack.c.bf16 %v725_v40, %v725_v40 }
 0x101   : > { %727 = vst.msk [vmem:[%s492_s18] sm:$0xf] %vm704_vm2, %v726_v41 }
 0x102 PF: > { %s21_s15 = sadd.s32 1, %s1029_s15   ;;  %s1184_s13 = smov %s1025_s14 }
 0x103   : > { %p18_p5 = scmp.ge.s32.totalorder %s21_s15, 4   ;;  %s1185_s14 = smov %s1187_s16 }
 0x105   :  { %20 = sbr.rel (!%p18_p5) target bundleno = 2 (0x2), region = 126 }

// kernel: transformer_decoder_layer.12
= control target key start
LH: loop header
LB: loop body
LE: loop exit
PB: predicated region body
PF: predicated region fallthrough
CT: control target
= control target key end

     0   :  { %s555_s15 = smov 0   ;;  %s557_s16 = smov 0   ;;  %s603_s0 = inlined_call_operand.vmem [shape: f32[16,32], index: 0, kind: input, shape index: {}]   ;;  %s604_s1 = inlined_call_operand.vmem [shape: f32[16,32], index: 1, kind: input, shape index: {}]   ;;  %s605_s2 = inlined_call_operand.vmem [shape: bf16[32,32], index: 2, kind: input, shape index: {}]   ;;  %s606_s3 = inlined_call_operand.vmem [shape: f32[1,32], index: 3, kind: input, shape index: {}]   ;;  %s607_s4 = inlined_call_operand.vmem [shape: bf16[16,32], index: 4, kind: output, shape index: {}]  }
   0x1   :  { %s559_s17 = smov 0  }
   0x2 LB: > { %s26_s18 = sadd.s32 1, %s522_s16  ;;  %p455_p0 = scmp.ge.s32.totalorder %s526_s17, 1  ;;  %s526_s17 = sphi %s559_s17, %s14_s17   ;;  %s522_s16 = sphi %s557_s16, %s609_s16   ;;  %s518_s15 = sphi %s555_s15, %s608_s15  }
   0x3   : > { %p28_p1 = scmp.ge.s32.totalorder %s26_s18, 2  ;;  %p203_p2 = scmp.lt.s32.totalorder %s526_s17, 3 }
   0x5   : > { %s611_s18 = smov (%p28_p1, %s26_s18), 0  ;;  %p204_p3 = pnand %p455_p0, %p203_p2 }
   0x6   : > { %v502_v0 = vld [vmem:[%s605_s2] sm:$0xff] (!%p204_p3)   ;;  %v528_v1 = vmov (!%p204_p3), 0.0   ;;  %v503_v2 = vld [vmem:[%s605_s2 + $0x8] sm:$0xff] (!%p204_p3)   ;;  %vm529_vm0 = vmmov (!%p204_p3), 0   ;;  %p242_p4 = scmp.lt.s32.totalorder (!%p204_p3), %s518_s15, 1  ;;  %vm271_vm1 = vcmask (!%p204_p3), 261120  }
   0x7   : > { %207 = sbr.rel (%p204_p3) target bundleno = 250 (0xfa), region = 36  ;;  %468 = vmatprep.subr.bf16.mxu0 (!%p204_p3), %v528_v1  ;;  %472 = vmatprep.mubr.msk.bf16.mxu0 (!%p204_p3), %vm529_vm0, %v528_v1  ;;  %272 = vst.msk [vmem:[#allocation2] sm:$0xff] (!%p204_p3), %vm271_vm1, %v528_v1  ;;  %v462_v13 = vld [vmem:[%s606_s3] ss:$0 sm:$0xff] (!%p204_p3)  ;;  %vm353_vm2 = vcmask (!%p204_p3), 257024  }
   0x8   : > { %469 = vmatpush3.bf16.msra.mxu0 (!%p204_p3), %v502_v0 }
   0x9   : > { %470 = vmatprep.subr.bf16.mxu0 (!%p204_p3), %v528_v1 }
   0xc   : > { %471 = vmatpush3.bf16.msra.mxu0 (!%p204_p3), %v503_v2 }
   0xe   : > { %s613_s15 = smov (!%p242_p4, %s518_s15), 1  ;;  %v277_v7 = vld [vmem:[#allocation2] sm:$0xff] }
   0xf   : > { %s456_s23 = sshll.u32 %s613_s15, 3  ;;  %s458_s6 = sshll.u32 %s613_s15, 2 }
  0x10   : > { %s248_s26 = scalar_lea.vmem %s603_s0, %s456_s23  ;;  %s255_s29 = scalar_lea.vmem %s604_s1, %s456_s23 }
  0x11   : > { %v273_v3 = vld [vmem:[%s248_s26] sm:$0xff]  ;;  %s265_s9 = scalar_lea.vmem %s607_s4, %s458_s6 }
  0x12   : > { %v274_v4 = vld [vmem:[%s255_s29] sm:$0xff] }
  0x13   : > { %v275_v5 = vadd.f32 %v274_v4, %v273_v3 }
  0x15   : > { %v276_v6 = vpack.c.bf16 %v275_v5, %v275_v5 }
  0x17   : > { %473 = vmatmul.mubr.msk.bf16.vlgmr.msra.gmra.mrb[0].mxu0 %vm271_vm1, %v276_v6 }
  0xea   : > { %v332_v8 = vpop.f32.mrb[0].mxu0 }
  0xeb   : > { %v338_v9 = vadd.f32 %v332_v8, %v277_v7  ;;  %v474_v10 = vpop.f32.mrb[1].mxu0 }
  0xec   : > { %v335_v11 = vpop.f32.mrb[2].mxu0 }
  0xed   : > { %339 = vst.msk [vmem:[#allocation2] sm:$0xff] %vm271_vm1, %v338_v9  ;;  %v475_v12 = vpop.f32.mrb[3].mxu0 }
  0xf4   : > { %v343_v14 = vld [vmem:[#allocation2] sm:$0xff] }
  0xf5   : > { %v351_v15 = vadd.f32 %v462_v13, %v343_v14 }
  0xf7   : > { %v352_v16 = vpack.c.bf16 %v351_v15, %v351_v15 }
  0xf9   : > { %354 = vst.msk [vmem:[%s265_s9] sm:$0xf] %vm353_vm2, %v352_v16 }
  0xfa PF: > { %s14_s17 = sadd.s32 1, %s526_s17   ;;  %s608_s15 = smov %s522_s16 }
  0xfb   : > { %p11_p5 = scmp.ge.s32.totalorder %s14_s17, 4   ;;  %s609_s16 = smov %s611_s18 }
  0xfd   :  { %13 = sbr.rel (!%p11_p5) target bundleno = 2 (0x2), region = 80 }

// kernel: transformer_decoder_layer.10
= control target key start
LH: loop header
LB: loop body
LE: loop exit
PB: predicated region body
PF: predicated region fallthrough
CT: control target
= control target key end

     0   :  { %s636_s21 = smov 0   ;;  %s638_s22 = smov 0   ;;  %s697_s0 = inlined_call_operand.vmem [shape: bf16[16,32], index: 0, kind: input, shape index: {}]   ;;  %s698_s1 = inlined_call_operand.vmem [shape: f32[16,32], index: 1, kind: input, shape index: {}]   ;;  %s699_s2 = inlined_call_operand.vmem [shape: bf16[32,32], index: 2, kind: input, shape index: {}]   ;;  %s700_s3 = inlined_call_operand.vmem [shape: f32[1,32], index: 3, kind: input, shape index: {}]   ;;  %s701_s4 = inlined_call_operand.vmem [shape: f32[1,32], index: 4, kind: input, shape index: {}]   ;;  %s702_s5 = inlined_call_operand.vmem [shape: f32[1,32], index: 5, kind: input, shape index: {}]   ;;  %s703_s6 = inlined_call_operand.vmem [shape: f32[16,32], index: 6, kind: output, shape index: {}]  }
   0x1   :  { %s640_s23 = smov 0  }
   0x2 LB: > { %s28_s24 = sadd.s32 1, %s593_s22  ;;  %p522_p0 = scmp.ge.s32.totalorder %s597_s23, 1  ;;  %s597_s23 = sphi %s640_s23, %s16_s23   ;;  %s593_s22 = sphi %s638_s22, %s705_s22   ;;  %s589_s21 = sphi %s636_s21, %s704_s21  }
   0x3   : > { %p30_p1 = scmp.ge.s32.totalorder %s28_s24, 2  ;;  %p248_p2 = scmp.lt.s32.totalorder %s597_s23, 3 }
   0x5   : > { %s707_s24 = smov (%p30_p1, %s28_s24), 0  ;;  %p249_p3 = pnand %p522_p0, %p248_p2 }
   0x6   : > { %vm314_vm0 = vcmask (!%p249_p3), 261120   ;;  %v599_v0 = vmov (!%p249_p3), 0.0   ;;  %v571_v1 = vld [vmem:[%s699_s2] sm:$0xff] (!%p249_p3)   ;;  %vm600_vm1 = vmmov (!%p249_p3), 0   ;;  %p288_p4 = scmp.lt.s32.totalorder (!%p249_p3), %s589_s21, 1  ;;  %v572_v2 = vld [vmem:[%s699_s2 + $0x8] sm:$0xff] (!%p249_p3)  }
   0x7   : > { %252 = sbr.rel (%p249_p3) target bundleno = 558 (0x22e), region = 44  ;;  %315 = vst.msk [vmem:[#allocation2] sm:$0xff] (!%p249_p3), %vm314_vm0, %v599_v0  ;;  %537 = vmatprep.subr.bf16.mxu0 (!%p249_p3), %v599_v0  ;;  %541 = vmatprep.mubr.msk.bf16.mxu0 (!%p249_p3), %vm600_vm1, %v599_v0  ;;  %v529_v10 = vld [vmem:[%s700_s3] ss:$0 sm:$0xff] (!%p249_p3) }
   0x8   : > { %538 = vmatpush3.bf16.msra.mxu0 (!%p249_p3), %v571_v1  ;;  %v530_v25 = vld [vmem:[%s701_s4] ss:$0 sm:$0xff] (!%p249_p3) }
   0x9   : > { %539 = vmatprep.subr.bf16.mxu0 (!%p249_p3), %v599_v0  ;;  %v531_v27 = vld [vmem:[%s702_s5] ss:$0 sm:$0xff] (!%p249_p3) }
   0xc   : > { %540 = vmatpush3.bf16.msra.mxu0 (!%p249_p3), %v572_v2 }
   0xe   : > { %s709_s21 = smov (!%p288_p4, %s589_s21), 1  ;;  %v316_v4 = vld [vmem:[#allocation2] sm:$0xff] }
   0xf   : > { %s523_s29 = sshll.u32 %s709_s21, 2  ;;  %s524_s9 = sshll.u32 %s709_s21, 3 }
  0x10   : > { %s294_s8 = scalar_lea.vmem %s697_s0, %s523_s29  ;;  %s298_s12 = scalar_lea.vmem %s698_s1, %s524_s9 }
  0x11   : > { %v317_v3 = vld [vmem:[%s294_s8] sm:$0xf]  ;;  %s308_s21 = scalar_lea.vmem %s703_s6, %s524_s9 }
  0x12   : > { %542 = vmatmul.mubr.msk.bf16.vlgmr.msra.gmra.mrb[0].mxu0 %vm314_vm0, %v317_v3  ;;  %v392_v12 = vld [vmem:[%s298_s12] sm:$0xff] }
  0xe5   : > { %v372_v5 = vpop.f32.mrb[0].mxu0 }
  0xe6   : > { %v378_v6 = vadd.f32 %v372_v5, %v316_v4  ;;  %v543_v7 = vpop.f32.mrb[1].mxu0 }
  0xe7   : > { %v375_v8 = vpop.f32.mrb[2].mxu0 }
  0xe8   : > { %379 = vst.msk [vmem:[#allocation2] sm:$0xff] %vm314_vm0, %v378_v6  ;;  %v544_v9 = vpop.f32.mrb[3].mxu0 }
  0xef   : > { %v383_v11 = vld [vmem:[#allocation2] sm:$0xff] }
  0xf0   : > { %v391_v13 = vadd.f32 %v529_v10, %v383_v11 }
  0xf2   : > { %v393_v14 = vadd.f32 %v392_v12, %v391_v13 }
  0xf4   : > { %v396_v15 = vsel %vm314_vm0, %v393_v14, 0.0 }
  0xf5   : > { %397 = vadd.xlane.f32.xlu0 %v396_v15 }
 0x182   : > { %v398_v16 = vpop.xlane.xlu0 %397 }
 0x183   : > { %v400_v17 = vmul.f32 0.03125, %v398_v16 }
 0x185   : > { %v401_v18 = vsub.f32 %v393_v14, %v400_v17 }
 0x187   : > { %v402_v19 = vmul.f32 %v401_v18, %v401_v18 }
 0x189   : > { %v403_v20 = vsel %vm314_vm0, %v402_v19, 0.0 }
 0x18a   : > { %404 = vadd.xlane.f32.xlu0 %v403_v20 }
 0x217   : > { %v405_v21 = vpop.xlane.xlu0 %404 }
 0x218   : > { %v406_v22 = vmul.f32 0.03125, %v405_v21 }
 0x21a   : > { %v407_v23 = vadd.f32 1e-05, %v406_v22 }
 0x21c   : > { %573 = vrsqrt.f32 %v407_v23 }
 0x226   : > { %v574_v24 = vpop.eup %573 }
 0x227   : > { %v409_v26 = vmul.f32 %v574_v24, %v401_v18 }
 0x229   : > { %v416_v28 = vmul.f32 %v530_v25, %v409_v26 }
 0x22b   : > { %v423_v29 = vadd.f32 %v531_v27, %v416_v28 }
 0x22d   : > { %424 = vst.msk [vmem:[%s308_s21] sm:$0xff] %vm314_vm0, %v423_v29 }
 0x22e PF: > { %s16_s23 = sadd.s32 1, %s597_s23   ;;  %s704_s21 = smov %s593_s22 }
 0x22f   : > { %p13_p5 = scmp.ge.s32.totalorder %s16_s23, 4   ;;  %s705_s22 = smov %s707_s24 }
 0x231   :  { %15 = sbr.rel (!%p13_p5) target bundleno = 2 (0x2), region = 88 }

// kernel: transformer_decoder_layer.9
= control target key start
LH: loop header
LB: loop body
LE: loop exit
PB: predicated region body
PF: predicated region fallthrough
CT: control target
= control target key end

     0   :  { %s1193_s12 = smov 0   ;;  %s1195_s13 = smov 0   ;;  %s1357_s0 = inlined_call_operand.vmem [shape: bf16[2,8,32], index: 0, kind: input, shape index: {}]   ;;  %s1358_s1 = inlined_call_operand.vmem [shape: bf16[2,8,32], index: 1, kind: input, shape index: {}]   ;;  %s1359_s2 = inlined_call_operand.vmem [shape: bf16[2,8,32], index: 2, kind: input, shape index: {}]   ;;  %s1360_s3 = inlined_call_operand.vmem [shape: bf16[2,8,32], index: 3, kind: output, shape index: {}]  }
   0x1   :  { %s1197_s14 = smov 0  }
   0x2 LB: > { %s32_s15 = sadd.s32 1, %s1157_s13  ;;  %p996_p0 = scmp.ge.s32.totalorder %s1161_s14, 1  ;;  %s1161_s14 = sphi %s1197_s14, %s13_s14   ;;  %s1157_s13 = sphi %s1195_s13, %s1362_s13   ;;  %s1153_s12 = sphi %s1193_s12, %s1361_s12  }
   0x3   : > { %p34_p1 = scmp.ge.s32.totalorder %s32_s15, 2  ;;  %p190_p2 = scmp.lt.s32.totalorder %s1161_s14, 3 }
   0x5   : > { %s1364_s15 = smov (%p34_p1, %s32_s15), 0  ;;  %p191_p3 = pnand %p996_p0, %p190_p2 }
   0x6   : > { %p232_p4 = scmp.lt.s32.totalorder (!%p191_p3), %s1153_s12, 1  ;;  %vm274_vm0 = vcmask (!%p191_p3), 64512   ;;  %v1163_v0 = vmov (!%p191_p3), 0.0   ;;  %vm1164_vm1 = vmmov (!%p191_p3), 0   ;;  %vm265_vm2 = vcmask (!%p191_p3), 7168   ;;  %s1167_s23 = smov (!%p191_p3), 120  }
   0x7   : > { %194 = sbr.rel (%p191_p3) target bundleno = 1465 (0x5b9), region = 32  ;;  %1029 = vmatprep.subr.bf16.mxu0 (!%p191_p3), %v1163_v0  ;;  %275 = vst.msk [vmem:[#allocation4] sm:$0xff] (!%p191_p3), %vm274_vm0, %v1163_v0  ;;  %276 = vst.msk [vmem:[#allocation4 + $0x8] sm:$0xff] (!%p191_p3), %vm274_vm0, %v1163_v0  ;;  %1031 = vmatprep.mubr.msk.bf16.mxu0 (!%p191_p3), %vm1164_vm1, %v1163_v0  ;;  %v1165_v7 = vmov (!%p191_p3), -inf   ;;  %v1166_v13 = vmov (!%p191_p3), 0   ;;  %s1168_s24 = smov (!%p191_p3), 112  }
   0x8   : > { %277 = vst.msk [vmem:[#allocation4 + $0x10] sm:$0xff] (!%p191_p3), %vm274_vm0, %v1163_v0  ;;  %278 = vst.msk [vmem:[#allocation4 + $0x18] sm:$0xff] (!%p191_p3), %vm274_vm0, %v1163_v0  ;;  %1035 = vmatprep.subr.bf16.mxu1 (!%p191_p3), %v1163_v0  ;;  %1037 = vmatprep.mubr.msk.bf16.mxu1 (!%p191_p3), %vm1164_vm1, %v1163_v0  ;;  %s1169_s25 = smov (!%p191_p3), 104   ;;  %vm367_vm3 = vcmask (!%p191_p3), 1043456   ;;  %s1170_s29 = smov (!%p191_p3), 8   ;;  %vm878_vm4 = vcmask (!%p191_p3), 130048  }
   0x9   : > { %266 = vst.msk [vmem:[#allocation2] sm:$0xff] (!%p191_p3), %vm265_vm2, %v1165_v7  ;;  %267 = vst.msk [vmem:[#allocation2 + $0x8] sm:$0xff] (!%p191_p3), %vm265_vm2, %v1165_v7  ;;  %1111 = vset.pattern.permute.xlu0 (!%p191_p3), %v1166_v13  ;;  %1112 = vset.pattern.permute.xlu1 (!%p191_p3), %v1166_v13  ;;  %s1171_s30 = smov (!%p191_p3), 16   ;;  %s1172_s4 = smov (!%p191_p3), 24   ;;  %vm880_vm5 = vcmask (!%p191_p3), 195584   ;;  %vm883_vm6 = vcmask (!%p191_p3), 257024  }
   0xa   : > { %268 = vst.msk [vmem:[#allocation2 + $0x10] sm:$0xff] (!%p191_p3), %vm265_vm2, %v1165_v7  ;;  %269 = vst.msk [vmem:[#allocation2 + $0x18] sm:$0xff] (!%p191_p3), %vm265_vm2, %v1165_v7 }
   0xb   : > { %270 = vst.msk [vmem:[#allocation3] sm:$0xff] (!%p191_p3), %vm265_vm2, %v1163_v0  ;;  %271 = vst.msk [vmem:[#allocation3 + $0x8] sm:$0xff] (!%p191_p3), %vm265_vm2, %v1163_v0 }
   0xc   : > { %272 = vst.msk [vmem:[#allocation3 + $0x10] sm:$0xff] (!%p191_p3), %vm265_vm2, %v1163_v0  ;;  %273 = vst.msk [vmem:[#allocation3 + $0x18] sm:$0xff] (!%p191_p3), %vm265_vm2, %v1163_v0 }
   0xe   : > { %s1366_s12 = smov (!%p232_p4, %s1153_s12), 1 }
   0xf   : > { %s1225_s16 = sshll.u32 %s1366_s12, 2 }
  0x10   : > { %s245_s19 = scalar_lea.vmem %s1358_s1, %s1225_s16  ;;  %s238_s22 = scalar_lea.vmem %s1357_s0, %s1225_s16  ;;  %v1259_v15 = vld [vmem:[#allocation2] sm:$0xff]  ;;  %v1302_v54 = vld [vmem:[#allocation2 + $0x8] sm:$0xff] }
  0x11   : > { %v283_v1 = vld [vmem:[%s245_s19] sm:$0xf]  ;;  %s252_s28 = scalar_lea.vmem %s1359_s2, %s1225_s16  ;;  %v607_v58 = vld [vmem:[#allocation2 + $0x10] sm:$0xff]  ;;  %v742_v62 = vld [vmem:[#allocation2 + $0x18] sm:$0xff]  ;;  %s259_s7 = scalar_lea.vmem %s1360_s3, %s1225_s16 }
  0x12   : > { %v279_v2 = vld [vmem:[%s238_s22] sm:$0xf]  ;;  %v290_v3 = vsel %vm274_vm0, %v283_v1, 0  ;;  %v1003_v14 = vcombine.low %v283_v1, %v283_v1 }
  0x13   : > { %v280_v4 = vunpack.c.l.bf16 %v279_v2  ;;  %1030 = vmatpush3.bf16.xpose.msra.mxu0 %v290_v3  ;;  %v1273_v19 = vld [vmem:[%s252_s28] sm:$0xf] }
  0x14   : > { %1047 = vmatprep.subr.bf16.mxu0 %v1163_v0  ;;  %420 = vrot.lane.b32.xlu1 %v1003_v14, %s1167_s23  ;;  %v369_v20 = vsel %vm367_vm3, %v1273_v19, 0  ;;  %v1005_v2 = vcombine.low %v1273_v19, %v1273_v19 }
  0x15   : > { %v281_v5 = vmul.f32 0.35355338, %v280_v4  ;;  %1036 = vmatpush3.bf16.msra.mxu1 %v369_v20 }
  0x16   : > { %1041 = vmatprep.subr.bf16.mxu1 %v1163_v0 }
  0x17   : > { %v282_v6 = vpack.c.bf16 %v281_v5, %v281_v5 }
  0x19   : > { %415 = vrot.lane.b32.xlu1 %v282_v6, %s1167_s23 }
  0x1a   : > { %1032 = vmatmul.mubr.msk.bf16.vlgmr.msra.gmra.mrb[0].mxu0 %vm274_vm0, %v282_v6 }
  0x1b   : > { %1049 = vmatprep.mubr.msk.bf16.mxu0 %vm1164_vm1, %v1163_v0 }
  0x1d   : > { %558 = vrot.lane.b32.xlu1 %v1003_v14, %s1168_s24 }
  0x21   : > { %556 = vrot.lane.b32.xlu1 %v282_v6, %s1168_s24 }
  0x25   : > { %693 = vrot.lane.b32.xlu1 %v1003_v14, %s1169_s25 }
  0x29   : > { %691 = vrot.lane.b32.xlu1 %v282_v6, %s1169_s25 }
  0x86   : > { %v421_v24 = vpop.permute.xlu1 %420 }
  0x87   : > { %v426_v27 = vsel %vm274_vm0, %v421_v24, 0 }
  0x8b   : > { %v416_v25 = vpop.permute.xlu1 %415 }
  0x8f   : > { %v559_v29 = vpop.permute.xlu1 %558 }
  0x90   : > { %v564_v31 = vsel %vm274_vm0, %v559_v29, 0 }
  0x93   : > { %v557_v30 = vpop.permute.xlu1 %556 }
  0x97   : > { %v694_v32 = vpop.permute.xlu1 %693 }
  0x98   : > { %v699_v33 = vsel %vm274_vm0, %v694_v32, 0 }
  0x9b   : > { %v692_v34 = vpop.permute.xlu1 %691 }
  0xed   : > { %v326_v8 = vpop.f32.mrb[0].mxu0 }
  0xee   : > { %v1033_v9 = vpop.f32.mrb[1].mxu0  ;;  %v333_v10 = vsel %vm274_vm0, %v326_v8, -inf }
  0xef   : > { %334 = vmax.xlane.f32.xlu0 %v333_v10  ;;  %v329_v11 = vpop.f32.mrb[2].mxu0 }
  0xf0   : > { %v1034_v12 = vpop.f32.mrb[3].mxu0 }
 0x17c   : > { %v335_v16 = vpop.xlane.xlu0 %334 }
 0x17d   : > { %v1262_v17 = vmax.f32 %v1259_v15, %v335_v16 }
 0x17f   : > { %v337_v18 = vsub.f32 %v1259_v15, %v1262_v17  ;;  %413 = vst.msk [vmem:[#allocation2] sm:$0xff] %vm265_vm2, %v1262_v17  ;;  %342 = vperm.xlu0 %1111, %v1262_v17  }
 0x1fe   : > { %v343_v21 = vpop.permute.xlu0 %342 }
 0x1ff   : > { %v345_v22 = vsub.f32 %v326_v8, %v343_v21 }
 0x201   : > { %v346_v23 = vmul.f32 1.442695, %v345_v22 }
 0x203   : > { %1115 = vpow2.f32 %v346_v23 }
 0x20d   : > { %v1278_v26 = vpop.eup %1115 }
 0x20e   : > { %v363_v28 = vpack.c.bf16 %v1278_v26, %v1278_v26  ;;  %v350_v4 = vsel %vm274_vm0, %v1278_v26, 0.0 }
 0x210   : > { %1038 = vmatmul.mubr.msk.bf16.vlgmr.msra.gmra.mrb[0].mxu1 %vm274_vm0, %v363_v28 }
 0x211   : > { %1042 = vmatpush3.bf16.xpose.msra.mxu1 %v426_v27  ;;  %1043 = vmatprep.mubr.msk.bf16.mxu1 %vm1164_vm1, %v1163_v0 }
 0x212   : > { %1053 = vmatprep.subr.bf16.mxu1 %v1163_v0 }
 0x218   : > { %1044 = vmatmul.mubr.msk.bf16.vlgmr.msra.gmra.mrb[4].mxu1 %vm274_vm0, %v416_v25 }
 0x219   : > { %1054 = vmatpush3.bf16.xpose.msra.mxu1 %v564_v31  ;;  %1055 = vmatprep.mubr.msk.bf16.mxu1 %vm1164_vm1, %v1163_v0 }
 0x21a   : > { %1065 = vmatprep.subr.bf16.mxu1 %v1163_v0 }
 0x220   : > { %1056 = vmatmul.mubr.msk.bf16.vlgmr.msra.gmra.mrb[8].mxu1 %vm274_vm0, %v557_v30  ;;  %v338_v30 = vmul.f32 1.442695, %v337_v18 }
 0x221   : > { %1066 = vmatpush3.bf16.xpose.msra.mxu1 %v699_v33  ;;  %1067 = vmatprep.mubr.msk.bf16.mxu1 %vm1164_vm1, %v1163_v0 }
 0x228   : > { %1068 = vmatmul.mubr.msk.bf16.vlgmr.msra.gmra.mrb[12].mxu1 %vm274_vm0, %v692_v34 }
 0x2e3   : > { %v1297_v35 = vpop.f32.mrb[0].mxu1 }
 0x2e4   : > { %v1039_v36 = vpop.f32.mrb[1].mxu1 }
 0x2e5   : > { %v408_v37 = vpop.f32.mrb[2].mxu1 }
 0x2e6   : > { %v1040_v38 = vpop.f32.mrb[3].mxu1 }
 0x2e7   : > { %v348_v38 = vld [vmem:[#allocation3] sm:$0xff] }
 0x2eb   : > { %v462_v39 = vpop.f32.mrb[4].mxu1 }
 0x2ec   : > { %v1045_v40 = vpop.f32.mrb[5].mxu1  ;;  %v470_v41 = vsel %vm274_vm0, %v462_v39, -inf }
 0x2ed   : > { %471 = vmax.xlane.f32.xlu1 %v470_v41  ;;  %v465_v42 = vpop.f32.mrb[6].mxu1 }
 0x2ee   : > { %v1046_v43 = vpop.f32.mrb[7].mxu1 }
 0x2ef   : > { %v486_v43 = vld [vmem:[#allocation3 + $0x8] sm:$0xff] }
 0x2f3   : > { %v600_v44 = vpop.f32.mrb[8].mxu1 }
 0x2f4   : > { %v1057_v45 = vpop.f32.mrb[9].mxu1  ;;  %v608_v46 = vsel %vm274_vm0, %v600_v44, -inf }
 0x2f5   : > { %609 = vmax.xlane.f32.xlu0 %v608_v46  ;;  %v603_v47 = vpop.f32.mrb[10].mxu1 }
 0x2f6   : > { %v1058_v48 = vpop.f32.mrb[11].mxu1  ;;  %v624_v47 = vld [vmem:[#allocation3 + $0x10] sm:$0xff] }
 0x2fb   : > { %v735_v49 = vpop.f32.mrb[12].mxu1 }
 0x2fc   : > { %v1069_v50 = vpop.f32.mrb[13].mxu1  ;;  %v743_v51 = vsel %vm274_vm0, %v735_v49, -inf }
 0x2fd   : > { %744 = vmax.xlane.f32.xlu1 %v743_v51  ;;  %v738_v52 = vpop.f32.mrb[14].mxu1 }
 0x2fe   : > { %v1070_v53 = vpop.f32.mrb[15].mxu1  ;;  %v759_v52 = vld [vmem:[#allocation3 + $0x18] sm:$0xff] }
 0x2ff   : > { %v356_v53 = vld [vmem:[#allocation4] sm:$0xff] }
 0x37a   : > { %v472_v55 = vpop.xlane.xlu1 %471 }
 0x37b   : > { %v473_v56 = vmax.f32 %v1302_v54, %v472_v55 }
 0x37d   : > { %v474_v57 = vsub.f32 %v1302_v54, %v473_v56  ;;  %555 = vst.msk [vmem:[#allocation2 + $0x8] sm:$0xff] %vm265_vm2, %v473_v56  ;;  %479 = vperm.xlu1 %1112, %v473_v56  }
 0x37f   : > { %v475_v32 = vmul.f32 1.442695, %v474_v57 }
 0x382   : > { %v610_v59 = vpop.xlane.xlu0 %609 }
 0x383   : > { %v611_v60 = vmax.f32 %v607_v58, %v610_v59 }
 0x385   : > { %v612_v61 = vsub.f32 %v607_v58, %v611_v60  ;;  %690 = vst.msk [vmem:[#allocation2 + $0x10] sm:$0xff] %vm265_vm2, %v611_v60  ;;  %617 = vperm.xlu0 %1111, %v611_v60  }
 0x387   : > { %v613_v34 = vmul.f32 1.442695, %v612_v61 }
 0x38a   : > { %v745_v63 = vpop.xlane.xlu1 %744 }
 0x38b   : > { %v746_v1 = vmax.f32 %v742_v62, %v745_v63 }
 0x38d   : > { %v747_v3 = vsub.f32 %v742_v62, %v746_v1  ;;  %825 = vst.msk [vmem:[#allocation2 + $0x18] sm:$0xff] %vm265_vm2, %v746_v1  ;;  %752 = vperm.xlu1 %1112, %v746_v1  }
 0x38f   : > { %v748_v33 = vmul.f32 1.442695, %v747_v3 }
 0x391   : > { %505 = vrot.lane.b32.xlu1 %v1005_v2, %s1167_s23 }
 0x395   : > { %640 = vrot.lane.b32.xlu1 %v1005_v2, %s1168_s24 }
 0x399   : > { %775 = vrot.lane.b32.xlu1 %v1005_v2, %s1169_s25  ;;  %v494_v2 = vld [vmem:[#allocation4 + $0x8] sm:$0xff] }
 0x3bd   : > { %351 = vadd.xlane.f32.xlu1 %v350_v4 }
 0x3fc   : > { %v480_v5 = vpop.permute.xlu1 %479 }
 0x3fd   : > { %v482_v6 = vsub.f32 %v462_v39, %v480_v5 }
 0x3ff   : > { %v483_v7 = vmul.f32 1.442695, %v482_v6 }
 0x401   : > { %1117 = vpow2.f32 %v483_v7 }
 0x404   : > { %v618_v8 = vpop.permute.xlu0 %617 }
 0x405   : > { %v620_v9 = vsub.f32 %v600_v44, %v618_v8 }
 0x407   : > { %v621_v10 = vmul.f32 1.442695, %v620_v9  ;;  %v632_v9 = vld [vmem:[#allocation4 + $0x10] sm:$0xff] }
 0x409   : > { %1119 = vpow2.f32 %v621_v10 }
 0x40b   : > { %v1118_v11 = vpop.eup %1117 }
 0x40c   : > { %v753_v12 = vpop.permute.xlu1 %752  ;;  %v488_v13 = vsel %vm274_vm0, %v1118_v11, 0.0  ;;  %v501_v22 = vpack.c.bf16 %v1118_v11, %v1118_v11 }
 0x40d   : > { %v755_v14 = vsub.f32 %v735_v49, %v753_v12  ;;  %489 = vadd.xlane.f32.xlu0 %v488_v13 }
 0x40f   : > { %v756_v16 = vmul.f32 1.442695, %v755_v14 }
 0x410   : > { %v506_v19 = vpop.permute.xlu1 %505 }
 0x411   : > { %1121 = vpow2.f32 %v756_v16  ;;  %v511_v20 = vsel %vm367_vm3, %v506_v19, 0 }
 0x412   : > { %1048 = vmatpush3.bf16.msra.mxu0 %v511_v20  ;;  %1123 = vpow2.f32 %v338_v30  ;;  %v767_v20 = vld [vmem:[#allocation4 + $0x18] sm:$0xff] }
 0x413   : > { %v1120_v21 = vpop.eup %1119  ;;  %1059 = vmatprep.subr.bf16.mxu0 %v1163_v0  ;;  %1125 = vpow2.f32 %v475_v32 }
 0x414   : > { %v626_v23 = vsel %vm274_vm0, %v1120_v21, 0.0  ;;  %v641_v24 = vpop.permute.xlu1 %640  ;;  %v639_v28 = vpack.c.bf16 %v1120_v21, %v1120_v21  ;;  %1127 = vpow2.f32 %v748_v33 }
 0x415   : > { %627 = vadd.xlane.f32.xlu0 %v626_v23  ;;  %1050 = vmatmul.mubr.msk.bf16.vlgmr.msra.gmra.mrb[4].mxu0 %vm274_vm0, %v501_v22  ;;  %v646_v25 = vsel %vm367_vm3, %v641_v24, 0  ;;  %1129 = vpow2.f32 %v613_v34 }
 0x416   : > { %1060 = vmatpush3.bf16.msra.mxu0 %v646_v25  ;;  %1061 = vmatprep.mubr.msk.bf16.mxu0 %vm1164_vm1, %v1163_v0 }
 0x417   : > { %1071 = vmatprep.subr.bf16.mxu0 %v1163_v0 }
 0x418   : > { %v776_v26 = vpop.permute.xlu1 %775 }
 0x419   : > { %v781_v29 = vsel %vm367_vm3, %v776_v26, 0 }
 0x41b   : > { %v1122_v27 = vpop.eup %1121 }
 0x41c   : > { %v761_v31 = vsel %vm274_vm0, %v1122_v27, 0.0  ;;  %v774_v36 = vpack.c.bf16 %v1122_v27, %v1122_v27  ;;  %v1124_v15 = vpop.eup %1123 }
 0x41d   : > { %1062 = vmatmul.mubr.msk.bf16.vlgmr.msra.gmra.mrb[8].mxu0 %vm274_vm0, %v639_v28  ;;  %762 = vadd.xlane.f32.xlu1 %v761_v31  ;;  %v1126_v17 = vpop.eup %1125 }
 0x41e   : > { %1072 = vmatpush3.bf16.msra.mxu0 %v781_v29  ;;  %1073 = vmatprep.mubr.msk.bf16.mxu0 %vm1164_vm1, %v1163_v0  ;;  %v1128_v18 = vpop.eup %1127  ;;  %v349_v0 = vmul.f32 %v1124_v15, %v348_v38  ;;  %v487_v44 = vmul.f32 %v1126_v17, %v486_v43 }
 0x41f   : > { %v1130_v37 = vpop.eup %1129  ;;  %v760_v54 = vmul.f32 %v1128_v18, %v759_v52 }
 0x420   : > { %v625_v48 = vmul.f32 %v1130_v37, %v624_v47 }
 0x425   : > { %1074 = vmatmul.mubr.msk.bf16.vlgmr.msra.gmra.mrb[12].mxu0 %vm274_vm0, %v774_v36 }
 0x42b   : > { %359 = vperm.xlu0 %1111, %v1124_v15  }
 0x42e   : > { %497 = vperm.xlu1 %1112, %v1126_v17  }
 0x42f   : > { %770 = vperm.xlu0 %1111, %v1128_v18  }
 0x432   : > { %635 = vperm.xlu1 %1112, %v1130_v37  }
 0x44a   : > { %v352_v39 = vpop.xlane.xlu1 %351 }
 0x44b   : > { %v353_v40 = vadd.f32 %v352_v39, %v349_v0 }
 0x44d   : > { %355 = vst.msk [vmem:[#allocation3] sm:$0xff] %vm265_vm2, %v353_v40 }
 0x454   : > { %v830_v41 = vld [vmem:[#allocation3] sm:$0xff] }
 0x455   : > { %1131 = vrcp.f32 %v830_v41 }
 0x45f   : > { %v1132_v42 = vpop.eup %1131 }
 0x460   : > { %834 = vperm.xlu1 %1112, %v1132_v42  }
 0x49a   : > { %v490_v45 = vpop.xlane.xlu0 %489 }
 0x49b   : > { %v491_v46 = vadd.f32 %v490_v45, %v487_v44 }
 0x49d   : > { %492 = vst.msk [vmem:[#allocation3 + $0x8] sm:$0xff] %vm265_vm2, %v491_v46 }
 0x4a2   : > { %v628_v49 = vpop.xlane.xlu0 %627 }
 0x4a3   : > { %v629_v50 = vadd.f32 %v628_v49, %v625_v48 }
 0x4a4   : > { %v839_v51 = vld [vmem:[#allocation3 + $0x8] sm:$0xff] }
 0x4a5   : > { %630 = vst.msk [vmem:[#allocation3 + $0x10] sm:$0xff] %vm265_vm2, %v629_v50  ;;  %1133 = vrcp.f32 %v839_v51 }
 0x4aa   : > { %v763_v55 = vpop.xlane.xlu1 %762  ;;  %v360_v56 = vpop.permute.xlu0 %359 }
 0x4ab   : > { %v764_v57 = vadd.f32 %v763_v55, %v760_v54  ;;  %v362_v58 = vmul.f32 %v360_v56, %v356_v53 }
 0x4ac   : > { %v848_v59 = vld [vmem:[#allocation3 + $0x10] sm:$0xff] }
 0x4ad   : > { %765 = vst.msk [vmem:[#allocation3 + $0x18] sm:$0xff] %vm265_vm2, %v764_v57  ;;  %v411_v60 = vadd.f32 %v1297_v35, %v362_v58  ;;  %1135 = vrcp.f32 %v848_v59 }
 0x4ae   : > { %v498_v3 = vpop.permute.xlu1 %497  ;;  %v771_v21 = vpop.permute.xlu0 %770 }
 0x4af   : > { %v1134_v61 = vpop.eup %1133  ;;  %412 = vst.msk [vmem:[#allocation4] sm:$0xff] %vm274_vm0, %v411_v60  ;;  %v500_v4 = vmul.f32 %v498_v3, %v494_v2  ;;  %v773_v22 = vmul.f32 %v771_v21, %v767_v20 }
 0x4b0   : > { %843 = vperm.xlu0 %1111, %v1134_v61  }
 0x4b2   : > { %v636_v10 = vpop.permute.xlu1 %635 }
 0x4b3   : > { %v638_v11 = vmul.f32 %v636_v10, %v632_v9 }
 0x4b4   : > { %v857_v62 = vld [vmem:[#allocation3 + $0x18] sm:$0xff] }
 0x4b5   : > { %1137 = vrcp.f32 %v857_v62 }
 0x4b6   : > { %v829_v18 = vld [vmem:[#allocation4] sm:$0xff] }
 0x4b7   : > { %v1136_v63 = vpop.eup %1135 }
 0x4b8   : > { %852 = vperm.xlu1 %1112, %v1136_v63  }
 0x4bf   : > { %v1138_v1 = vpop.eup %1137 }
 0x4c0   : > { %861 = vperm.xlu0 %1111, %v1138_v1  }
 0x4df   : > { %v835_v31 = vpop.permute.xlu1 %834 }
 0x4e0   : > { %v837_v38 = vmul.f32 %v835_v31, %v829_v18 }
 0x4e8   : > { %v547_v5 = vpop.f32.mrb[4].mxu0 }
 0x4e9   : > { %v553_v6 = vadd.f32 %v547_v5, %v500_v4  ;;  %v1051_v7 = vpop.f32.mrb[5].mxu0 }
 0x4ea   : > { %v550_v8 = vpop.f32.mrb[6].mxu0 }
 0x4eb   : > { %554 = vst.msk [vmem:[#allocation4 + $0x8] sm:$0xff] %vm274_vm0, %v553_v6  ;;  %v1052_v35 = vpop.f32.mrb[7].mxu0 }
 0x4f0   : > { %v682_v12 = vpop.f32.mrb[8].mxu0 }
 0x4f1   : > { %v688_v13 = vadd.f32 %v682_v12, %v638_v11  ;;  %v1063_v14 = vpop.f32.mrb[9].mxu0 }
 0x4f2   : > { %v685_v16 = vpop.f32.mrb[10].mxu0  ;;  %v838_v29 = vld [vmem:[#allocation4 + $0x8] sm:$0xff] }
 0x4f3   : > { %689 = vst.msk [vmem:[#allocation4 + $0x10] sm:$0xff] %vm274_vm0, %v688_v13  ;;  %v1064_v19 = vpop.f32.mrb[11].mxu0 }
 0x4f8   : > { %v817_v23 = vpop.f32.mrb[12].mxu0 }
 0x4f9   : > { %v823_v24 = vadd.f32 %v817_v23, %v773_v22  ;;  %v1075_v25 = vpop.f32.mrb[13].mxu0 }
 0x4fa   : > { %v820_v26 = vpop.f32.mrb[14].mxu0  ;;  %v847_v33 = vld [vmem:[#allocation4 + $0x10] sm:$0xff] }
 0x4fb   : > { %824 = vst.msk [vmem:[#allocation4 + $0x18] sm:$0xff] %vm274_vm0, %v823_v24  ;;  %v1076_v27 = vpop.f32.mrb[15].mxu0 }
 0x502   : > { %v856_v15 = vld [vmem:[#allocation4 + $0x18] sm:$0xff] }
 0x52f   : > { %v844_v28 = vpop.permute.xlu0 %843 }
 0x530   : > { %v846_v30 = vmul.f32 %v844_v28, %v838_v29 }
 0x532   : > { %866 = vrot.lane.b32.xlu1 %v846_v30, %s1170_s29 }
 0x537   : > { %v853_v32 = vpop.permute.xlu1 %852 }
 0x538   : > { %v855_v34 = vmul.f32 %v853_v32, %v847_v33 }
 0x53a   : > { %870 = vrot.lane.b32.xlu0 %v855_v34, %s1171_s30 }
 0x53f   : > { %v862_v36 = vpop.permute.xlu0 %861 }
 0x540   : > { %v864_v17 = vmul.f32 %v862_v36, %v856_v15 }
 0x542   : > { %874 = vrot.lane.b32.xlu1 %v864_v17, %s1172_s4 }
 0x5a4   : > { %v867_v37 = vpop.permute.xlu1 %866 }
 0x5a5   : > { %v877_v39 = vsel %vm274_vm0, %v837_v38, %v867_v37 }
 0x5ac   : > { %v871_v0 = vpop.permute.xlu0 %870 }
 0x5ad   : > { %v879_v40 = vsel %vm878_vm4, %v877_v39, %v871_v0 }
 0x5b4   : > { %v875_v41 = vpop.permute.xlu1 %874 }
 0x5b5   : > { %v881_v42 = vsel %vm880_vm5, %v879_v40, %v875_v41 }
 0x5b6   : > { %v882_v43 = vpack.c.bf16 %v881_v42, %v881_v42 }
 0x5b8   : > { %884 = vst.msk [vmem:[%s259_s7] sm:$0xf] %vm883_vm6, %v882_v43 }
 0x5b9 PF: > { %s13_s14 = sadd.s32 1, %s1161_s14   ;;  %s1361_s12 = smov %s1157_s13 }
 0x5ba   : > { %p10_p5 = scmp.ge.s32.totalorder %s13_s14, 4   ;;  %s1362_s13 = smov %s1364_s15 }
 0x5bc   :  { %12 = sbr.rel (!%p10_p5) target bundleno = 2 (0x2), region = 85 }

// kernel: transformer_decoder_layer.11
= control target key start
LH: loop header
LB: loop body
LE: loop exit
PB: predicated region body
PF: predicated region fallthrough
CT: control target
= control target key end

     0   :  { %s891_s24 = smov 0   ;;  %s893_s25 = smov 0   ;;  %s962_s0 = inlined_call_operand.vmem [shape: f32[32,32], index: 0, kind: input, shape index: {}]   ;;  %s963_s1 = inlined_call_operand.vmem [shape: f32[32,32], index: 1, kind: input, shape index: {}]   ;;  %s964_s2 = inlined_call_operand.vmem [shape: bf16[32,32], index: 2, kind: input, shape index: {}]   ;;  %s965_s3 = inlined_call_operand.vmem [shape: f32[1,32], index: 3, kind: input, shape index: {}]   ;;  %s966_s4 = inlined_call_operand.vmem [shape: bf16[32,32], index: 4, kind: input, shape index: {}]   ;;  %s967_s5 = inlined_call_operand.vmem [shape: f32[1,32], index: 5, kind: input, shape index: {}]   ;;  %s968_s6 = inlined_call_operand.vmem [shape: bf16[32,32], index: 6, kind: output, shape index: {0}]   ;;  %s969_s7 = inlined_call_operand.vmem [shape: bf16[32,32], index: 7, kind: output, shape index: {1}]  }
   0x1   :  { %s895_s26 = smov 0  }
   0x2 LB: > { %s30_s27 = sadd.s32 1, %s843_s25  ;;  %p746_p0 = scmp.ge.s32.totalorder %s847_s26, 1  ;;  %s847_s26 = sphi %s895_s26, %s18_s26   ;;  %s843_s25 = sphi %s893_s25, %s971_s25   ;;  %s839_s24 = sphi %s891_s24, %s970_s24  }
   0x3   : > { %p32_p1 = scmp.ge.s32.totalorder %s30_s27, 2  ;;  %p296_p2 = scmp.lt.s32.totalorder %s847_s26, 3 }
   0x5   : > { %s973_s27 = smov (%p32_p1, %s30_s27), 0  ;;  %p297_p3 = pnand %p746_p0, %p296_p2 }
   0x6   : > { %v821_v0 = vld [vmem:[%s966_s4] sm:$0xff] (!%p297_p3)   ;;  %v849_v1 = vmov (!%p297_p3), 0.0   ;;  %v823_v3 = vld [vmem:[%s966_s4 + $0x8] sm:$0xff] (!%p297_p3)   ;;  %vm850_vm0 = vmmov (!%p297_p3), 0   ;;  %s747_s11 = sshll.u32 (!%p297_p3), %s839_s24, 1  ;;  %vm401_vm1 = vcmask (!%p297_p3), 261120  }
   0x7   : > { %300 = sbr.rel (%p297_p3) target bundleno = 252 (0xfc), region = 44  ;;  %787 = vmatprep.subr.bf16.mxu1 (!%p297_p3), %v849_v1  ;;  %779 = vmatprep.subr.bf16.mxu0 (!%p297_p3), %v849_v1  ;;  %v822_v2 = vld [vmem:[%s964_s2] sm:$0xff] (!%p297_p3)   ;;  %v824_v4 = vld [vmem:[%s964_s2 + $0x8] sm:$0xff] (!%p297_p3)   ;;  %p355_p4 = scmp.lt.s32.totalorder (!%p297_p3), %s747_s11, 3  ;;  %402 = vst.msk [vmem:[#allocation2] sm:$0xff] (!%p297_p3), %vm401_vm1, %v849_v1  ;;  %403 = vst.msk [vmem:[#allocation2 + $0x8] sm:$0xff] (!%p297_p3), %vm401_vm1, %v849_v1 }
   0x8   : > { %788 = vmatpush3.bf16.msra.mxu1 (!%p297_p3), %v821_v0  ;;  %791 = vmatprep.mubr.msk.bf16.mxu1 (!%p297_p3), %vm850_vm0, %v849_v1  ;;  %404 = vst.msk [vmem:[#allocation3] sm:$0xff] (!%p297_p3), %vm401_vm1, %v849_v1  ;;  %405 = vst.msk [vmem:[#allocation3 + $0x8] sm:$0xff] (!%p297_p3), %vm401_vm1, %v849_v1  ;;  %v764_v29 = vld [vmem:[%s967_s5] ss:$0 sm:$0xff] (!%p297_p3)  ;;  %vm569_vm2 = vcmask (!%p297_p3), 257024  }
   0x9   : > { %780 = vmatpush3.bf16.msra.mxu0 (!%p297_p3), %v822_v2  ;;  %789 = vmatprep.subr.bf16.mxu1 (!%p297_p3), %v849_v1  ;;  %v761_v32 = vld [vmem:[%s965_s3] ss:$0 sm:$0xff] (!%p297_p3) }
   0xa   : > { %781 = vmatprep.subr.bf16.mxu0 (!%p297_p3), %v849_v1  ;;  %783 = vmatprep.mubr.msk.bf16.mxu0 (!%p297_p3), %vm850_vm0, %v849_v1 }
   0xc   : > { %790 = vmatpush3.bf16.msra.mxu1 (!%p297_p3), %v823_v3 }
   0xd   : > { %782 = vmatpush3.bf16.msra.mxu0 (!%p297_p3), %v824_v4 }
   0xe   : > { %s975_s11 = smov (!%p355_p4, %s747_s11), 3  ;;  %v410_v18 = vld [vmem:[#allocation2] sm:$0xff]  ;;  %v411_v23 = vld [vmem:[#allocation2 + $0x8] sm:$0xff] }
   0xf   : > { %s748_s14 = sshll.u32 %s975_s11, 3  ;;  %v480_v13 = vld [vmem:[#allocation3] sm:$0xff]  ;;  %v481_v15 = vld [vmem:[#allocation3 + $0x8] sm:$0xff]  ;;  %s752_s23 = sshll.u32 %s975_s11, 2 }
  0x10   : > { %s361_s17 = scalar_lea.vmem %s962_s0, %s748_s14  ;;  %s370_s20 = scalar_lea.vmem %s963_s1, %s748_s14 }
  0x11   : > { %v406_v5 = vld [vmem:[%s361_s17] sm:$0xff]  ;;  %v407_v6 = vld [vmem:[%s361_s17 + $0x8] sm:$0xff]  ;;  %s394_s8 = scalar_lea.vmem %s969_s7, %s752_s23  ;;  %s388_s11 = scalar_lea.vmem %s968_s6, %s752_s23 }
  0x12   : > { %v482_v7 = vpack.c.bf16 %v407_v6, %v406_v5  ;;  %v408_v8 = vld [vmem:[%s370_s20] sm:$0xff]  ;;  %v409_v9 = vld [vmem:[%s370_s20 + $0x8] sm:$0xff] }
  0x13   : > { %v412_v10 = vadd.f32 %v408_v8, %v406_v5  ;;  %v413_v11 = vadd.f32 %v409_v9, %v407_v6 }
  0x14   : > { %792 = vmatmul.mubr.msk.bf16.vlgmr.msra.gmra.mrb[0].mxu1 %vm401_vm1, %v482_v7 }
  0x15   : > { %v414_v12 = vpack.c.bf16 %v413_v11, %v412_v10 }
  0x17   : > { %784 = vmatmul.mubr.msk.bf16.vlgmr.msra.gmra.mrb[0].mxu0 %vm401_vm1, %v414_v12 }
  0xe7   : > { %v536_v14 = vpop.f32.mrb[0].mxu1 }
  0xe8   : > { %v543_v16 = vadd.f32 %v536_v14, %v480_v13  ;;  %v793_v17 = vpop.f32.mrb[1].mxu1 }
  0xe9   : > { %v539_v19 = vpop.f32.mrb[2].mxu1 }
  0xea   : > { %545 = vst.msk [vmem:[#allocation3] sm:$0xff] %vm401_vm1, %v543_v16  ;;  %v469_v20 = vpop.f32.mrb[0].mxu0  ;;  %v544_v21 = vadd.f32 %v539_v19, %v481_v15  ;;  %v794_v22 = vpop.f32.mrb[3].mxu1 }
  0xeb   : > { %v476_v24 = vadd.f32 %v469_v20, %v410_v18  ;;  %v785_v25 = vpop.f32.mrb[1].mxu0 }
  0xec   : > { %546 = vst.msk [vmem:[#allocation3 + $0x8] sm:$0xff] %vm401_vm1, %v544_v21  ;;  %v472_v26 = vpop.f32.mrb[2].mxu0 }
  0xed   : > { %478 = vst.msk [vmem:[#allocation2] sm:$0xff] %vm401_vm1, %v476_v24  ;;  %v477_v27 = vadd.f32 %v472_v26, %v411_v23  ;;  %v786_v28 = vpop.f32.mrb[3].mxu0 }
  0xef   : > { %479 = vst.msk [vmem:[#allocation2 + $0x8] sm:$0xff] %vm401_vm1, %v477_v27 }
  0xf1   : > { %v572_v30 = vld [vmem:[#allocation3] sm:$0xff] }
  0xf2   : > { %v581_v31 = vadd.f32 %v764_v29, %v572_v30 }
  0xf3   : > { %v573_v33 = vld [vmem:[#allocation3 + $0x8] sm:$0xff] }
  0xf4   : > { %v771_v34 = vpack.c.bf16 %v581_v31, %v581_v31  ;;  %v550_v35 = vld [vmem:[#allocation2] sm:$0xff]  ;;  %v582_v36 = vadd.f32 %v764_v29, %v573_v33 }
  0xf5   : > { %v559_v37 = vadd.f32 %v761_v32, %v550_v35 }
  0xf6   : > { %591 = vst.msk [vmem:[%s394_s8] sm:$0xf] %vm569_vm2, %v771_v34  ;;  %v772_v38 = vpack.c.bf16 %v582_v36, %v582_v36  ;;  %v551_v39 = vld [vmem:[#allocation2 + $0x8] sm:$0xff] }
  0xf7   : > { %v769_v40 = vpack.c.bf16 %v559_v37, %v559_v37  ;;  %v560_v41 = vadd.f32 %v761_v32, %v551_v39 }
  0xf8   : > { %592 = vst.msk [vmem:[%s394_s8 + $0x4] sm:$0xf] %vm569_vm2, %v772_v38 }
  0xf9   : > { %570 = vst.msk [vmem:[%s388_s11] sm:$0xf] %vm569_vm2, %v769_v40  ;;  %v770_v42 = vpack.c.bf16 %v560_v41, %v560_v41 }
  0xfb   : > { %571 = vst.msk [vmem:[%s388_s11 + $0x4] sm:$0xf] %vm569_vm2, %v770_v42 }
  0xfc PF: > { %s18_s26 = sadd.s32 1, %s847_s26   ;;  %s970_s24 = smov %s843_s25 }
  0xfd   : > { %p15_p5 = scmp.ge.s32.totalorder %s18_s26, 4   ;;  %s971_s25 = smov %s973_s27 }
  0xff   :  { %17 = sbr.rel (!%p15_p5) target bundleno = 2 (0x2), region = 103 }

// kernel: transformer_decoder_layer.15
= control target key start
LH: loop header
LB: loop body
LE: loop exit
PB: predicated region body
PF: predicated region fallthrough
CT: control target
= control target key end

     0   :  { %s797_s24 = smov 0   ;;  %s799_s25 = smov 0   ;;  %s873_s0 = inlined_call_operand.vmem [shape: f32[16,32], index: 0, kind: input, shape index: {}]   ;;  %s874_s1 = inlined_call_operand.vmem [shape: bf16[32,64], index: 1, kind: input, shape index: {}]   ;;  %s875_s2 = inlined_call_operand.vmem [shape: f32[1,64], index: 2, kind: input, shape index: {}]   ;;  %s876_s3 = inlined_call_operand.vmem [shape: bf16[64,32], index: 3, kind: input, shape index: {}]   ;;  %s877_s4 = inlined_call_operand.vmem [shape: f32[1,32], index: 4, kind: input, shape index: {}]   ;;  %s878_s5 = inlined_call_operand.vmem [shape: f32[1,32], index: 5, kind: input, shape index: {}]   ;;  %s879_s6 = inlined_call_operand.vmem [shape: f32[1,32], index: 6, kind: input, shape index: {}]   ;;  %s880_s7 = inlined_call_operand.vmem [shape: f32[16,32], index: 7, kind: output, shape index: {}]  }
   0x1   :  { %s801_s26 = smov 0  }
   0x2 LB: > { %s29_s27 = sadd.s32 1, %s749_s25  ;;  %p652_p0 = scmp.ge.s32.totalorder %s753_s26, 1  ;;  %s753_s26 = sphi %s801_s26, %s17_s26   ;;  %s749_s25 = sphi %s799_s25, %s882_s25   ;;  %s745_s24 = sphi %s797_s24, %s881_s24  }
   0x3   : > { %p31_p1 = scmp.ge.s32.totalorder %s29_s27, 2  ;;  %p276_p2 = scmp.lt.s32.totalorder %s753_s26, 3 }
   0x5   : > { %s884_s27 = smov (%p31_p1, %s29_s27), 0  ;;  %p277_p3 = pnand %p652_p0, %p276_p2 }
   0x6   : > { %v723_v0 = vld [vmem:[%s874_s1] sm:$0xff] (!%p277_p3)   ;;  %v755_v1 = vmov (!%p277_p3), 0.0   ;;  %v724_v2 = vld [vmem:[%s874_s1 + $0x8] sm:$0xff] (!%p277_p3)   ;;  %vm756_vm0 = vmmov (!%p277_p3), 0   ;;  %p318_p4 = scmp.lt.s32.totalorder (!%p277_p3), %s745_s24, 1  ;;  %vm344_vm1 = vcmask (!%p277_p3), 261120  }
   0x7   : > { %280 = sbr.rel (%p277_p3) target bundleno = 778 (0x30a), region = 48  ;;  %677 = vmatprep.subr.bf16.mxu0 (!%p277_p3), %v755_v1  ;;  %685 = vmatprep.subr.bf16.mxu1 (!%p277_p3), %v755_v1  ;;  %345 = vst.msk [vmem:[#allocation2] sm:$0xff] (!%p277_p3), %vm344_vm1, %v755_v1  ;;  %v725_v3 = vld [vmem:[%s876_s3] sm:$0xff] (!%p277_p3)   ;;  %v726_v4 = vld [vmem:[%s876_s3 + $0x8] sm:$0xff] (!%p277_p3)   ;;  %v727_v7 = vld [vmem:[%s876_s3 + $0x10] sm:$0xff] (!%p277_p3)   ;;  %vm450_vm2 = vcmask (!%p277_p3), 523264  }
   0x8   : > { %678 = vmatpush3.bf16.msra.mxu0 (!%p277_p3), %v723_v0  ;;  %681 = vmatprep.mubr.msk.bf16.mxu0 (!%p277_p3), %vm756_vm0, %v755_v1  ;;  %v728_v8 = vld [vmem:[%s876_s3 + $0x18] sm:$0xff] (!%p277_p3)   ;;  %v655_v9 = vld [vmem:[%s875_s2] ss:$0 sm:$0xff] (!%p277_p3) }
   0x9   : > { %679 = vmatprep.subr.bf16.mxu0 (!%p277_p3), %v755_v1  ;;  %693 = vmatprep.mubr.msk.bf16.mxu1 (!%p277_p3), %vm756_vm0, %v755_v1  ;;  %v664_v23 = vld [vmem:[%s877_s4] ss:$0 sm:$0xff] (!%p277_p3) }
   0xa   : > { %686 = vmatpush3.bf16.msra.mxu1 (!%p277_p3), %v725_v3  ;;  %v665_v37 = vld [vmem:[%s878_s5] ss:$0 sm:$0xff] (!%p277_p3) }
   0xb   : > { %687 = vmatprep.subr.bf16.mxu1 (!%p277_p3), %v755_v1  ;;  %v666_v39 = vld [vmem:[%s879_s6] ss:$0 sm:$0xff] (!%p277_p3) }
   0xc   : > { %680 = vmatpush3.bf16.msra.mxu0 (!%p277_p3), %v724_v2 }
   0xe   : > { %s886_s24 = smov (!%p318_p4, %s745_s24), 1  ;;  %688 = vmatpush3.bf16.msra.mxu1 %v726_v4  ;;  %v416_v17 = vld [vmem:[#allocation2] sm:$0xff] }
   0xf   : > { %s653_s13 = sshll.u32 %s886_s24, 3  ;;  %689 = vmatprep.subr.bf16.mxu1 %v755_v1 }
  0x10   : > { %s321_s16 = scalar_lea.vmem %s873_s0, %s653_s13  ;;  %s338_s12 = scalar_lea.vmem %s880_s7, %s653_s13 }
  0x11   : > { %v346_v5 = vld [vmem:[%s321_s16] sm:$0xff] }
  0x12   : > { %v347_v6 = vpack.c.bf16 %v346_v5, %v346_v5  ;;  %690 = vmatpush3.bf16.msra.mxu1 %v727_v7 }
  0x13   : > { %691 = vmatprep.subr.bf16.mxu1 %v755_v1 }
  0x14   : > { %682 = vmatmul.mubr.msk.bf16.vlgmr.msra.gmra.mrb[0].mxu0 %vm344_vm1, %v347_v6 }
  0x16   : > { %692 = vmatpush3.bf16.msra.mxu1 %v728_v8 }
  0xe7   : > { %v409_v10 = vpop.f32.mrb[0].mxu0 }
  0xe8   : > { %v410_v11 = vadd.f32 %v655_v9, %v409_v10  ;;  %v683_v12 = vpop.f32.mrb[1].mxu0 }
  0xe9   : > { %v412_v13 = vpop.f32.mrb[2].mxu0 }
  0xea   : > { %v415_v14 = vmax.f32 %v410_v11, 0.0  ;;  %v684_v15 = vpop.f32.mrb[3].mxu0 }
  0xec   : > { %v417_v16 = vpack.c.bf16 %v415_v14, %v415_v14 }
  0xee   : > { %694 = vmatmul.mubr.msk.bf16.vlgmr.msra.gmra.mrb[0].mxu1 %vm450_vm2, %v417_v16 }
 0x1c1   : > { %v488_v18 = vpop.f32.mrb[0].mxu1 }
 0x1c2   : > { %v494_v19 = vadd.f32 %v488_v18, %v416_v17  ;;  %v695_v20 = vpop.f32.mrb[1].mxu1 }
 0x1c3   : > { %v491_v21 = vpop.f32.mrb[2].mxu1 }
 0x1c4   : > { %495 = vst.msk [vmem:[#allocation2] sm:$0xff] %vm344_vm1, %v494_v19  ;;  %v696_v22 = vpop.f32.mrb[3].mxu1 }
 0x1cb   : > { %v499_v24 = vld [vmem:[#allocation2] sm:$0xff] }
 0x1cc   : > { %v507_v25 = vadd.f32 %v664_v23, %v499_v24 }
 0x1ce   : > { %v509_v26 = vadd.f32 %v507_v25, %v346_v5 }
 0x1d0   : > { %v512_v27 = vsel %vm344_vm1, %v509_v26, 0.0 }
 0x1d1   : > { %513 = vadd.xlane.f32.xlu0 %v512_v27 }
 0x25e   : > { %v514_v28 = vpop.xlane.xlu0 %513 }
 0x25f   : > { %v516_v29 = vmul.f32 0.03125, %v514_v28 }
 0x261   : > { %v517_v30 = vsub.f32 %v509_v26, %v516_v29 }
 0x263   : > { %v518_v31 = vmul.f32 %v517_v30, %v517_v30 }
 0x265   : > { %v519_v32 = vsel %vm344_vm1, %v518_v31, 0.0 }
 0x266   : > { %520 = vadd.xlane.f32.xlu0 %v519_v32 }
 0x2f3   : > { %v521_v33 = vpop.xlane.xlu0 %520 }
 0x2f4   : > { %v522_v34 = vmul.f32 0.03125, %v521_v33 }
 0x2f6   : > { %v523_v35 = vadd.f32 1e-05, %v522_v34 }
 0x2f8   : > { %729 = vrsqrt.f32 %v523_v35 }
 0x302   : > { %v730_v36 = vpop.eup %729 }
 0x303   : > { %v525_v38 = vmul.f32 %v730_v36, %v517_v30 }
 0x305   : > { %v532_v40 = vmul.f32 %v665_v37, %v525_v38 }
 0x307   : > { %v539_v41 = vadd.f32 %v666_v39, %v532_v40 }
 0x309   : > { %540 = vst.msk [vmem:[%s338_s12] sm:$0xff] %vm344_vm1, %v539_v41 }
 0x30a PF: > { %s17_s26 = sadd.s32 1, %s753_s26   ;;  %s881_s24 = smov %s749_s25 }
 0x30b   : > { %p14_p5 = scmp.ge.s32.totalorder %s17_s26, 4   ;;  %s882_s25 = smov %s884_s27 }
 0x30d   :  { %16 = sbr.rel (!%p14_p5) target bundleno = 2 (0x2), region = 95 }

// kernel: transformer_decoder_layer.13
= control target key start
LH: loop header
LB: loop body
LE: loop exit
PB: predicated region body
PF: predicated region fallthrough
CT: control target
= control target key end

     0   :  { %s1216_s12 = smov 0   ;;  %s1218_s13 = smov 0   ;;  %s1380_s0 = inlined_call_operand.vmem [shape: bf16[2,8,32], index: 0, kind: input, shape index: {}]   ;;  %s1381_s1 = inlined_call_operand.vmem [shape: bf16[2,16,32], index: 1, kind: input, shape index: {}]   ;;  %s1382_s2 = inlined_call_operand.vmem [shape: bf16[2,16,32], index: 2, kind: input, shape index: {}]   ;;  %s1383_s3 = inlined_call_operand.vmem [shape: bf16[2,8,32], index: 3, kind: output, shape index: {}]  }
   0x1   :  { %s1220_s14 = smov 0  }
   0x2 LB: > { %s32_s15 = sadd.s32 1, %s1180_s13  ;;  %p1015_p0 = scmp.ge.s32.totalorder %s1184_s14, 1  ;;  %s1184_s14 = sphi %s1220_s14, %s13_s14   ;;  %s1180_s13 = sphi %s1218_s13, %s1385_s13   ;;  %s1176_s12 = sphi %s1216_s12, %s1384_s12  }
   0x3   : > { %p34_p1 = scmp.ge.s32.totalorder %s32_s15, 2  ;;  %p196_p2 = scmp.lt.s32.totalorder %s1184_s14, 3 }
   0x5   : > { %s1387_s15 = smov (%p34_p1, %s32_s15), 0  ;;  %p197_p3 = pnand %p1015_p0, %p196_p2 }
   0x6   : > { %p242_p4 = scmp.lt.s32.totalorder (!%p197_p3), %s1176_s12, 1  ;;  %vm290_vm0 = vcmask (!%p197_p3), 64512   ;;  %v1186_v0 = vmov (!%p197_p3), 0.0   ;;  %vm1187_vm1 = vmmov (!%p197_p3), 0   ;;  %vm281_vm2 = vcmask (!%p197_p3), 7168   ;;  %s1190_s24 = smov (!%p197_p3), 120  }
   0x7   : > { %200 = sbr.rel (%p197_p3) target bundleno = 1465 (0x5b9), region = 32  ;;  %1052 = vmatprep.subr.bf16.mxu0 (!%p197_p3), %v1186_v0  ;;  %291 = vst.msk [vmem:[#allocation4] sm:$0xff] (!%p197_p3), %vm290_vm0, %v1186_v0  ;;  %292 = vst.msk [vmem:[#allocation4 + $0x8] sm:$0xff] (!%p197_p3), %vm290_vm0, %v1186_v0  ;;  %1054 = vmatprep.mubr.msk.bf16.mxu0 (!%p197_p3), %vm1187_vm1, %v1186_v0  ;;  %v1188_v7 = vmov (!%p197_p3), -inf   ;;  %vm356_vm3 = vcmask (!%p197_p3), 130048   ;;  %v1189_v13 = vmov (!%p197_p3), 0  }
   0x8   : > { %293 = vst.msk [vmem:[#allocation4 + $0x10] sm:$0xff] (!%p197_p3), %vm290_vm0, %v1186_v0  ;;  %294 = vst.msk [vmem:[#allocation4 + $0x18] sm:$0xff] (!%p197_p3), %vm290_vm0, %v1186_v0  ;;  %1058 = vmatprep.subr.bf16.mxu1 (!%p197_p3), %v1186_v0  ;;  %1060 = vmatprep.mubr.msk.bf16.mxu1 (!%p197_p3), %vm1187_vm1, %v1186_v0  ;;  %s1191_s25 = smov (!%p197_p3), 112   ;;  %s1192_s26 = smov (!%p197_p3), 104   ;;  %vm893_vm4 = vcmask (!%p197_p3), 195584   ;;  %vm896_vm5 = vcmask (!%p197_p3), 257024  }
   0x9   : > { %282 = vst.msk [vmem:[#allocation2] sm:$0xff] (!%p197_p3), %vm281_vm2, %v1188_v7  ;;  %283 = vst.msk [vmem:[#allocation2 + $0x8] sm:$0xff] (!%p197_p3), %vm281_vm2, %v1188_v7  ;;  %1134 = vset.pattern.permute.xlu0 (!%p197_p3), %v1189_v13  ;;  %1135 = vset.pattern.permute.xlu1 (!%p197_p3), %v1189_v13  ;;  %s1193_s30 = smov (!%p197_p3), 8   ;;  %s1194_s4 = smov (!%p197_p3), 16  }
   0xa   : > { %284 = vst.msk [vmem:[#allocation2 + $0x10] sm:$0xff] (!%p197_p3), %vm281_vm2, %v1188_v7  ;;  %285 = vst.msk [vmem:[#allocation2 + $0x18] sm:$0xff] (!%p197_p3), %vm281_vm2, %v1188_v7  ;;  %s1195_s5 = smov (!%p197_p3), 24  }
   0xb   : > { %286 = vst.msk [vmem:[#allocation3] sm:$0xff] (!%p197_p3), %vm281_vm2, %v1186_v0  ;;  %287 = vst.msk [vmem:[#allocation3 + $0x8] sm:$0xff] (!%p197_p3), %vm281_vm2, %v1186_v0 }
   0xc   : > { %288 = vst.msk [vmem:[#allocation3 + $0x10] sm:$0xff] (!%p197_p3), %vm281_vm2, %v1186_v0  ;;  %289 = vst.msk [vmem:[#allocation3 + $0x18] sm:$0xff] (!%p197_p3), %vm281_vm2, %v1186_v0 }
   0xe   : > { %s1389_s12 = smov (!%p242_p4, %s1176_s12), 1 }
   0xf   : > { %s1034_s16 = sshll.u32 %s1389_s12, 3  ;;  %s1016_s17 = sshll.u32 %s1389_s12, 2 }
  0x10   : > { %s257_s20 = scalar_lea.vmem %s1381_s1, %s1034_s16  ;;  %s248_s23 = scalar_lea.vmem %s1380_s0, %s1016_s17  ;;  %v1286_v14 = vld [vmem:[#allocation2] sm:$0xff]  ;;  %v492_v52 = vld [vmem:[#allocation2 + $0x8] sm:$0xff] }
  0x11   : > { %v1136_v1 = vld [vmem:[%s257_s20] sm:$0xff]   ;;  %s267_s29 = scalar_lea.vmem %s1382_s2, %s1034_s16  ;;  %v625_v56 = vld [vmem:[#allocation2 + $0x10] sm:$0xff]  ;;  %v758_v60 = vld [vmem:[#allocation2 + $0x18] sm:$0xff]  ;;  %s275_s8 = scalar_lea.vmem %s1383_s3, %s1016_s17 }
  0x12   : > { %v295_v2 = vld [vmem:[%s248_s23] sm:$0xf]  ;;  %v313_v3 = vsel %vm290_vm0, %v1136_v1, 0  ;;  %443 = vrot.lane.b32.xlu1 %v1136_v1, %s1190_s24 }
  0x13   : > { %v296_v4 = vunpack.c.l.bf16 %v295_v2  ;;  %1053 = vmatpush3.bf16.xpose.msra.mxu0 %v313_v3  ;;  %v1301_v18 = vld [vmem:[%s267_s29] sm:$0xff]  }
  0x14   : > { %1070 = vmatprep.subr.bf16.mxu0 %v1186_v0  ;;  %1059 = vmatpush3.bf16.msra.mxu1 %v1301_v18 }
  0x15   : > { %v297_v5 = vmul.f32 0.35355338, %v296_v4  ;;  %1064 = vmatprep.subr.bf16.mxu1 %v1186_v0 }
  0x17   : > { %v298_v6 = vpack.c.bf16 %v297_v5, %v297_v5 }
  0x19   : > { %441 = vrot.lane.b32.xlu1 %v298_v6, %s1190_s24 }
  0x1a   : > { %1055 = vmatmul.mubr.msk.bf16.vlgmr.msra.gmra.mrb[0].mxu0 %vm290_vm0, %v298_v6 }
  0x1b   : > { %1072 = vmatprep.mubr.msk.bf16.mxu0 %vm1187_vm1, %v1186_v0 }
  0x1d   : > { %576 = vrot.lane.b32.xlu1 %v1136_v1, %s1191_s25 }
  0x21   : > { %574 = vrot.lane.b32.xlu1 %v298_v6, %s1191_s25 }
  0x25   : > { %709 = vrot.lane.b32.xlu1 %v1136_v1, %s1192_s26 }
  0x29   : > { %707 = vrot.lane.b32.xlu1 %v298_v6, %s1192_s26 }
  0x84   : > { %v444_v22 = vpop.permute.xlu1 %443 }
  0x85   : > { %v449_v25 = vsel %vm290_vm0, %v444_v22, 0 }
  0x8b   : > { %v442_v23 = vpop.permute.xlu1 %441 }
  0x8f   : > { %v577_v27 = vpop.permute.xlu1 %576 }
  0x90   : > { %v582_v29 = vsel %vm290_vm0, %v577_v27, 0 }
  0x93   : > { %v575_v28 = vpop.permute.xlu1 %574 }
  0x97   : > { %v710_v30 = vpop.permute.xlu1 %709 }
  0x98   : > { %v715_v31 = vsel %vm290_vm0, %v710_v30, 0 }
  0x9b   : > { %v708_v32 = vpop.permute.xlu1 %707 }
  0xed   : > { %v349_v8 = vpop.f32.mrb[0].mxu0 }
  0xee   : > { %v1056_v9 = vpop.f32.mrb[1].mxu0  ;;  %v357_v10 = vsel %vm356_vm3, %v349_v8, -inf }
  0xef   : > { %358 = vmax.xlane.f32.xlu0 %v357_v10  ;;  %v352_v11 = vpop.f32.mrb[2].mxu0 }
  0xf0   : > { %v1057_v12 = vpop.f32.mrb[3].mxu0 }
 0x17c   : > { %v359_v15 = vpop.xlane.xlu0 %358 }
 0x17d   : > { %v1289_v16 = vmax.f32 %v1286_v14, %v359_v15 }
 0x17f   : > { %v361_v17 = vsub.f32 %v1286_v14, %v1289_v16  ;;  %439 = vst.msk [vmem:[#allocation2] sm:$0xff] %vm281_vm2, %v1289_v16  ;;  %366 = vperm.xlu0 %1134, %v1289_v16  }
 0x1fe   : > { %v367_v19 = vpop.permute.xlu0 %366 }
 0x1ff   : > { %v369_v20 = vsub.f32 %v349_v8, %v367_v19 }
 0x201   : > { %v370_v21 = vmul.f32 1.442695, %v369_v20 }
 0x203   : > { %1138 = vpow2.f32 %v370_v21 }
 0x20d   : > { %v1305_v24 = vpop.eup %1138 }
 0x20e   : > { %v387_v26 = vpack.c.bf16 %v1305_v24, %v1305_v24  ;;  %v374_v1 = vsel %vm356_vm3, %v1305_v24, 0.0  ;;  %v362_v24 = vmul.f32 1.442695, %v361_v17 }
 0x210   : > { %1061 = vmatmul.mubr.msk.bf16.vlgmr.msra.gmra.mrb[0].mxu1 %vm356_vm3, %v387_v26 }
 0x211   : > { %1065 = vmatpush3.bf16.xpose.msra.mxu1 %v449_v25  ;;  %1066 = vmatprep.mubr.msk.bf16.mxu1 %vm1187_vm1, %v1186_v0 }
 0x212   : > { %1076 = vmatprep.subr.bf16.mxu1 %v1186_v0 }
 0x218   : > { %1067 = vmatmul.mubr.msk.bf16.vlgmr.msra.gmra.mrb[4].mxu1 %vm290_vm0, %v442_v23 }
 0x219   : > { %1077 = vmatpush3.bf16.xpose.msra.mxu1 %v582_v29  ;;  %1078 = vmatprep.mubr.msk.bf16.mxu1 %vm1187_vm1, %v1186_v0 }
 0x21a   : > { %1088 = vmatprep.subr.bf16.mxu1 %v1186_v0 }
 0x220   : > { %1079 = vmatmul.mubr.msk.bf16.vlgmr.msra.gmra.mrb[8].mxu1 %vm290_vm0, %v575_v28 }
 0x221   : > { %1089 = vmatpush3.bf16.xpose.msra.mxu1 %v715_v31  ;;  %1090 = vmatprep.mubr.msk.bf16.mxu1 %vm1187_vm1, %v1186_v0  ;;  %v372_v31 = vld [vmem:[#allocation3] sm:$0xff] }
 0x228   : > { %1091 = vmatmul.mubr.msk.bf16.vlgmr.msra.gmra.mrb[12].mxu1 %vm290_vm0, %v708_v32 }
 0x2e3   : > { %v1324_v33 = vpop.f32.mrb[0].mxu1 }
 0x2e4   : > { %v1062_v34 = vpop.f32.mrb[1].mxu1 }
 0x2e5   : > { %v434_v35 = vpop.f32.mrb[2].mxu1 }
 0x2e6   : > { %v1063_v36 = vpop.f32.mrb[3].mxu1 }
 0x2eb   : > { %v485_v37 = vpop.f32.mrb[4].mxu1 }
 0x2ec   : > { %v1068_v38 = vpop.f32.mrb[5].mxu1  ;;  %v493_v39 = vsel %vm356_vm3, %v485_v37, -inf }
 0x2ed   : > { %494 = vmax.xlane.f32.xlu1 %v493_v39  ;;  %v488_v40 = vpop.f32.mrb[6].mxu1 }
 0x2ee   : > { %v1069_v41 = vpop.f32.mrb[7].mxu1 }
 0x2ef   : > { %v642_v41 = vld [vmem:[#allocation3 + $0x10] sm:$0xff] }
 0x2f3   : > { %v618_v42 = vpop.f32.mrb[8].mxu1 }
 0x2f4   : > { %v1080_v43 = vpop.f32.mrb[9].mxu1  ;;  %v626_v44 = vsel %vm356_vm3, %v618_v42, -inf }
 0x2f5   : > { %627 = vmax.xlane.f32.xlu0 %v626_v44  ;;  %v621_v45 = vpop.f32.mrb[10].mxu1 }
 0x2f6   : > { %v1081_v46 = vpop.f32.mrb[11].mxu1 }
 0x2f7   : > { %v775_v46 = vld [vmem:[#allocation3 + $0x18] sm:$0xff] }
 0x2fb   : > { %v751_v47 = vpop.f32.mrb[12].mxu1 }
 0x2fc   : > { %v1092_v48 = vpop.f32.mrb[13].mxu1  ;;  %v759_v49 = vsel %vm356_vm3, %v751_v47, -inf }
 0x2fd   : > { %760 = vmax.xlane.f32.xlu1 %v759_v49  ;;  %v754_v50 = vpop.f32.mrb[14].mxu1 }
 0x2fe   : > { %v1093_v51 = vpop.f32.mrb[15].mxu1 }
 0x37a   : > { %v495_v53 = vpop.xlane.xlu1 %494 }
 0x37b   : > { %v496_v54 = vmax.f32 %v492_v52, %v495_v53 }
 0x37d   : > { %v497_v55 = vsub.f32 %v492_v52, %v496_v54  ;;  %573 = vst.msk [vmem:[#allocation2 + $0x8] sm:$0xff] %vm281_vm2, %v496_v54  ;;  %502 = vperm.xlu1 %1135, %v496_v54  }
 0x37f   : > { %v498_v26 = vmul.f32 1.442695, %v497_v55 }
 0x382   : > { %v628_v57 = vpop.xlane.xlu0 %627 }
 0x383   : > { %v629_v58 = vmax.f32 %v625_v56, %v628_v57 }
 0x385   : > { %v630_v59 = vsub.f32 %v625_v56, %v629_v58  ;;  %706 = vst.msk [vmem:[#allocation2 + $0x10] sm:$0xff] %vm281_vm2, %v629_v58  ;;  %635 = vperm.xlu0 %1134, %v629_v58  }
 0x387   : > { %v631_v29 = vmul.f32 1.442695, %v630_v59  ;;  %v517_v59 = vld [vmem:[#allocation4 + $0x8] sm:$0xff] }
 0x38a   : > { %v761_v61 = vpop.xlane.xlu1 %760 }
 0x38b   : > { %v762_v62 = vmax.f32 %v758_v60, %v761_v61 }
 0x38d   : > { %v763_v63 = vsub.f32 %v758_v60, %v762_v62  ;;  %839 = vst.msk [vmem:[#allocation2 + $0x18] sm:$0xff] %vm281_vm2, %v762_v62  ;;  %768 = vperm.xlu1 %1135, %v762_v62  }
 0x38f   : > { %v764_v27 = vmul.f32 1.442695, %v763_v63 }
 0x391   : > { %525 = vrot.lane.b32.xlu1 %v1301_v18, %s1190_s24 }
 0x395   : > { %658 = vrot.lane.b32.xlu1 %v1301_v18, %s1191_s25 }
 0x399   : > { %791 = vrot.lane.b32.xlu1 %v1301_v18, %s1192_s26 }
 0x3bd   : > { %375 = vadd.xlane.f32.xlu1 %v374_v1 }
 0x3fc   : > { %v503_v2 = vpop.permute.xlu1 %502 }
 0x3fd   : > { %v505_v3 = vsub.f32 %v485_v37, %v503_v2  ;;  %v509_v37 = vld [vmem:[#allocation3 + $0x8] sm:$0xff] }
 0x3ff   : > { %v506_v4 = vmul.f32 1.442695, %v505_v3  ;;  %v650_v3 = vld [vmem:[#allocation4 + $0x10] sm:$0xff] }
 0x401   : > { %1140 = vpow2.f32 %v506_v4 }
 0x404   : > { %v636_v5 = vpop.permute.xlu0 %635 }
 0x405   : > { %v638_v6 = vsub.f32 %v618_v42, %v636_v5 }
 0x407   : > { %v639_v7 = vmul.f32 1.442695, %v638_v6 }
 0x409   : > { %1142 = vpow2.f32 %v639_v7 }
 0x40b   : > { %v1141_v8 = vpop.eup %1140 }
 0x40c   : > { %v769_v9 = vpop.permute.xlu1 %768  ;;  %v511_v10 = vsel %vm356_vm3, %v1141_v8, 0.0  ;;  %v524_v15 = vpack.c.bf16 %v1141_v8, %v1141_v8 }
 0x40d   : > { %v771_v11 = vsub.f32 %v751_v47, %v769_v9  ;;  %512 = vadd.xlane.f32.xlu0 %v511_v10  ;;  %v380_v47 = vld [vmem:[#allocation4] sm:$0xff] }
 0x40f   : > { %v772_v12 = vmul.f32 1.442695, %v771_v11  ;;  %v783_v11 = vld [vmem:[#allocation4 + $0x18] sm:$0xff] }
 0x410   : > { %v526_v13 = vpop.permute.xlu1 %525 }
 0x411   : > { %1144 = vpow2.f32 %v772_v12  ;;  %1071 = vmatpush3.bf16.msra.mxu0 %v526_v13 }
 0x412   : > { %1082 = vmatprep.subr.bf16.mxu0 %v1186_v0  ;;  %1146 = vpow2.f32 %v362_v24 }
 0x413   : > { %v1143_v18 = vpop.eup %1142  ;;  %1148 = vpow2.f32 %v498_v26 }
 0x414   : > { %1073 = vmatmul.mubr.msk.bf16.vlgmr.msra.gmra.mrb[4].mxu0 %vm356_vm3, %v524_v15  ;;  %v644_v19 = vsel %vm356_vm3, %v1143_v18, 0.0  ;;  %v659_v20 = vpop.permute.xlu1 %658  ;;  %v657_v21 = vpack.c.bf16 %v1143_v18, %v1143_v18  ;;  %1150 = vpow2.f32 %v764_v27 }
 0x415   : > { %645 = vadd.xlane.f32.xlu0 %v644_v19  ;;  %1083 = vmatpush3.bf16.msra.mxu0 %v659_v20  ;;  %1152 = vpow2.f32 %v631_v29 }
 0x416   : > { %1084 = vmatprep.mubr.msk.bf16.mxu0 %vm1187_vm1, %v1186_v0  ;;  %1094 = vmatprep.subr.bf16.mxu0 %v1186_v0 }
 0x418   : > { %v792_v22 = vpop.permute.xlu1 %791 }
 0x41b   : > { %v1145_v23 = vpop.eup %1144 }
 0x41c   : > { %1085 = vmatmul.mubr.msk.bf16.vlgmr.msra.gmra.mrb[8].mxu0 %vm356_vm3, %v657_v21  ;;  %v777_v25 = vsel %vm356_vm3, %v1145_v23, 0.0  ;;  %v790_v28 = vpack.c.bf16 %v1145_v23, %v1145_v23  ;;  %v1147_v14 = vpop.eup %1146 }
 0x41d   : > { %778 = vadd.xlane.f32.xlu1 %v777_v25  ;;  %1095 = vmatpush3.bf16.msra.mxu0 %v792_v22  ;;  %v1149_v16 = vpop.eup %1148 }
 0x41e   : > { %1096 = vmatprep.mubr.msk.bf16.mxu0 %vm1187_vm1, %v1186_v0  ;;  %v1151_v17 = vpop.eup %1150  ;;  %v373_v0 = vmul.f32 %v1147_v14, %v372_v31  ;;  %v510_v38 = vmul.f32 %v1149_v16, %v509_v37 }
 0x41f   : > { %v1153_v30 = vpop.eup %1152  ;;  %v776_v48 = vmul.f32 %v1151_v17, %v775_v46 }
 0x420   : > { %v643_v42 = vmul.f32 %v1153_v30, %v642_v41 }
 0x424   : > { %1097 = vmatmul.mubr.msk.bf16.vlgmr.msra.gmra.mrb[12].mxu0 %vm356_vm3, %v790_v28 }
 0x42b   : > { %383 = vperm.xlu0 %1134, %v1147_v14  }
 0x42e   : > { %520 = vperm.xlu1 %1135, %v1149_v16  }
 0x42f   : > { %786 = vperm.xlu0 %1134, %v1151_v17  }
 0x432   : > { %653 = vperm.xlu1 %1135, %v1153_v30  }
 0x44a   : > { %v376_v32 = vpop.xlane.xlu1 %375 }
 0x44b   : > { %v377_v34 = vadd.f32 %v376_v32, %v373_v0 }
 0x44d   : > { %379 = vst.msk [vmem:[#allocation3] sm:$0xff] %vm281_vm2, %v377_v34 }
 0x454   : > { %v844_v35 = vld [vmem:[#allocation3] sm:$0xff] }
 0x455   : > { %1154 = vrcp.f32 %v844_v35 }
 0x45f   : > { %v1155_v36 = vpop.eup %1154 }
 0x460   : > { %848 = vperm.xlu1 %1135, %v1155_v36  }
 0x49a   : > { %v513_v39 = vpop.xlane.xlu0 %512 }
 0x49b   : > { %v514_v40 = vadd.f32 %v513_v39, %v510_v38 }
 0x49d   : > { %515 = vst.msk [vmem:[#allocation3 + $0x8] sm:$0xff] %vm281_vm2, %v514_v40 }
 0x4a2   : > { %v646_v43 = vpop.xlane.xlu0 %645 }
 0x4a3   : > { %v647_v44 = vadd.f32 %v646_v43, %v643_v42 }
 0x4a4   : > { %v853_v45 = vld [vmem:[#allocation3 + $0x8] sm:$0xff] }
 0x4a5   : > { %648 = vst.msk [vmem:[#allocation3 + $0x10] sm:$0xff] %vm281_vm2, %v647_v44  ;;  %1156 = vrcp.f32 %v853_v45 }
 0x4aa   : > { %v779_v49 = vpop.xlane.xlu1 %778  ;;  %v384_v50 = vpop.permute.xlu0 %383 }
 0x4ab   : > { %v780_v51 = vadd.f32 %v779_v49, %v776_v48  ;;  %v386_v52 = vmul.f32 %v384_v50, %v380_v47 }
 0x4ac   : > { %v862_v53 = vld [vmem:[#allocation3 + $0x10] sm:$0xff] }
 0x4ad   : > { %781 = vst.msk [vmem:[#allocation3 + $0x18] sm:$0xff] %vm281_vm2, %v780_v51  ;;  %v437_v54 = vadd.f32 %v1324_v33, %v386_v52  ;;  %1158 = vrcp.f32 %v862_v53 }
 0x4ae   : > { %v521_v60 = vpop.permute.xlu1 %520  ;;  %v787_v12 = vpop.permute.xlu0 %786 }
 0x4af   : > { %v1157_v55 = vpop.eup %1156  ;;  %438 = vst.msk [vmem:[#allocation4] sm:$0xff] %vm290_vm0, %v437_v54  ;;  %v523_v61 = vmul.f32 %v521_v60, %v517_v59  ;;  %v789_v13 = vmul.f32 %v787_v12, %v783_v11 }
 0x4b0   : > { %857 = vperm.xlu0 %1134, %v1157_v55  }
 0x4b2   : > { %v654_v4 = vpop.permute.xlu1 %653 }
 0x4b3   : > { %v656_v5 = vmul.f32 %v654_v4, %v650_v3 }
 0x4b4   : > { %v871_v56 = vld [vmem:[#allocation3 + $0x18] sm:$0xff] }
 0x4b5   : > { %1160 = vrcp.f32 %v871_v56 }
 0x4b6   : > { %v843_v17 = vld [vmem:[#allocation4] sm:$0xff] }
 0x4b7   : > { %v1159_v57 = vpop.eup %1158 }
 0x4b8   : > { %866 = vperm.xlu1 %1135, %v1159_v57  }
 0x4bf   : > { %v1161_v58 = vpop.eup %1160 }
 0x4c0   : > { %875 = vperm.xlu0 %1134, %v1161_v58  }
 0x4df   : > { %v849_v25 = vpop.permute.xlu1 %848 }
 0x4e0   : > { %v851_v31 = vmul.f32 %v849_v25, %v843_v17 }
 0x4e7   : > { %v565_v62 = vpop.f32.mrb[4].mxu0 }
 0x4e8   : > { %v571_v63 = vadd.f32 %v565_v62, %v523_v61  ;;  %v1074_v1 = vpop.f32.mrb[5].mxu0 }
 0x4e9   : > { %v568_v2 = vpop.f32.mrb[6].mxu0 }
 0x4ea   : > { %572 = vst.msk [vmem:[#allocation4 + $0x8] sm:$0xff] %vm290_vm0, %v571_v63  ;;  %v1075_v33 = vpop.f32.mrb[7].mxu0 }
 0x4ef   : > { %v698_v6 = vpop.f32.mrb[8].mxu0 }
 0x4f0   : > { %v704_v7 = vadd.f32 %v698_v6, %v656_v5  ;;  %v1086_v8 = vpop.f32.mrb[9].mxu0 }
 0x4f1   : > { %v701_v9 = vpop.f32.mrb[10].mxu0  ;;  %v852_v23 = vld [vmem:[#allocation4 + $0x8] sm:$0xff] }
 0x4f2   : > { %705 = vst.msk [vmem:[#allocation4 + $0x10] sm:$0xff] %vm290_vm0, %v704_v7  ;;  %v1087_v10 = vpop.f32.mrb[11].mxu0 }
 0x4f7   : > { %v831_v15 = vpop.f32.mrb[12].mxu0 }
 0x4f8   : > { %v837_v18 = vadd.f32 %v831_v15, %v789_v13  ;;  %v1098_v19 = vpop.f32.mrb[13].mxu0 }
 0x4f9   : > { %v834_v20 = vpop.f32.mrb[14].mxu0  ;;  %v861_v27 = vld [vmem:[#allocation4 + $0x10] sm:$0xff] }
 0x4fa   : > { %838 = vst.msk [vmem:[#allocation4 + $0x18] sm:$0xff] %vm290_vm0, %v837_v18  ;;  %v1099_v21 = vpop.f32.mrb[15].mxu0 }
 0x501   : > { %v870_v14 = vld [vmem:[#allocation4 + $0x18] sm:$0xff] }
 0x52f   : > { %v858_v22 = vpop.permute.xlu0 %857 }
 0x530   : > { %v860_v24 = vmul.f32 %v858_v22, %v852_v23 }
 0x532   : > { %880 = vrot.lane.b32.xlu1 %v860_v24, %s1193_s30 }
 0x537   : > { %v867_v26 = vpop.permute.xlu1 %866 }
 0x538   : > { %v869_v28 = vmul.f32 %v867_v26, %v861_v27 }
 0x53a   : > { %884 = vrot.lane.b32.xlu0 %v869_v28, %s1194_s4 }
 0x53f   : > { %v876_v29 = vpop.permute.xlu0 %875 }
 0x540   : > { %v878_v16 = vmul.f32 %v876_v29, %v870_v14 }
 0x542   : > { %888 = vrot.lane.b32.xlu1 %v878_v16, %s1195_s5 }
 0x5a4   : > { %v881_v30 = vpop.permute.xlu1 %880 }
 0x5a5   : > { %v891_v32 = vsel %vm290_vm0, %v851_v31, %v881_v30 }
 0x5ac   : > { %v885_v0 = vpop.permute.xlu0 %884 }
 0x5ad   : > { %v892_v34 = vsel %vm356_vm3, %v891_v32, %v885_v0 }
 0x5b4   : > { %v889_v35 = vpop.permute.xlu1 %888 }
 0x5b5   : > { %v894_v36 = vsel %vm893_vm4, %v892_v34, %v889_v35 }
 0x5b6   : > { %v895_v37 = vpack.c.bf16 %v894_v36, %v894_v36 }
 0x5b8   : > { %897 = vst.msk [vmem:[%s275_s8] sm:$0xf] %vm896_vm5, %v895_v37 }
 0x5b9 PF: > { %s13_s14 = sadd.s32 1, %s1184_s14   ;;  %s1384_s12 = smov %s1180_s13 }
 0x5ba   : > { %p10_p5 = scmp.ge.s32.totalorder %s13_s14, 4   ;;  %s1385_s13 = smov %s1387_s15 }
 0x5bc   :  { %12 = sbr.rel (!%p10_p5) target bundleno = 2 (0x2), region = 85 }

</bundles_post_ra>
